<compile_context>
chip_gen: v6e
topology: v6e:2x2x1
jax: 0.10.0
libtpu: 0.0.40
codegen_flags: <defaults>
</compile_context>

<pallas_src>
import functools
import math

import jax
import jax.numpy as jnp
from jax.experimental import pallas as pl
from jax.experimental.pallas import tpu as pltpu


# ----------------------------------------------------------------------------
# Pallas kernels
# ----------------------------------------------------------------------------
def _matmul_bias_kernel(a_ref, b_ref, bias_ref, o_ref, *, relu):
    acc = jnp.dot(a_ref[...], b_ref[...], preferred_element_type=jnp.float32)
    acc = acc + bias_ref[...]
    if relu:
        acc = jnp.maximum(acc, 0.0)
    o_ref[...] = acc.astype(o_ref.dtype)


def matmul_bias(a, b, bias, relu, out_dtype=jnp.float32):
    """(M, K) @ (K, N) + bias, optional ReLU.

    No operand padding: K and N blocks span the full array extents; only M is
    tiled.  TM >= 512 for the large-M layers so the grid has multiple steps
    (megacore-friendly) and per-step overhead amortizes; partial last blocks
    are handled by Pallas (OOB rows are dropped on store)."""
    M, K = a.shape
    K2, N = b.shape
    assert K == K2 and bias.shape == (1, N)
    if M >= 1024:
        TM = 512
    elif M >= 256:
        TM = 256
    else:
        TM = M                       # full-extent block, grid of 1
    grid_m = pl.cdiv(M, TM)

    return pl.pallas_call(
        functools.partial(_matmul_bias_kernel, relu=relu),
        out_shape=jax.ShapeDtypeStruct((M, N), out_dtype),
        grid_spec=pltpu.PrefetchScalarGridSpec(
            num_scalar_prefetch=0,
            grid=(grid_m,),
            in_specs=[
                pl.BlockSpec((TM, K), lambda i: (i, 0)),
                pl.BlockSpec((K, N), lambda i: (0, 0)),
                pl.BlockSpec((1, N), lambda i: (0, 0)),
            ],
            out_specs=pl.BlockSpec((TM, N), lambda i: (i, 0)),
        ),
        compiler_params=pltpu.CompilerParams(
            dimension_semantics=("parallel",)),
    )(a, b, bias)


def _gauss_head_kernel(h_ref, wmu_ref, bmu_ref, wlv_ref, blv_ref, eps_ref,
                       mu_ref, logvar_ref, z_ref):
    # Fused: mu = h @ Wmu + bmu ; logvar = h @ Wlv + blv ;
    #        z = mu + eps * exp(0.5 * logvar)
    h = h_ref[...]
    mu = jnp.dot(h, wmu_ref[...], preferred_element_type=jnp.float32) + bmu_ref[...]
    lv = jnp.dot(h, wlv_ref[...], preferred_element_type=jnp.float32) + blv_ref[...]
    mu_ref[...] = mu
    logvar_ref[...] = lv
    z_ref[...] = mu + eps_ref[...] * jnp.exp(0.5 * lv)


def gauss_head(h, wmu, bmu, wlv, blv, eps):
    B = h.shape[0]
    Z = wmu.shape[1]
    shp = jax.ShapeDtypeStruct((B, Z), jnp.float32)
    return pl.pallas_call(
        _gauss_head_kernel,
        out_shape=(shp, shp, shp),
    )(h, wmu, bmu, wlv, blv, eps)


# ----------------------------------------------------------------------------
# Conv / ConvTranspose lowered to (NHWC) im2col + Pallas matmul
# ----------------------------------------------------------------------------
def conv2d_s2_k4_p1(x, wmat, bias, relu, out_dtype):
    """Conv2d(k=4, s=2, p=1) on NHWC x.  wmat: (16*Cin, Cout) bf16, rows
    ordered (kh, kw, ci)."""
    B, H, W, Cin = x.shape
    Cout = wmat.shape[1]
    Ho, Wo = H // 2, W // 2
    xp = jnp.pad(x.astype(wmat.dtype), ((0, 0), (1, 1), (1, 1), (0, 0)))
    taps = [xp[:, kh:kh + 2 * Ho:2, kw:kw + 2 * Wo:2, :]
            for kh in range(4) for kw in range(4)]
    patches = jnp.stack(taps, axis=3).reshape(B * Ho * Wo, 16 * Cin)
    out = matmul_bias(patches, wmat, bias, relu, out_dtype)
    return out.reshape(B, Ho, Wo, Cout)


def convT2d_s2_k4_p1(x, wmat, bias, relu, out_dtype):
    """ConvTranspose2d(k=4, s=2, p=1) on NHWC x via sub-pixel phase
    decomposition.  wmat: (4*Cin, 4*Cout) bf16; patch rows ordered
    (di, dj, ci), weight columns are the 4 output phases (ph, pw) block-wise."""
    B, H, W, Cin = x.shape
    Cout = wmat.shape[1] // 4
    xp = jnp.pad(x.astype(wmat.dtype), ((0, 0), (1, 1), (1, 1), (0, 0)))
    taps = [xp[:, di:di + H + 1, dj:dj + W + 1, :]
            for di in range(2) for dj in range(2)]
    patches = jnp.stack(taps, axis=3).reshape(B * (H + 1) * (W + 1), 4 * Cin)
    out = matmul_bias(patches, wmat, bias, relu, out_dtype)
    out = out.reshape(B, H + 1, W + 1, 4, Cout)
    # Interleave the 4 phases into the (2H, 2W) output grid.
    phases = [out[:, ph:ph + H, pw:pw + W, ph * 2 + pw, :]
              for ph in range(2) for pw in range(2)]
    y = jnp.stack(phases, axis=3).reshape(B, H, W, 2, 2, Cout)
    y = y.transpose(0, 1, 3, 2, 4, 5).reshape(B, 2 * H, 2 * W, Cout)
    return y


# ----------------------------------------------------------------------------
# Parameter construction (PyTorch layout) + one-time kernel-layout preparation
# ----------------------------------------------------------------------------
def _uniform(key, shape, fan_in):
    bound = 1.0 / math.sqrt(fan_in)
    return jax.random.uniform(key, shape, jnp.float32, -bound, bound)


def init_params(key, num_channels, hidden_dim, z_dim, u_dim):
    keys = iter(jax.random.split(key, 64))
    p = {}

    def conv(name, cin, cout):
        p[name + "_w"] = _uniform(next(keys), (cout, cin, 4, 4), cin * 16)
        p[name + "_b"] = _uniform(next(keys), (cout,), cin * 16)

    def convT(name, cin, cout):
        p[name + "_w"] = _uniform(next(keys), (cin, cout, 4, 4), cin * 16)
        p[name + "_b"] = _uniform(next(keys), (cout,), cin * 16)

    def lin(name, fin, fout):
        p[name + "_w"] = _uniform(next(keys), (fout, fin), fin)
        p[name + "_b"] = _uniform(next(keys), (fout,), fin)

    # Encoder
    conv("enc_conv1", num_channels, 32)
    conv("enc_conv2", 32, 32)
    conv("enc_conv3", 32, 64)
    conv("enc_conv4", 64, 64)
    lin("enc_lin1", 64 * 4 * 4 + u_dim, hidden_dim)
    lin("enc_mu", hidden_dim, z_dim)
    lin("enc_logvar", hidden_dim, z_dim)
    # Decoder
    lin("dec_lin1", z_dim, hidden_dim)
    lin("dec_lin2", hidden_dim, 64 * 4 * 4)
    convT("dec_convT1", 64, 64)
    convT("dec_convT2", 64, 32)
    convT("dec_convT3", 32, 32)
    convT("dec_convT4", 32, num_channels)
    return p
    # TODO(synk): groundtruthfactor_learner is not exercised by SSIDVAE.forward(); omitted.


def prepare_params(p, u_dim):
    """One-time transforms: conv->im2col matrices, convT->phase matrices,
    Linear transposes, NHWC flatten permutations, bf16 weight casts."""
    q = {}

    def conv_mat(w):                       # (Cout, Cin, 4, 4) -> (16*Cin, Cout)
        cout = w.shape[0]
        return w.transpose(2, 3, 1, 0).reshape(-1, cout).astype(jnp.bfloat16)

    def convT_mat(w):                      # (Cin, Cout, 4, 4) -> (4*Cin, 4*Cout)
        cin, cout = w.shape[0], w.shape[1]
        cols = []
        for ph in range(2):
            for pw in range(2):
                wp = w[:, :, (3 - ph, 1 - ph), :][:, :, :, (3 - pw, 1 - pw)]
                wp = wp.transpose(2, 3, 0, 1).reshape(4 * cin, cout)
                cols.append(wp)
        return jnp.concatenate(cols, axis=1).astype(jnp.bfloat16)

    for name in ["enc_conv1", "enc_conv2", "enc_conv3", "enc_conv4"]:
        q[name + "_w"] = conv_mat(p[name + "_w"])
        q[name + "_b"] = p[name + "_b"].reshape(1, -1)

    for name in ["dec_convT1", "dec_convT2", "dec_convT3", "dec_convT4"]:
        q[name + "_w"] = convT_mat(p[name + "_w"])
        q[name + "_b"] = jnp.tile(p[name + "_b"], 4).reshape(1, -1)

    # enc_lin1: permute its conv-input rows from NCHW-flatten to NHWC-flatten.
    w = p["enc_lin1_w"]                                  # (hidden, 1024 + u)
    hid = w.shape[0]
    wc = w[:, :64 * 16].reshape(hid, 64, 4, 4)           # (hid, c, h, w)
    wc = wc.transpose(2, 3, 1, 0).reshape(64 * 16, hid)  # rows (h, w, c)
    wu = w[:, 64 * 16:].T                                # (u_dim, hid)
    q["enc_lin1_w"] = jnp.concatenate([wc, wu], axis=0)
    q["enc_lin1_b"] = p["enc_lin1_b"].reshape(1, -1)

    for name in ["enc_mu", "enc_logvar", "dec_lin1"]:
        q[name + "_w"] = p[name + "_w"].T
        q[name + "_b"] = p[name + "_b"].reshape(1, -1)

    # dec_lin2: permute output columns so the result is already NHWC-flattened.
    w = p["dec_lin2_w"]                                  # (1024, hidden)
    w = w.reshape(64, 4, 4, -1).transpose(1, 2, 0, 3).reshape(64 * 16, -1)
    q["dec_lin2_w"] = w.T                                # (hidden, 1024) cols (h,w,c)
    q["dec_lin2_b"] = (p["dec_lin2_b"].reshape(64, 4, 4)
                       .transpose(1, 2, 0).reshape(1, -1))
    return q


# ----------------------------------------------------------------------------
# SSIDVAE forward
# ----------------------------------------------------------------------------
def ssidvae_forward(params, x, u, eps):
    B = x.shape[0]
    bf16 = jnp.bfloat16
    f32 = jnp.float32

    # ---- Encoder (NHWC) ----
    h = jnp.transpose(x, (0, 2, 3, 1))
    h = conv2d_s2_k4_p1(h, params["enc_conv1_w"], params["enc_conv1_b"], True, bf16)
    h = conv2d_s2_k4_p1(h, params["enc_conv2_w"], params["enc_conv2_b"], True, bf16)
    h = conv2d_s2_k4_p1(h, params["enc_conv3_w"], params["enc_conv3_b"], True, bf16)
    h = conv2d_s2_k4_p1(h, params["enc_conv4_w"], params["enc_conv4_b"], True, f32)
    h = h.reshape(B, -1)                      # NHWC flatten; enc_lin1 rows pre-permuted
    h = jnp.concatenate([h, u], axis=1)
    h = matmul_bias(h, params["enc_lin1_w"], params["enc_lin1_b"], True, f32)

    # Fused mu / logvar / reparametrize (forward() re-samples z from mu,logvar).
    mu, logvar, z = gauss_head(h, params["enc_mu_w"], params["enc_mu_b"],
                               params["enc_logvar_w"], params["enc_logvar_b"], eps)

    # ---- Decoder (NHWC) ----
    d = matmul_bias(z, params["dec_lin1_w"], params["dec_lin1_b"], True, f32)
    d = matmul_bias(d, params["dec_lin2_w"], params["dec_lin2_b"], True, bf16)
    d = d.reshape(B, 4, 4, 64)                # NHWC (dec_lin2 cols pre-permuted)
    d = convT2d_s2_k4_p1(d, params["dec_convT1_w"], params["dec_convT1_b"], True, bf16)
    d = convT2d_s2_k4_p1(d, params["dec_convT2_w"], params["dec_convT2_b"], True, bf16)
    d = convT2d_s2_k4_p1(d, params["dec_convT3_w"], params["dec_convT3_b"], True, bf16)
    out = convT2d_s2_k4_p1(d, params["dec_convT4_w"], params["dec_convT4_b"], False, f32)
    out = jnp.transpose(out, (0, 3, 1, 2))    # back to NCHW
    return out, z, mu, logvar


if __name__ == "__main__":
    # Spatial must be 64x64 so the 64*4*4 flatten matches the module.
    num_channels, hidden_dim, z_dim, u_dim = 3, 32, 10, 5
    batch = 2

    key = jax.random.PRNGKey(0)
    k_params, k_x, k_u, k_eps = jax.random.split(key, 4)

    torch_layout_params = init_params(k_params, num_channels, hidden_dim, z_dim, u_dim)
    params = prepare_params(torch_layout_params, u_dim)   # one-time weight prep

    x = jax.random.normal(k_x, (batch, num_channels, 64, 64), jnp.float32)
    u = jax.random.normal(k_u, (batch, u_dim), jnp.float32)
    eps = jax.random.normal(k_eps, (batch, z_dim), jnp.float32)

    out, z, mu, logvar = jax.jit(ssidvae_forward)(params, x, u, eps)
    jax.block_until_ready((out, z, mu, logvar))

    assert out.shape == (batch, num_channels, 64, 64)
    assert z.shape == (batch, z_dim)
    assert mu.shape == (batch, z_dim)
    assert logvar.shape == (batch, z_dim)
    print("KERNEL_OK")
</pallas_src>

<mosaic_0001>
module attributes {stable_mosaic.version = 11 : i64} {
  func.func @_matmul_bias_kernel(%arg0: i32, %arg1: memref<512x48xbf16, #tpu.memory_space<vmem>>, %arg2: memref<48x32xbf16, #tpu.memory_space<vmem>>, %arg3: memref<1x32xf32, #tpu.memory_space<vmem>>, %arg4: memref<512x32xbf16, #tpu.memory_space<vmem>>) attributes {dimension_semantics = [#tpu.dimension_semantics<parallel>], iteration_bounds = array<i64: 4>, scalar_prefetch = 0 : i64, scratch_operands = 0 : i64, tpu.core_type = #tpu.core_type<tc>, window_params = [{transform_indices = @transform_0, window_bounds = array<i64: 512, 48>}, {pipeline_mode = #tpu.pipeline_mode<synchronous>, transform_indices = @transform_1, window_bounds = array<i64: 48, 32>}, {pipeline_mode = #tpu.pipeline_mode<synchronous>, transform_indices = @transform_2, window_bounds = array<i64: 1, 32>}, {transform_indices = @transform_3, window_bounds = array<i64: 512, 32>}]} {
    %c0 = arith.constant 0 : index
    %c0_0 = arith.constant 0 : index
    %0 = vector.load %arg1[%c0, %c0_0] : memref<512x48xbf16, #tpu.memory_space<vmem>>, vector<512x48xbf16>
    %c0_1 = arith.constant 0 : index
    %c0_2 = arith.constant 0 : index
    %1 = vector.load %arg2[%c0_1, %c0_2] : memref<48x32xbf16, #tpu.memory_space<vmem>>, vector<48x32xbf16>
    %cst = arith.constant dense<0.000000e+00> : vector<512x32xf32>
    %2 = tpu.matmul %0, %1, %cst {dimension_numbers = #tpu.dot_dimension_numbers<[1], [0], [0], [1], [0, 0, 1, 1], [], []>} : vector<512x48xbf16>, vector<48x32xbf16>, vector<512x32xf32> -> vector<512x32xf32>
    %c0_3 = arith.constant 0 : index
    %c0_4 = arith.constant 0 : index
    %3 = vector.load %arg3[%c0_3, %c0_4] : memref<1x32xf32, #tpu.memory_space<vmem>>, vector<1x32xf32>
    %4 = vector.broadcast %3 : vector<1x32xf32> to vector<512x32xf32>
    %5 = arith.addf %2, %4 : vector<512x32xf32>
    %cst_5 = arith.constant 0.000000e+00 : f32
    %6 = vector.broadcast %cst_5 : f32 to vector<512x32xf32>
    %7 = arith.maximumf %5, %6 : vector<512x32xf32>
    %8 = arith.truncf %7 : vector<512x32xf32> to vector<512x32xbf16>
    %c0_6 = arith.constant 0 : index
    %c0_7 = arith.constant 0 : index
    %9 = vector.load %arg4[%c0_6, %c0_7] : memref<512x32xbf16, #tpu.memory_space<vmem>>, vector<512x32xbf16>
    tpu.vector_store %arg4[%c0_6, %c0_7], %8 {strides = array<i32>} : memref<512x32xbf16, #tpu.memory_space<vmem>>, vector<512x32xbf16>,
    return
  }
  func.func @transform_0(%arg0: i32) -> (i32, i32) {
    %c0_i32 = arith.constant 0 : i32
    %c0_i32_0 = arith.constant 0 : i32
    return %arg0, %c0_i32 : i32, i32
  }
  func.func @transform_1(%arg0: i32) -> (i32, i32) {
    %c0_i32 = arith.constant 0 : i32
    %c0_i32_0 = arith.constant 0 : i32
    %c0_i32_1 = arith.constant 0 : i32
    return %c0_i32, %c0_i32_0 : i32, i32
  }
  func.func @transform_2(%arg0: i32) -> (i32, i32) {
    %c0_i32 = arith.constant 0 : i32
    %c0_i32_0 = arith.constant 0 : i32
    %c0_i32_1 = arith.constant 0 : i32
    return %c0_i32, %c0_i32_0 : i32, i32
  }
  func.func @transform_3(%arg0: i32) -> (i32, i32) {
    %c0_i32 = arith.constant 0 : i32
    %c0_i32_0 = arith.constant 0 : i32
    return %arg0, %c0_i32 : i32, i32
  }
}

module attributes {stable_mosaic.version = 11 : i64} {
  func.func @_matmul_bias_kernel(%arg0: i32, %arg1: memref<256x512xbf16, #tpu.memory_space<vmem>>, %arg2: memref<512x32xbf16, #tpu.memory_space<vmem>>, %arg3: memref<1x32xf32, #tpu.memory_space<vmem>>, %arg4: memref<256x32xbf16, #tpu.memory_space<vmem>>) attributes {dimension_semantics = [#tpu.dimension_semantics<parallel>], iteration_bounds = array<i64: 2>, scalar_prefetch = 0 : i64, scratch_operands = 0 : i64, tpu.core_type = #tpu.core_type<tc>, window_params = [{transform_indices = @transform_0, window_bounds = array<i64: 256, 512>}, {pipeline_mode = #tpu.pipeline_mode<synchronous>, transform_indices = @transform_1, window_bounds = array<i64: 512, 32>}, {pipeline_mode = #tpu.pipeline_mode<synchronous>, transform_indices = @transform_2, window_bounds = array<i64: 1, 32>}, {transform_indices = @transform_3, window_bounds = array<i64: 256, 32>}]} {
    %c0 = arith.constant 0 : index
    %c0_0 = arith.constant 0 : index
    %0 = vector.load %arg1[%c0, %c0_0] : memref<256x512xbf16, #tpu.memory_space<vmem>>, vector<256x512xbf16>
    %c0_1 = arith.constant 0 : index
    %c0_2 = arith.constant 0 : index
    %1 = vector.load %arg2[%c0_1, %c0_2] : memref<512x32xbf16, #tpu.memory_space<vmem>>, vector<512x32xbf16>
    %cst = arith.constant dense<0.000000e+00> : vector<256x32xf32>
    %2 = tpu.matmul %0, %1, %cst {dimension_numbers = #tpu.dot_dimension_numbers<[1], [0], [0], [1], [0, 0, 1, 1], [], []>} : vector<256x512xbf16>, vector<512x32xbf16>, vector<256x32xf32> -> vector<256x32xf32>
    %c0_3 = arith.constant 0 : index
    %c0_4 = arith.constant 0 : index
    %3 = vector.load %arg3[%c0_3, %c0_4] : memref<1x32xf32, #tpu.memory_space<vmem>>, vector<1x32xf32>
    %4 = vector.broadcast %3 : vector<1x32xf32> to vector<256x32xf32>
    %5 = arith.addf %2, %4 : vector<256x32xf32>
    %cst_5 = arith.constant 0.000000e+00 : f32
    %6 = vector.broadcast %cst_5 : f32 to vector<256x32xf32>
    %7 = arith.maximumf %5, %6 : vector<256x32xf32>
    %8 = arith.truncf %7 : vector<256x32xf32> to vector<256x32xbf16>
    %c0_6 = arith.constant 0 : index
    %c0_7 = arith.constant 0 : index
    %9 = vector.load %arg4[%c0_6, %c0_7] : memref<256x32xbf16, #tpu.memory_space<vmem>>, vector<256x32xbf16>
    tpu.vector_store %arg4[%c0_6, %c0_7], %8 {strides = array<i32>} : memref<256x32xbf16, #tpu.memory_space<vmem>>, vector<256x32xbf16>,
    return
  }
  func.func @transform_0(%arg0: i32) -> (i32, i32) {
    %c0_i32 = arith.constant 0 : i32
    %c0_i32_0 = arith.constant 0 : i32
    return %arg0, %c0_i32 : i32, i32
  }
  func.func @transform_1(%arg0: i32) -> (i32, i32) {
    %c0_i32 = arith.constant 0 : i32
    %c0_i32_0 = arith.constant 0 : i32
    %c0_i32_1 = arith.constant 0 : i32
    return %c0_i32, %c0_i32_0 : i32, i32
  }
  func.func @transform_2(%arg0: i32) -> (i32, i32) {
    %c0_i32 = arith.constant 0 : i32
    %c0_i32_0 = arith.constant 0 : i32
    %c0_i32_1 = arith.constant 0 : i32
    return %c0_i32, %c0_i32_0 : i32, i32
  }
  func.func @transform_3(%arg0: i32) -> (i32, i32) {
    %c0_i32 = arith.constant 0 : i32
    %c0_i32_0 = arith.constant 0 : i32
    return %arg0, %c0_i32 : i32, i32
  }
}

module attributes {stable_mosaic.version = 11 : i64} {
  func.func @_matmul_bias_kernel(%arg0: i32, %arg1: memref<128x512xbf16, #tpu.memory_space<vmem>>, %arg2: memref<512x64xbf16, #tpu.memory_space<vmem>>, %arg3: memref<1x64xf32, #tpu.memory_space<vmem>>, %arg4: memref<128x64xbf16, #tpu.memory_space<vmem>>) attributes {dimension_semantics = [#tpu.dimension_semantics<parallel>], iteration_bounds = array<i64: 1>, scalar_prefetch = 0 : i64, scratch_operands = 0 : i64, tpu.core_type = #tpu.core_type<tc>, window_params = [{transform_indices = @transform_0, window_bounds = array<i64: 128, 512>}, {pipeline_mode = #tpu.pipeline_mode<synchronous>, transform_indices = @transform_1, window_bounds = array<i64: 512, 64>}, {pipeline_mode = #tpu.pipeline_mode<synchronous>, transform_indices = @transform_2, window_bounds = array<i64: 1, 64>}, {transform_indices = @transform_3, window_bounds = array<i64: 128, 64>}]} {
    %c0 = arith.constant 0 : index
    %c0_0 = arith.constant 0 : index
    %0 = vector.load %arg1[%c0, %c0_0] : memref<128x512xbf16, #tpu.memory_space<vmem>>, vector<128x512xbf16>
    %c0_1 = arith.constant 0 : index
    %c0_2 = arith.constant 0 : index
    %1 = vector.load %arg2[%c0_1, %c0_2] : memref<512x64xbf16, #tpu.memory_space<vmem>>, vector<512x64xbf16>
    %cst = arith.constant dense<0.000000e+00> : vector<128x64xf32>
    %2 = tpu.matmul %0, %1, %cst {dimension_numbers = #tpu.dot_dimension_numbers<[1], [0], [0], [1], [0, 0, 1, 1], [], []>} : vector<128x512xbf16>, vector<512x64xbf16>, vector<128x64xf32> -> vector<128x64xf32>
    %c0_3 = arith.constant 0 : index
    %c0_4 = arith.constant 0 : index
    %3 = vector.load %arg3[%c0_3, %c0_4] : memref<1x64xf32, #tpu.memory_space<vmem>>, vector<1x64xf32>
    %4 = vector.broadcast %3 : vector<1x64xf32> to vector<128x64xf32>
    %5 = arith.addf %2, %4 : vector<128x64xf32>
    %cst_5 = arith.constant 0.000000e+00 : f32
    %6 = vector.broadcast %cst_5 : f32 to vector<128x64xf32>
    %7 = arith.maximumf %5, %6 : vector<128x64xf32>
    %8 = arith.truncf %7 : vector<128x64xf32> to vector<128x64xbf16>
    %c0_6 = arith.constant 0 : index
    %c0_7 = arith.constant 0 : index
    %9 = vector.load %arg4[%c0_6, %c0_7] : memref<128x64xbf16, #tpu.memory_space<vmem>>, vector<128x64xbf16>
    tpu.vector_store %arg4[%c0_6, %c0_7], %8 {strides = array<i32>} : memref<128x64xbf16, #tpu.memory_space<vmem>>, vector<128x64xbf16>,
    return
  }
  func.func @transform_0(%arg0: i32) -> (i32, i32) {
    %c0_i32 = arith.constant 0 : i32
    %c0_i32_0 = arith.constant 0 : i32
    return %arg0, %c0_i32 : i32, i32
  }
  func.func @transform_1(%arg0: i32) -> (i32, i32) {
    %c0_i32 = arith.constant 0 : i32
    %c0_i32_0 = arith.constant 0 : i32
    %c0_i32_1 = arith.constant 0 : i32
    return %c0_i32, %c0_i32_0 : i32, i32
  }
  func.func @transform_2(%arg0: i32) -> (i32, i32) {
    %c0_i32 = arith.constant 0 : i32
    %c0_i32_0 = arith.constant 0 : i32
    %c0_i32_1 = arith.constant 0 : i32
    return %c0_i32, %c0_i32_0 : i32, i32
  }
  func.func @transform_3(%arg0: i32) -> (i32, i32) {
    %c0_i32 = arith.constant 0 : i32
    %c0_i32_0 = arith.constant 0 : i32
    return %arg0, %c0_i32 : i32, i32
  }
}

module attributes {stable_mosaic.version = 11 : i64} {
  func.func @_matmul_bias_kernel(%arg0: i32, %arg1: memref<32x1024xbf16, #tpu.memory_space<vmem>>, %arg2: memref<1024x64xbf16, #tpu.memory_space<vmem>>, %arg3: memref<1x64xf32, #tpu.memory_space<vmem>>, %arg4: memref<32x64xf32, #tpu.memory_space<vmem>>) attributes {dimension_semantics = [#tpu.dimension_semantics<parallel>], iteration_bounds = array<i64: 1>, scalar_prefetch = 0 : i64, scratch_operands = 0 : i64, tpu.core_type = #tpu.core_type<tc>, window_params = [{transform_indices = @transform_0, window_bounds = array<i64: 32, 1024>}, {pipeline_mode = #tpu.pipeline_mode<synchronous>, transform_indices = @transform_1, window_bounds = array<i64: 1024, 64>}, {pipeline_mode = #tpu.pipeline_mode<synchronous>, transform_indices = @transform_2, window_bounds = array<i64: 1, 64>}, {transform_indices = @transform_3, window_bounds = array<i64: 32, 64>}]} {
    %c0 = arith.constant 0 : index
    %c0_0 = arith.constant 0 : index
    %0 = vector.load %arg1[%c0, %c0_0] : memref<32x1024xbf16, #tpu.memory_space<vmem>>, vector<32x1024xbf16>
    %c0_1 = arith.constant 0 : index
    %c0_2 = arith.constant 0 : index
    %1 = vector.load %arg2[%c0_1, %c0_2] : memref<1024x64xbf16, #tpu.memory_space<vmem>>, vector<1024x64xbf16>
    %cst = arith.constant dense<0.000000e+00> : vector<32x64xf32>
    %2 = tpu.matmul %0, %1, %cst {dimension_numbers = #tpu.dot_dimension_numbers<[1], [0], [0], [1], [0, 0, 1, 1], [], []>} : vector<32x1024xbf16>, vector<1024x64xbf16>, vector<32x64xf32> -> vector<32x64xf32>
    %c0_3 = arith.constant 0 : index
    %c0_4 = arith.constant 0 : index
    %3 = vector.load %arg3[%c0_3, %c0_4] : memref<1x64xf32, #tpu.memory_space<vmem>>, vector<1x64xf32>
    %4 = vector.broadcast %3 : vector<1x64xf32> to vector<32x64xf32>
    %5 = arith.addf %2, %4 : vector<32x64xf32>
    %cst_5 = arith.constant 0.000000e+00 : f32
    %6 = vector.broadcast %cst_5 : f32 to vector<32x64xf32>
    %7 = arith.maximumf %5, %6 : vector<32x64xf32>
    %c0_6 = arith.constant 0 : index
    %c0_7 = arith.constant 0 : index
    %8 = vector.load %arg4[%c0_6, %c0_7] : memref<32x64xf32, #tpu.memory_space<vmem>>, vector<32x64xf32>
    tpu.vector_store %arg4[%c0_6, %c0_7], %7 {strides = array<i32>} : memref<32x64xf32, #tpu.memory_space<vmem>>, vector<32x64xf32>,
    return
  }
  func.func @transform_0(%arg0: i32) -> (i32, i32) {
    %c0_i32 = arith.constant 0 : i32
    %c0_i32_0 = arith.constant 0 : i32
    return %arg0, %c0_i32 : i32, i32
  }
  func.func @transform_1(%arg0: i32) -> (i32, i32) {
    %c0_i32 = arith.constant 0 : i32
    %c0_i32_0 = arith.constant 0 : i32
    %c0_i32_1 = arith.constant 0 : i32
    return %c0_i32, %c0_i32_0 : i32, i32
  }
  func.func @transform_2(%arg0: i32) -> (i32, i32) {
    %c0_i32 = arith.constant 0 : i32
    %c0_i32_0 = arith.constant 0 : i32
    %c0_i32_1 = arith.constant 0 : i32
    return %c0_i32, %c0_i32_0 : i32, i32
  }
  func.func @transform_3(%arg0: i32) -> (i32, i32) {
    %c0_i32 = arith.constant 0 : i32
    %c0_i32_0 = arith.constant 0 : i32
    return %arg0, %c0_i32 : i32, i32
  }
}

module attributes {stable_mosaic.version = 11 : i64} {
  func.func @_matmul_bias_kernel(%arg0: i32, %arg1: memref<2x1029xf32, #tpu.memory_space<vmem>>, %arg2: memref<1029x32xf32, #tpu.memory_space<vmem>>, %arg3: memref<1x32xf32, #tpu.memory_space<vmem>>, %arg4: memref<2x32xf32, #tpu.memory_space<vmem>>) attributes {dimension_semantics = [#tpu.dimension_semantics<parallel>], iteration_bounds = array<i64: 1>, scalar_prefetch = 0 : i64, scratch_operands = 0 : i64, tpu.core_type = #tpu.core_type<tc>, window_params = [{transform_indices = @transform_0, window_bounds = array<i64: 2, 1029>}, {pipeline_mode = #tpu.pipeline_mode<synchronous>, transform_indices = @transform_1, window_bounds = array<i64: 1029, 32>}, {pipeline_mode = #tpu.pipeline_mode<synchronous>, transform_indices = @transform_2, window_bounds = array<i64: 1, 32>}, {transform_indices = @transform_3, window_bounds = array<i64: 2, 32>}]} {
    %c0 = arith.constant 0 : index
    %c0_0 = arith.constant 0 : index
    %0 = vector.load %arg1[%c0, %c0_0] : memref<2x1029xf32, #tpu.memory_space<vmem>>, vector<2x1029xf32>
    %c0_1 = arith.constant 0 : index
    %c0_2 = arith.constant 0 : index
    %1 = vector.load %arg2[%c0_1, %c0_2] : memref<1029x32xf32, #tpu.memory_space<vmem>>, vector<1029x32xf32>
    %cst = arith.constant dense<0.000000e+00> : vector<2x32xf32>
    %2 = tpu.matmul %0, %1, %cst {dimension_numbers = #tpu.dot_dimension_numbers<[1], [0], [0], [1], [0, 0, 1, 1], [], []>} : vector<2x1029xf32>, vector<1029x32xf32>, vector<2x32xf32> -> vector<2x32xf32>
    %c0_3 = arith.constant 0 : index
    %c0_4 = arith.constant 0 : index
    %3 = vector.load %arg3[%c0_3, %c0_4] : memref<1x32xf32, #tpu.memory_space<vmem>>, vector<1x32xf32>
    %4 = vector.broadcast %3 : vector<1x32xf32> to vector<2x32xf32>
    %5 = arith.addf %2, %4 : vector<2x32xf32>
    %cst_5 = arith.constant 0.000000e+00 : f32
    %6 = vector.broadcast %cst_5 : f32 to vector<2x32xf32>
    %7 = arith.maximumf %5, %6 : vector<2x32xf32>
    %c0_6 = arith.constant 0 : index
    %c0_7 = arith.constant 0 : index
    %8 = vector.load %arg4[%c0_6, %c0_7] : memref<2x32xf32, #tpu.memory_space<vmem>>, vector<2x32xf32>
    tpu.vector_store %arg4[%c0_6, %c0_7], %7 {strides = array<i32>} : memref<2x32xf32, #tpu.memory_space<vmem>>, vector<2x32xf32>,
    return
  }
  func.func @transform_0(%arg0: i32) -> (i32, i32) {
    %c0_i32 = arith.constant 0 : i32
    %c0_i32_0 = arith.constant 0 : i32
    return %arg0, %c0_i32 : i32, i32
  }
  func.func @transform_1(%arg0: i32) -> (i32, i32) {
    %c0_i32 = arith.constant 0 : i32
    %c0_i32_0 = arith.constant 0 : i32
    %c0_i32_1 = arith.constant 0 : i32
    return %c0_i32, %c0_i32_0 : i32, i32
  }
  func.func @transform_2(%arg0: i32) -> (i32, i32) {
    %c0_i32 = arith.constant 0 : i32
    %c0_i32_0 = arith.constant 0 : i32
    %c0_i32_1 = arith.constant 0 : i32
    return %c0_i32, %c0_i32_0 : i32, i32
  }
  func.func @transform_3(%arg0: i32) -> (i32, i32) {
    %c0_i32 = arith.constant 0 : i32
    %c0_i32_0 = arith.constant 0 : i32
    return %arg0, %c0_i32 : i32, i32
  }
}

module attributes {stable_mosaic.version = 11 : i64} {
  func.func @_gauss_head_kernel(%arg0: memref<2x32xf32, #tpu.memory_space<vmem>>, %arg1: memref<32x10xf32, #tpu.memory_space<vmem>>, %arg2: memref<1x10xf32, #tpu.memory_space<vmem>>, %arg3: memref<32x10xf32, #tpu.memory_space<vmem>>, %arg4: memref<1x10xf32, #tpu.memory_space<vmem>>, %arg5: memref<2x10xf32, #tpu.memory_space<vmem>>, %arg6: memref<2x10xf32, #tpu.memory_space<vmem>>, %arg7: memref<2x10xf32, #tpu.memory_space<vmem>>, %arg8: memref<2x10xf32, #tpu.memory_space<vmem>>) attributes {dimension_semantics = [], scalar_prefetch = 0 : i64, scratch_operands = 0 : i64, tpu.core_type = #tpu.core_type<tc>} {
    %c0 = arith.constant 0 : index
    %c0_0 = arith.constant 0 : index
    %0 = vector.load %arg0[%c0, %c0_0] : memref<2x32xf32, #tpu.memory_space<vmem>>, vector<2x32xf32>
    %c0_1 = arith.constant 0 : index
    %c0_2 = arith.constant 0 : index
    %1 = vector.load %arg1[%c0_1, %c0_2] : memref<32x10xf32, #tpu.memory_space<vmem>>, vector<32x10xf32>
    %cst = arith.constant dense<0.000000e+00> : vector<2x10xf32>
    %2 = tpu.matmul %0, %1, %cst {dimension_numbers = #tpu.dot_dimension_numbers<[1], [0], [0], [1], [0, 0, 1, 1], [], []>} : vector<2x32xf32>, vector<32x10xf32>, vector<2x10xf32> -> vector<2x10xf32>
    %c0_3 = arith.constant 0 : index
    %c0_4 = arith.constant 0 : index
    %3 = vector.load %arg2[%c0_3, %c0_4] : memref<1x10xf32, #tpu.memory_space<vmem>>, vector<1x10xf32>
    %4 = vector.broadcast %3 : vector<1x10xf32> to vector<2x10xf32>
    %5 = arith.addf %2, %4 : vector<2x10xf32>
    %c0_5 = arith.constant 0 : index
    %c0_6 = arith.constant 0 : index
    %6 = vector.load %arg3[%c0_5, %c0_6] : memref<32x10xf32, #tpu.memory_space<vmem>>, vector<32x10xf32>
    %cst_7 = arith.constant dense<0.000000e+00> : vector<2x10xf32>
    %7 = tpu.matmul %0, %6, %cst_7 {dimension_numbers = #tpu.dot_dimension_numbers<[1], [0], [0], [1], [0, 0, 1, 1], [], []>} : vector<2x32xf32>, vector<32x10xf32>, vector<2x10xf32> -> vector<2x10xf32>
    %c0_8 = arith.constant 0 : index
    %c0_9 = arith.constant 0 : index
    %8 = vector.load %arg4[%c0_8, %c0_9] : memref<1x10xf32, #tpu.memory_space<vmem>>, vector<1x10xf32>
    %9 = vector.broadcast %8 : vector<1x10xf32> to vector<2x10xf32>
    %10 = arith.addf %7, %9 : vector<2x10xf32>
    %c0_10 = arith.constant 0 : index
    %c0_11 = arith.constant 0 : index
    %11 = vector.load %arg6[%c0_10, %c0_11] : memref<2x10xf32, #tpu.memory_space<vmem>>, vector<2x10xf32>
    tpu.vector_store %arg6[%c0_10, %c0_11], %5 {strides = array<i32>} : memref<2x10xf32, #tpu.memory_space<vmem>>, vector<2x10xf32>,
    %c0_12 = arith.constant 0 : index
    %c0_13 = arith.constant 0 : index
    %12 = vector.load %arg7[%c0_12, %c0_13] : memref<2x10xf32, #tpu.memory_space<vmem>>, vector<2x10xf32>
    tpu.vector_store %arg7[%c0_12, %c0_13], %10 {strides = array<i32>} : memref<2x10xf32, #tpu.memory_space<vmem>>, vector<2x10xf32>,
    %c0_14 = arith.constant 0 : index
    %c0_15 = arith.constant 0 : index
    %13 = vector.load %arg5[%c0_14, %c0_15] : memref<2x10xf32, #tpu.memory_space<vmem>>, vector<2x10xf32>
    %cst_16 = arith.constant 5.000000e-01 : f32
    %14 = vector.broadcast %cst_16 : f32 to vector<2x10xf32>
    %15 = arith.mulf %14, %10 : vector<2x10xf32>
    %16 = math.exp %15 : vector<2x10xf32>
    %17 = arith.mulf %13, %16 : vector<2x10xf32>
    %18 = arith.addf %5, %17 : vector<2x10xf32>
    %c0_17 = arith.constant 0 : index
    %c0_18 = arith.constant 0 : index
    %19 = vector.load %arg8[%c0_17, %c0_18] : memref<2x10xf32, #tpu.memory_space<vmem>>, vector<2x10xf32>
    tpu.vector_store %arg8[%c0_17, %c0_18], %18 {strides = array<i32>} : memref<2x10xf32, #tpu.memory_space<vmem>>, vector<2x10xf32>,
    return
  }
}

module attributes {stable_mosaic.version = 11 : i64} {
  func.func @_matmul_bias_kernel(%arg0: i32, %arg1: memref<2x10xf32, #tpu.memory_space<vmem>>, %arg2: memref<10x32xf32, #tpu.memory_space<vmem>>, %arg3: memref<1x32xf32, #tpu.memory_space<vmem>>, %arg4: memref<2x32xf32, #tpu.memory_space<vmem>>) attributes {dimension_semantics = [#tpu.dimension_semantics<parallel>], iteration_bounds = array<i64: 1>, scalar_prefetch = 0 : i64, scratch_operands = 0 : i64, tpu.core_type = #tpu.core_type<tc>, window_params = [{transform_indices = @transform_0, window_bounds = array<i64: 2, 10>}, {pipeline_mode = #tpu.pipeline_mode<synchronous>, transform_indices = @transform_1, window_bounds = array<i64: 10, 32>}, {pipeline_mode = #tpu.pipeline_mode<synchronous>, transform_indices = @transform_2, window_bounds = array<i64: 1, 32>}, {transform_indices = @transform_3, window_bounds = array<i64: 2, 32>}]} {
    %c0 = arith.constant 0 : index
    %c0_0 = arith.constant 0 : index
    %0 = vector.load %arg1[%c0, %c0_0] : memref<2x10xf32, #tpu.memory_space<vmem>>, vector<2x10xf32>
    %c0_1 = arith.constant 0 : index
    %c0_2 = arith.constant 0 : index
    %1 = vector.load %arg2[%c0_1, %c0_2] : memref<10x32xf32, #tpu.memory_space<vmem>>, vector<10x32xf32>
    %cst = arith.constant dense<0.000000e+00> : vector<2x32xf32>
    %2 = tpu.matmul %0, %1, %cst {dimension_numbers = #tpu.dot_dimension_numbers<[1], [0], [0], [1], [0, 0, 1, 1], [], []>} : vector<2x10xf32>, vector<10x32xf32>, vector<2x32xf32> -> vector<2x32xf32>
    %c0_3 = arith.constant 0 : index
    %c0_4 = arith.constant 0 : index
    %3 = vector.load %arg3[%c0_3, %c0_4] : memref<1x32xf32, #tpu.memory_space<vmem>>, vector<1x32xf32>
    %4 = vector.broadcast %3 : vector<1x32xf32> to vector<2x32xf32>
    %5 = arith.addf %2, %4 : vector<2x32xf32>
    %cst_5 = arith.constant 0.000000e+00 : f32
    %6 = vector.broadcast %cst_5 : f32 to vector<2x32xf32>
    %7 = arith.maximumf %5, %6 : vector<2x32xf32>
    %c0_6 = arith.constant 0 : index
    %c0_7 = arith.constant 0 : index
    %8 = vector.load %arg4[%c0_6, %c0_7] : memref<2x32xf32, #tpu.memory_space<vmem>>, vector<2x32xf32>
    tpu.vector_store %arg4[%c0_6, %c0_7], %7 {strides = array<i32>} : memref<2x32xf32, #tpu.memory_space<vmem>>, vector<2x32xf32>,
    return
  }
  func.func @transform_0(%arg0: i32) -> (i32, i32) {
    %c0_i32 = arith.constant 0 : i32
    %c0_i32_0 = arith.constant 0 : i32
    return %arg0, %c0_i32 : i32, i32
  }
  func.func @transform_1(%arg0: i32) -> (i32, i32) {
    %c0_i32 = arith.constant 0 : i32
    %c0_i32_0 = arith.constant 0 : i32
    %c0_i32_1 = arith.constant 0 : i32
    return %c0_i32, %c0_i32_0 : i32, i32
  }
  func.func @transform_2(%arg0: i32) -> (i32, i32) {
    %c0_i32 = arith.constant 0 : i32
    %c0_i32_0 = arith.constant 0 : i32
    %c0_i32_1 = arith.constant 0 : i32
    return %c0_i32, %c0_i32_0 : i32, i32
  }
  func.func @transform_3(%arg0: i32) -> (i32, i32) {
    %c0_i32 = arith.constant 0 : i32
    %c0_i32_0 = arith.constant 0 : i32
    return %arg0, %c0_i32 : i32, i32
  }
}

module attributes {stable_mosaic.version = 11 : i64} {
  func.func @_matmul_bias_kernel(%arg0: i32, %arg1: memref<2x32xf32, #tpu.memory_space<vmem>>, %arg2: memref<32x1024xf32, #tpu.memory_space<vmem>>, %arg3: memref<1x1024xf32, #tpu.memory_space<vmem>>, %arg4: memref<2x1024xbf16, #tpu.memory_space<vmem>>) attributes {dimension_semantics = [#tpu.dimension_semantics<parallel>], iteration_bounds = array<i64: 1>, scalar_prefetch = 0 : i64, scratch_operands = 0 : i64, tpu.core_type = #tpu.core_type<tc>, window_params = [{transform_indices = @transform_0, window_bounds = array<i64: 2, 32>}, {pipeline_mode = #tpu.pipeline_mode<synchronous>, transform_indices = @transform_1, window_bounds = array<i64: 32, 1024>}, {pipeline_mode = #tpu.pipeline_mode<synchronous>, transform_indices = @transform_2, window_bounds = array<i64: 1, 1024>}, {transform_indices = @transform_3, window_bounds = array<i64: 2, 1024>}]} {
    %c0 = arith.constant 0 : index
    %c0_0 = arith.constant 0 : index
    %0 = vector.load %arg1[%c0, %c0_0] : memref<2x32xf32, #tpu.memory_space<vmem>>, vector<2x32xf32>
    %c0_1 = arith.constant 0 : index
    %c0_2 = arith.constant 0 : index
    %1 = vector.load %arg2[%c0_1, %c0_2] : memref<32x1024xf32, #tpu.memory_space<vmem>>, vector<32x1024xf32>
    %cst = arith.constant dense<0.000000e+00> : vector<2x1024xf32>
    %2 = tpu.matmul %0, %1, %cst {dimension_numbers = #tpu.dot_dimension_numbers<[1], [0], [0], [1], [0, 0, 1, 1], [], []>} : vector<2x32xf32>, vector<32x1024xf32>, vector<2x1024xf32> -> vector<2x1024xf32>
    %c0_3 = arith.constant 0 : index
    %c0_4 = arith.constant 0 : index
    %3 = vector.load %arg3[%c0_3, %c0_4] : memref<1x1024xf32, #tpu.memory_space<vmem>>, vector<1x1024xf32>
    %4 = vector.broadcast %3 : vector<1x1024xf32> to vector<2x1024xf32>
    %5 = arith.addf %2, %4 : vector<2x1024xf32>
    %cst_5 = arith.constant 0.000000e+00 : f32
    %6 = vector.broadcast %cst_5 : f32 to vector<2x1024xf32>
    %7 = arith.maximumf %5, %6 : vector<2x1024xf32>
    %8 = arith.truncf %7 : vector<2x1024xf32> to vector<2x1024xbf16>
    %c0_6 = arith.constant 0 : index
    %c0_7 = arith.constant 0 : index
    %9 = vector.load %arg4[%c0_6, %c0_7] : memref<2x1024xbf16, #tpu.memory_space<vmem>>, vector<2x1024xbf16>
    tpu.vector_store %arg4[%c0_6, %c0_7], %8 {strides = array<i32>} : memref<2x1024xbf16, #tpu.memory_space<vmem>>, vector<2x1024xbf16>,
    return
  }
  func.func @transform_0(%arg0: i32) -> (i32, i32) {
    %c0_i32 = arith.constant 0 : i32
    %c0_i32_0 = arith.constant 0 : i32
    return %arg0, %c0_i32 : i32, i32
  }
  func.func @transform_1(%arg0: i32) -> (i32, i32) {
    %c0_i32 = arith.constant 0 : i32
    %c0_i32_0 = arith.constant 0 : i32
    %c0_i32_1 = arith.constant 0 : i32
    return %c0_i32, %c0_i32_0 : i32, i32
  }
  func.func @transform_2(%arg0: i32) -> (i32, i32) {
    %c0_i32 = arith.constant 0 : i32
    %c0_i32_0 = arith.constant 0 : i32
    %c0_i32_1 = arith.constant 0 : i32
    return %c0_i32, %c0_i32_0 : i32, i32
  }
  func.func @transform_3(%arg0: i32) -> (i32, i32) {
    %c0_i32 = arith.constant 0 : i32
    %c0_i32_0 = arith.constant 0 : i32
    return %arg0, %c0_i32 : i32, i32
  }
}

module attributes {stable_mosaic.version = 11 : i64} {
  func.func @_matmul_bias_kernel(%arg0: i32, %arg1: memref<50x256xbf16, #tpu.memory_space<vmem>>, %arg2: memref<256x256xbf16, #tpu.memory_space<vmem>>, %arg3: memref<1x256xf32, #tpu.memory_space<vmem>>, %arg4: memref<50x256xbf16, #tpu.memory_space<vmem>>) attributes {dimension_semantics = [#tpu.dimension_semantics<parallel>], iteration_bounds = array<i64: 1>, scalar_prefetch = 0 : i64, scratch_operands = 0 : i64, tpu.core_type = #tpu.core_type<tc>, window_params = [{transform_indices = @transform_0, window_bounds = array<i64: 50, 256>}, {pipeline_mode = #tpu.pipeline_mode<synchronous>, transform_indices = @transform_1, window_bounds = array<i64: 256, 256>}, {pipeline_mode = #tpu.pipeline_mode<synchronous>, transform_indices = @transform_2, window_bounds = array<i64: 1, 256>}, {transform_indices = @transform_3, window_bounds = array<i64: 50, 256>}]} {
    %c0 = arith.constant 0 : index
    %c0_0 = arith.constant 0 : index
    %0 = vector.load %arg1[%c0, %c0_0] : memref<50x256xbf16, #tpu.memory_space<vmem>>, vector<50x256xbf16>
    %c0_1 = arith.constant 0 : index
    %c0_2 = arith.constant 0 : index
    %1 = vector.load %arg2[%c0_1, %c0_2] : memref<256x256xbf16, #tpu.memory_space<vmem>>, vector<256x256xbf16>
    %cst = arith.constant dense<0.000000e+00> : vector<50x256xf32>
    %2 = tpu.matmul %0, %1, %cst {dimension_numbers = #tpu.dot_dimension_numbers<[1], [0], [0], [1], [0, 0, 1, 1], [], []>} : vector<50x256xbf16>, vector<256x256xbf16>, vector<50x256xf32> -> vector<50x256xf32>
    %c0_3 = arith.constant 0 : index
    %c0_4 = arith.constant 0 : index
    %3 = vector.load %arg3[%c0_3, %c0_4] : memref<1x256xf32, #tpu.memory_space<vmem>>, vector<1x256xf32>
    %4 = vector.broadcast %3 : vector<1x256xf32> to vector<50x256xf32>
    %5 = arith.addf %2, %4 : vector<50x256xf32>
    %cst_5 = arith.constant 0.000000e+00 : f32
    %6 = vector.broadcast %cst_5 : f32 to vector<50x256xf32>
    %7 = arith.maximumf %5, %6 : vector<50x256xf32>
    %8 = arith.truncf %7 : vector<50x256xf32> to vector<50x256xbf16>
    %c0_6 = arith.constant 0 : index
    %c0_7 = arith.constant 0 : index
    %9 = vector.load %arg4[%c0_6, %c0_7] : memref<50x256xbf16, #tpu.memory_space<vmem>>, vector<50x256xbf16>
    tpu.vector_store %arg4[%c0_6, %c0_7], %8 {strides = array<i32>} : memref<50x256xbf16, #tpu.memory_space<vmem>>, vector<50x256xbf16>,
    return
  }
  func.func @transform_0(%arg0: i32) -> (i32, i32) {
    %c0_i32 = arith.constant 0 : i32
    %c0_i32_0 = arith.constant 0 : i32
    return %arg0, %c0_i32 : i32, i32
  }
  func.func @transform_1(%arg0: i32) -> (i32, i32) {
    %c0_i32 = arith.constant 0 : i32
    %c0_i32_0 = arith.constant 0 : i32
    %c0_i32_1 = arith.constant 0 : i32
    return %c0_i32, %c0_i32_0 : i32, i32
  }
  func.func @transform_2(%arg0: i32) -> (i32, i32) {
    %c0_i32 = arith.constant 0 : i32
    %c0_i32_0 = arith.constant 0 : i32
    %c0_i32_1 = arith.constant 0 : i32
    return %c0_i32, %c0_i32_0 : i32, i32
  }
  func.func @transform_3(%arg0: i32) -> (i32, i32) {
    %c0_i32 = arith.constant 0 : i32
    %c0_i32_0 = arith.constant 0 : i32
    return %arg0, %c0_i32 : i32, i32
  }
}

module attributes {stable_mosaic.version = 11 : i64} {
  func.func @_matmul_bias_kernel(%arg0: i32, %arg1: memref<162x256xbf16, #tpu.memory_space<vmem>>, %arg2: memref<256x128xbf16, #tpu.memory_space<vmem>>, %arg3: memref<1x128xf32, #tpu.memory_space<vmem>>, %arg4: memref<162x128xbf16, #tpu.memory_space<vmem>>) attributes {dimension_semantics = [#tpu.dimension_semantics<parallel>], iteration_bounds = array<i64: 1>, scalar_prefetch = 0 : i64, scratch_operands = 0 : i64, tpu.core_type = #tpu.core_type<tc>, window_params = [{transform_indices = @transform_0, window_bounds = array<i64: 162, 256>}, {pipeline_mode = #tpu.pipeline_mode<synchronous>, transform_indices = @transform_1, window_bounds = array<i64: 256, 128>}, {pipeline_mode = #tpu.pipeline_mode<synchronous>, transform_indices = @transform_2, window_bounds = array<i64: 1, 128>}, {transform_indices = @transform_3, window_bounds = array<i64: 162, 128>}]} {
    %c0 = arith.constant 0 : index
    %c0_0 = arith.constant 0 : index
    %0 = vector.load %arg1[%c0, %c0_0] : memref<162x256xbf16, #tpu.memory_space<vmem>>, vector<162x256xbf16>
    %c0_1 = arith.constant 0 : index
    %c0_2 = arith.constant 0 : index
    %1 = vector.load %arg2[%c0_1, %c0_2] : memref<256x128xbf16, #tpu.memory_space<vmem>>, vector<256x128xbf16>
    %cst = arith.constant dense<0.000000e+00> : vector<162x128xf32>
    %2 = tpu.matmul %0, %1, %cst {dimension_numbers = #tpu.dot_dimension_numbers<[1], [0], [0], [1], [0, 0, 1, 1], [], []>} : vector<162x256xbf16>, vector<256x128xbf16>, vector<162x128xf32> -> vector<162x128xf32>
    %c0_3 = arith.constant 0 : index
    %c0_4 = arith.constant 0 : index
    %3 = vector.load %arg3[%c0_3, %c0_4] : memref<1x128xf32, #tpu.memory_space<vmem>>, vector<1x128xf32>
    %4 = vector.broadcast %3 : vector<1x128xf32> to vector<162x128xf32>
    %5 = arith.addf %2, %4 : vector<162x128xf32>
    %cst_5 = arith.constant 0.000000e+00 : f32
    %6 = vector.broadcast %cst_5 : f32 to vector<162x128xf32>
    %7 = arith.maximumf %5, %6 : vector<162x128xf32>
    %8 = arith.truncf %7 : vector<162x128xf32> to vector<162x128xbf16>
    %c0_6 = arith.constant 0 : index
    %c0_7 = arith.constant 0 : index
    %9 = vector.load %arg4[%c0_6, %c0_7] : memref<162x128xbf16, #tpu.memory_space<vmem>>, vector<162x128xbf16>
    tpu.vector_store %arg4[%c0_6, %c0_7], %8 {strides = array<i32>} : memref<162x128xbf16, #tpu.memory_space<vmem>>, vector<162x128xbf16>,
    return
  }
  func.func @transform_0(%arg0: i32) -> (i32, i32) {
    %c0_i32 = arith.constant 0 : i32
    %c0_i32_0 = arith.constant 0 : i32
    return %arg0, %c0_i32 : i32, i32
  }
  func.func @transform_1(%arg0: i32) -> (i32, i32) {
    %c0_i32 = arith.constant 0 : i32
    %c0_i32_0 = arith.constant 0 : i32
    %c0_i32_1 = arith.constant 0 : i32
    return %c0_i32, %c0_i32_0 : i32, i32
  }
  func.func @transform_2(%arg0: i32) -> (i32, i32) {
    %c0_i32 = arith.constant 0 : i32
    %c0_i32_0 = arith.constant 0 : i32
    %c0_i32_1 = arith.constant 0 : i32
    return %c0_i32, %c0_i32_0 : i32, i32
  }
  func.func @transform_3(%arg0: i32) -> (i32, i32) {
    %c0_i32 = arith.constant 0 : i32
    %c0_i32_0 = arith.constant 0 : i32
    return %arg0, %c0_i32 : i32, i32
  }
}

module attributes {stable_mosaic.version = 11 : i64} {
  func.func @_matmul_bias_kernel(%arg0: i32, %arg1: memref<256x128xbf16, #tpu.memory_space<vmem>>, %arg2: memref<128x128xbf16, #tpu.memory_space<vmem>>, %arg3: memref<1x128xf32, #tpu.memory_space<vmem>>, %arg4: memref<256x128xbf16, #tpu.memory_space<vmem>>) attributes {dimension_semantics = [#tpu.dimension_semantics<parallel>], iteration_bounds = array<i64: 3>, scalar_prefetch = 0 : i64, scratch_operands = 0 : i64, tpu.core_type = #tpu.core_type<tc>, window_params = [{transform_indices = @transform_0, window_bounds = array<i64: 256, 128>}, {pipeline_mode = #tpu.pipeline_mode<synchronous>, transform_indices = @transform_1, window_bounds = array<i64: 128, 128>}, {pipeline_mode = #tpu.pipeline_mode<synchronous>, transform_indices = @transform_2, window_bounds = array<i64: 1, 128>}, {transform_indices = @transform_3, window_bounds = array<i64: 256, 128>}]} {
    %c0 = arith.constant 0 : index
    %c0_0 = arith.constant 0 : index
    %0 = vector.load %arg1[%c0, %c0_0] : memref<256x128xbf16, #tpu.memory_space<vmem>>, vector<256x128xbf16>
    %c0_1 = arith.constant 0 : index
    %c0_2 = arith.constant 0 : index
    %1 = vector.load %arg2[%c0_1, %c0_2] : memref<128x128xbf16, #tpu.memory_space<vmem>>, vector<128x128xbf16>
    %cst = arith.constant dense<0.000000e+00> : vector<256x128xf32>
    %2 = tpu.matmul %0, %1, %cst {dimension_numbers = #tpu.dot_dimension_numbers<[1], [0], [0], [1], [0, 0, 1, 1], [], []>} : vector<256x128xbf16>, vector<128x128xbf16>, vector<256x128xf32> -> vector<256x128xf32>
    %c0_3 = arith.constant 0 : index
    %c0_4 = arith.constant 0 : index
    %3 = vector.load %arg3[%c0_3, %c0_4] : memref<1x128xf32, #tpu.memory_space<vmem>>, vector<1x128xf32>
    %4 = vector.broadcast %3 : vector<1x128xf32> to vector<256x128xf32>
    %5 = arith.addf %2, %4 : vector<256x128xf32>
    %cst_5 = arith.constant 0.000000e+00 : f32
    %6 = vector.broadcast %cst_5 : f32 to vector<256x128xf32>
    %7 = arith.maximumf %5, %6 : vector<256x128xf32>
    %8 = arith.truncf %7 : vector<256x128xf32> to vector<256x128xbf16>
    %c0_6 = arith.constant 0 : index
    %c0_7 = arith.constant 0 : index
    %9 = vector.load %arg4[%c0_6, %c0_7] : memref<256x128xbf16, #tpu.memory_space<vmem>>, vector<256x128xbf16>
    tpu.vector_store %arg4[%c0_6, %c0_7], %8 {strides = array<i32>} : memref<256x128xbf16, #tpu.memory_space<vmem>>, vector<256x128xbf16>,
    return
  }
  func.func @transform_0(%arg0: i32) -> (i32, i32) {
    %c0_i32 = arith.constant 0 : i32
    %c0_i32_0 = arith.constant 0 : i32
    return %arg0, %c0_i32 : i32, i32
  }
  func.func @transform_1(%arg0: i32) -> (i32, i32) {
    %c0_i32 = arith.constant 0 : i32
    %c0_i32_0 = arith.constant 0 : i32
    %c0_i32_1 = arith.constant 0 : i32
    return %c0_i32, %c0_i32_0 : i32, i32
  }
  func.func @transform_2(%arg0: i32) -> (i32, i32) {
    %c0_i32 = arith.constant 0 : i32
    %c0_i32_0 = arith.constant 0 : i32
    %c0_i32_1 = arith.constant 0 : i32
    return %c0_i32, %c0_i32_0 : i32, i32
  }
  func.func @transform_3(%arg0: i32) -> (i32, i32) {
    %c0_i32 = arith.constant 0 : i32
    %c0_i32_0 = arith.constant 0 : i32
    return %arg0, %c0_i32 : i32, i32
  }
}

module attributes {stable_mosaic.version = 11 : i64} {
  func.func @_matmul_bias_kernel(%arg0: i32, %arg1: memref<512x128xbf16, #tpu.memory_space<vmem>>, %arg2: memref<128x12xbf16, #tpu.memory_space<vmem>>, %arg3: memref<1x12xf32, #tpu.memory_space<vmem>>, %arg4: memref<512x12xf32, #tpu.memory_space<vmem>>) attributes {dimension_semantics = [#tpu.dimension_semantics<parallel>], iteration_bounds = array<i64: 5>, scalar_prefetch = 0 : i64, scratch_operands = 0 : i64, tpu.core_type = #tpu.core_type<tc>, window_params = [{transform_indices = @transform_0, window_bounds = array<i64: 512, 128>}, {pipeline_mode = #tpu.pipeline_mode<synchronous>, transform_indices = @transform_1, window_bounds = array<i64: 128, 12>}, {pipeline_mode = #tpu.pipeline_mode<synchronous>, transform_indices = @transform_2, window_bounds = array<i64: 1, 12>}, {transform_indices = @transform_3, window_bounds = array<i64: 512, 12>}]} {
    %c0 = arith.constant 0 : index
    %c0_0 = arith.constant 0 : index
    %0 = vector.load %arg1[%c0, %c0_0] : memref<512x128xbf16, #tpu.memory_space<vmem>>, vector<512x128xbf16>
    %c0_1 = arith.constant 0 : index
    %c0_2 = arith.constant 0 : index
    %1 = vector.load %arg2[%c0_1, %c0_2] : memref<128x12xbf16, #tpu.memory_space<vmem>>, vector<128x12xbf16>
    %cst = arith.constant dense<0.000000e+00> : vector<512x12xf32>
    %2 = tpu.matmul %0, %1, %cst {dimension_numbers = #tpu.dot_dimension_numbers<[1], [0], [0], [1], [0, 0, 1, 1], [], []>} : vector<512x128xbf16>, vector<128x12xbf16>, vector<512x12xf32> -> vector<512x12xf32>
    %c0_3 = arith.constant 0 : index
    %c0_4 = arith.constant 0 : index
    %3 = vector.load %arg3[%c0_3, %c0_4] : memref<1x12xf32, #tpu.memory_space<vmem>>, vector<1x12xf32>
    %4 = vector.broadcast %3 : vector<1x12xf32> to vector<512x12xf32>
    %5 = arith.addf %2, %4 : vector<512x12xf32>
    %c0_5 = arith.constant 0 : index
    %c0_6 = arith.constant 0 : index
    %6 = vector.load %arg4[%c0_5, %c0_6] : memref<512x12xf32, #tpu.memory_space<vmem>>, vector<512x12xf32>
    tpu.vector_store %arg4[%c0_5, %c0_6], %5 {strides = array<i32>} : memref<512x12xf32, #tpu.memory_space<vmem>>, vector<512x12xf32>,
    return
  }
  func.func @transform_0(%arg0: i32) -> (i32, i32) {
    %c0_i32 = arith.constant 0 : i32
    %c0_i32_0 = arith.constant 0 : i32
    return %arg0, %c0_i32 : i32, i32
  }
  func.func @transform_1(%arg0: i32) -> (i32, i32) {
    %c0_i32 = arith.constant 0 : i32
    %c0_i32_0 = arith.constant 0 : i32
    %c0_i32_1 = arith.constant 0 : i32
    return %c0_i32, %c0_i32_0 : i32, i32
  }
  func.func @transform_2(%arg0: i32) -> (i32, i32) {
    %c0_i32 = arith.constant 0 : i32
    %c0_i32_0 = arith.constant 0 : i32
    %c0_i32_1 = arith.constant 0 : i32
    return %c0_i32, %c0_i32_0 : i32, i32
  }
  func.func @transform_3(%arg0: i32) -> (i32, i32) {
    %c0_i32 = arith.constant 0 : i32
    %c0_i32_0 = arith.constant 0 : i32
    return %arg0, %c0_i32 : i32, i32
  }
}

</mosaic_0001>

<bundles_post_ra>
// kernel: ssidvae_forward.12
= control target key start
LH: loop header
LB: loop body
LE: loop exit
PB: predicated region body
PF: predicated region fallthrough
CT: control target
= control target key end

     0   :  { %s1646_s12 = smov 0   ;;  %s1944_s0 = inlined_call_operand.vmem [shape: bf16[2048,48], index: 0, kind: input, shape index: {}]   ;;  %s1945_s1 = inlined_call_operand.vmem [shape: bf16[48,32], index: 1, kind: input, shape index: {}]   ;;  %s1946_s2 = inlined_call_operand.vmem [shape: f32[1,32], index: 2, kind: input, shape index: {}]   ;;  %s1947_s3 = inlined_call_operand.vmem [shape: bf16[2048,32], index: 3, kind: output, shape index: {}]  }
   0x1 LB: > { %s1257_s13 = sadd.s32 4294967295, %s1624_s12   ;;  %p1261_p0 = scmp.ge.s32.totalorder %s1624_s12, 1  ;;  %s1624_s12 = sphi %s1646_s12, %s13_s12  }
   0x2   : > { %p138_p1 = scmp.lt.s32.totalorder %s1624_s12, 5 }
   0x4   : > { %p139_p2 = pnand %p1261_p0, %p138_p1 }
   0x5   : > { %s1262_s16 = sshll.u32 (!%p139_p2), %s1257_s13, 6 }
   0x6   : > { %142 = sbr.rel (%p139_p2) target bundleno = 286 (0x11e), region = 32  ;;  %p163_p3 = scmp.lt.s32.totalorder (!%p139_p2), %s1262_s16, 255 }
   0xb   : > { %v1583_v0 = vld [vmem:[%s1945_s1 + $0x10] sm:$0xff]   ;;  %v1584_v1 = vld [vmem:[%s1945_s1 + $0x8] sm:$0xff]   ;;  %s1949_s16 = smov (!%p163_p3, %s1262_s16), 255  ;;  %v1585_v2 = vld [vmem:[%s1945_s1] sm:$0xff]   ;;  %vm430_vm0 = vcmask 392192   ;;  %vm1136_vm1 = vcmask 257024  }
   0xc   : > { %1499 = vmatprep.subr.bf16.mxu0 %v1583_v0  ;;  %1569 = vmatprep.subr.bf16.mxu1 %v1583_v0  ;;  %s1263_s21 = sshll.u32 %s1949_s16, 2  ;;  %v1740_v35 = vld [vmem:[%s1946_s2] ss:$0 sm:$0xff] }
   0xd   : > { %1500 = vmatpush3.bf16.msra.mxu0 %v1583_v0  ;;  %1572 = vmatpush3.bf16.msra.mxu1 %v1583_v0  ;;  %s1671_s24 = scalar_lea.vmem %s1944_s0, %s1263_s21  ;;  %s1751_s29 = scalar_lea.vmem %s1947_s3, %s1263_s21 }
   0xe   : > { %1501 = vmatprep.subr.bf16.mxu0 %v1584_v1  ;;  %1570 = vmatprep.subr.bf16.mxu1 %v1584_v1  ;;  %v1586_v3 = vld [vmem:[%s1671_s24] sm:$0xff]   ;;  %v1588_v5 = vld [vmem:[%s1671_s24 + $0x8] sm:$0xff]   ;;  %v1590_v7 = vld [vmem:[%s1671_s24 + $0x10] sm:$0xff]  }
   0xf   : > { %v1587_v4 = vld [vmem:[%s1671_s24 + $0x80] sm:$0xff]   ;;  %1505 = vmatprep.mubr.msk.bf16.mxu0 %vm430_vm0, %v1586_v3  ;;  %v1589_v6 = vld [vmem:[%s1671_s24 + $0x88] sm:$0xff]   ;;  %v1591_v8 = vld [vmem:[%s1671_s24 + $0x90] sm:$0xff]  }
  0x10   : > { %1537 = vmatprep.mubr.msk.bf16.mxu1 %vm430_vm0, %v1587_v4  ;;  %v1592_v9 = vld [vmem:[%s1671_s24 + $0x18] sm:$0xff]   ;;  %v1594_v11 = vld [vmem:[%s1671_s24 + $0x20] sm:$0xff]   ;;  %v1596_v13 = vld [vmem:[%s1671_s24 + $0x28] sm:$0xff]  }
  0x11   : > { %1502 = vmatpush3.bf16.msra.mxu0 %v1584_v1  ;;  %1573 = vmatpush3.bf16.msra.mxu1 %v1584_v1  ;;  %v1593_v10 = vld [vmem:[%s1671_s24 + $0x98] sm:$0xff]   ;;  %v1595_v12 = vld [vmem:[%s1671_s24 + $0xa0] sm:$0xff]   ;;  %v1597_v14 = vld [vmem:[%s1671_s24 + $0xa8] sm:$0xff]  }
  0x12   : > { %1503 = vmatprep.subr.bf16.mxu0 %v1585_v2  ;;  %1571 = vmatprep.subr.bf16.mxu1 %v1585_v2  ;;  %v1598_v15 = vld [vmem:[%s1671_s24 + $0x30] sm:$0xff]   ;;  %v1600_v17 = vld [vmem:[%s1671_s24 + $0x38] sm:$0xff]   ;;  %v1602_v19 = vld [vmem:[%s1671_s24 + $0x40] sm:$0xff]  }
  0x13   : > { %v1599_v16 = vld [vmem:[%s1671_s24 + $0xb0] sm:$0xff]   ;;  %v1601_v18 = vld [vmem:[%s1671_s24 + $0xb8] sm:$0xff]   ;;  %v1603_v20 = vld [vmem:[%s1671_s24 + $0xc0] sm:$0xff]  }
  0x14   : > { %v1604_v21 = vld [vmem:[%s1671_s24 + $0x48] sm:$0xff]   ;;  %v1606_v23 = vld [vmem:[%s1671_s24 + $0x50] sm:$0xff]   ;;  %v1608_v25 = vld [vmem:[%s1671_s24 + $0x58] sm:$0xff]  }
  0x15   : > { %1504 = vmatpush3.bf16.msra.mxu0 %v1585_v2  ;;  %1574 = vmatpush3.bf16.msra.mxu1 %v1585_v2  ;;  %v1605_v22 = vld [vmem:[%s1671_s24 + $0xc8] sm:$0xff]   ;;  %v1607_v24 = vld [vmem:[%s1671_s24 + $0xd0] sm:$0xff]   ;;  %v1609_v26 = vld [vmem:[%s1671_s24 + $0xd8] sm:$0xff]  }
  0x16   : > { %v1610_v27 = vld [vmem:[%s1671_s24 + $0x60] sm:$0xff]   ;;  %v1612_v29 = vld [vmem:[%s1671_s24 + $0x68] sm:$0xff]   ;;  %v1614_v31 = vld [vmem:[%s1671_s24 + $0x70] sm:$0xff]  }
  0x17   : > { %v1611_v28 = vld [vmem:[%s1671_s24 + $0xe0] sm:$0xff]   ;;  %v1613_v30 = vld [vmem:[%s1671_s24 + $0xe8] sm:$0xff]   ;;  %v1615_v32 = vld [vmem:[%s1671_s24 + $0xf0] sm:$0xff]  }
  0x18   : > { %1506 = vmatmul.mubr.msk.bf16.vlgmr.msra.gmra.mxu0 %vm430_vm0, %v1588_v5  ;;  %1538 = vmatmul.mubr.msk.bf16.vlgmr.msra.gmra.mxu1 %vm430_vm0, %v1589_v6  ;;  %v1616_v33 = vld [vmem:[%s1671_s24 + $0x78] sm:$0xff]  }
  0x19   : > { %1509 = vmatprep.mubr.msk.bf16.mxu0 %vm430_vm0, %v1590_v7  ;;  %1541 = vmatprep.mubr.msk.bf16.mxu1 %vm430_vm0, %v1591_v8  ;;  %v1617_v34 = vld [vmem:[%s1671_s24 + $0xf8] sm:$0xff]  }
  0x20   : > { %1510 = vmatmul.mubr.msk.bf16.gmra.mxu0 %vm430_vm0, %v1592_v9  ;;  %1542 = vmatmul.mubr.msk.bf16.gmra.mxu1 %vm430_vm0, %v1593_v10 }
  0x21   : > { %1513 = vmatprep.mubr.msk.bf16.mxu0 %vm430_vm0, %v1594_v11  ;;  %1545 = vmatprep.mubr.msk.bf16.mxu1 %vm430_vm0, %v1595_v12 }
  0x28   : > { %1514 = vmatmul.mubr.msk.bf16.gmra.mxu0 %vm430_vm0, %v1596_v13  ;;  %1546 = vmatmul.mubr.msk.bf16.gmra.mxu1 %vm430_vm0, %v1597_v14 }
  0x29   : > { %1517 = vmatprep.mubr.msk.bf16.mxu0 %vm430_vm0, %v1598_v15  ;;  %1549 = vmatprep.mubr.msk.bf16.mxu1 %vm430_vm0, %v1599_v16 }
  0x30   : > { %1518 = vmatmul.mubr.msk.bf16.gmra.mxu0 %vm430_vm0, %v1600_v17  ;;  %1550 = vmatmul.mubr.msk.bf16.gmra.mxu1 %vm430_vm0, %v1601_v18 }
  0x31   : > { %1521 = vmatprep.mubr.msk.bf16.mxu0 %vm430_vm0, %v1602_v19  ;;  %1553 = vmatprep.mubr.msk.bf16.mxu1 %vm430_vm0, %v1603_v20 }
  0x38   : > { %1522 = vmatmul.mubr.msk.bf16.gmra.mxu0 %vm430_vm0, %v1604_v21  ;;  %1554 = vmatmul.mubr.msk.bf16.gmra.mxu1 %vm430_vm0, %v1605_v22 }
  0x39   : > { %1525 = vmatprep.mubr.msk.bf16.mxu0 %vm430_vm0, %v1606_v23  ;;  %1557 = vmatprep.mubr.msk.bf16.mxu1 %vm430_vm0, %v1607_v24 }
  0x40   : > { %1526 = vmatmul.mubr.msk.bf16.gmra.mxu0 %vm430_vm0, %v1608_v25  ;;  %1558 = vmatmul.mubr.msk.bf16.gmra.mxu1 %vm430_vm0, %v1609_v26 }
  0x41   : > { %1529 = vmatprep.mubr.msk.bf16.mxu0 %vm430_vm0, %v1610_v27  ;;  %1561 = vmatprep.mubr.msk.bf16.mxu1 %vm430_vm0, %v1611_v28 }
  0x48   : > { %1530 = vmatmul.mubr.msk.bf16.gmra.mxu0 %vm430_vm0, %v1612_v29  ;;  %1562 = vmatmul.mubr.msk.bf16.gmra.mxu1 %vm430_vm0, %v1613_v30 }
  0x49   : > { %1533 = vmatprep.mubr.msk.bf16.mxu0 %vm430_vm0, %v1614_v31  ;;  %1565 = vmatprep.mubr.msk.bf16.mxu1 %vm430_vm0, %v1615_v32 }
  0x50   : > { %1534 = vmatmul.mubr.msk.bf16.gmra.mxu0 %vm430_vm0, %v1616_v33  ;;  %1566 = vmatmul.mubr.msk.bf16.gmra.mxu1 %vm430_vm0, %v1617_v34 }
  0xd8   : > { %v1507_v36 = vpop.f32.mrf.mxu0  ;;  %v1539_v37 = vpop.f32.mrf.mxu1 }
  0xd9   : > { %v570_v38 = vadd.f32 %v1507_v36, %v1740_v35  ;;  %v698_v39 = vadd.f32 %v1539_v37, %v1740_v35 }
  0xda   : > { %v561_v40 = vpop.f32.mrf.mxu0  ;;  %v689_v41 = vpop.f32.mrf.mxu1 }
  0xdb   : > { %v818_v42 = vmax.f32 %v570_v38, 0.0  ;;  %v850_v43 = vmax.f32 %v698_v39, 0.0  ;;  %v562_v44 = vadd.f32 %v1740_v35, %v561_v40  ;;  %v690_v45 = vadd.f32 %v1740_v35, %v689_v41 }
  0xdc   : > { %v1508_v46 = vpop.f32.mrf.mxu0  ;;  %v1540_v47 = vpop.f32.mrf.mxu1 }
  0xdd   : > { %v1402_v48 = vpack.c.bf16 %v818_v42, %v818_v42  ;;  %v1434_v49 = vpack.c.bf16 %v850_v43, %v850_v43  ;;  %v816_v50 = vmax.f32 %v562_v44, 0.0  ;;  %v848_v51 = vmax.f32 %v690_v45, 0.0 }
  0xde   : > { %v573_v52 = vadd.f32 %v1508_v46, %v1740_v35  ;;  %v701_v53 = vadd.f32 %v1540_v47, %v1740_v35  ;;  %v564_v54 = vpop.f32.mrf.mxu0  ;;  %v692_v55 = vpop.f32.mrf.mxu1 }
  0xdf   : > { %1139 = vst.msk [vmem:[%s1751_s29 + $0x8] sm:$0xf] %vm1136_vm1, %v1402_v48  ;;  %1171 = vst.msk [vmem:[%s1751_s29 + $0x88] sm:$0xf] %vm1136_vm1, %v1434_v49  ;;  %v1400_v56 = vpack.c.bf16 %v816_v50, %v816_v50  ;;  %v1432_v57 = vpack.c.bf16 %v848_v51, %v848_v51  ;;  %v565_v58 = vadd.f32 %v1740_v35, %v564_v54 }
  0xe0   : > { %v693_v59 = vadd.f32 %v1740_v35, %v692_v55  ;;  %v819_v60 = vmax.f32 %v573_v52, 0.0  ;;  %v851_v61 = vmax.f32 %v701_v53, 0.0  ;;  %v1511_v62 = vpop.f32.mrf.mxu0  ;;  %v1543_v63 = vpop.f32.mrf.mxu1 }
  0xe1   : > { %1137 = vst.msk [vmem:[%s1751_s29] sm:$0xf] %vm1136_vm1, %v1400_v56  ;;  %1169 = vst.msk [vmem:[%s1751_s29 + $0x80] sm:$0xf] %vm1136_vm1, %v1432_v57  ;;  %v817_v0 = vmax.f32 %v565_v58, 0.0  ;;  %v586_v2 = vadd.f32 %v1511_v62, %v1740_v35  ;;  %v714_v3 = vadd.f32 %v1543_v63, %v1740_v35 }
  0xe2   : > { %v849_v1 = vmax.f32 %v693_v59, 0.0  ;;  %v1403_v4 = vpack.c.bf16 %v819_v60, %v819_v60  ;;  %v1435_v5 = vpack.c.bf16 %v851_v61, %v851_v61  ;;  %v577_v6 = vpop.f32.mrf.mxu0  ;;  %v705_v7 = vpop.f32.mrf.mxu1 }
  0xe3   : > { %v1401_v8 = vpack.c.bf16 %v817_v0, %v817_v0  ;;  %v822_v10 = vmax.f32 %v586_v2, 0.0  ;;  %v854_v11 = vmax.f32 %v714_v3, 0.0  ;;  %v578_v12 = vadd.f32 %v1740_v35, %v577_v6 }
  0xe4   : > { %v1433_v9 = vpack.c.bf16 %v849_v1, %v849_v1  ;;  %1140 = vst.msk [vmem:[%s1751_s29 + $0xc] sm:$0xf] %vm1136_vm1, %v1403_v4  ;;  %1172 = vst.msk [vmem:[%s1751_s29 + $0x8c] sm:$0xf] %vm1136_vm1, %v1435_v5  ;;  %v706_v13 = vadd.f32 %v1740_v35, %v705_v7  ;;  %v1512_v14 = vpop.f32.mrf.mxu0  ;;  %v1544_v15 = vpop.f32.mrf.mxu1 }
  0xe5   : > { %1138 = vst.msk [vmem:[%s1751_s29 + $0x4] sm:$0xf] %vm1136_vm1, %v1401_v8  ;;  %v1406_v16 = vpack.c.bf16 %v822_v10, %v822_v10  ;;  %v1438_v17 = vpack.c.bf16 %v854_v11, %v854_v11  ;;  %v589_v18 = vadd.f32 %v1512_v14, %v1740_v35  ;;  %v717_v19 = vadd.f32 %v1544_v15, %v1740_v35 }
  0xe6   : > { %1170 = vst.msk [vmem:[%s1751_s29 + $0x84] sm:$0xf] %vm1136_vm1, %v1433_v9  ;;  %v820_v20 = vmax.f32 %v578_v12, 0.0  ;;  %v852_v21 = vmax.f32 %v706_v13, 0.0  ;;  %v580_v22 = vpop.f32.mrf.mxu0  ;;  %v708_v23 = vpop.f32.mrf.mxu1 }
  0xe7   : > { %1143 = vst.msk [vmem:[%s1751_s29 + $0x18] sm:$0xf] %vm1136_vm1, %v1406_v16  ;;  %1175 = vst.msk [vmem:[%s1751_s29 + $0x98] sm:$0xf] %vm1136_vm1, %v1438_v17  ;;  %v823_v24 = vmax.f32 %v589_v18, 0.0  ;;  %v855_v25 = vmax.f32 %v717_v19, 0.0  ;;  %v581_v26 = vadd.f32 %v1740_v35, %v580_v22  ;;  %v709_v27 = vadd.f32 %v1740_v35, %v708_v23 }
  0xe8   : > { %v1404_v28 = vpack.c.bf16 %v820_v20, %v820_v20  ;;  %v1436_v29 = vpack.c.bf16 %v852_v21, %v852_v21  ;;  %v1515_v30 = vpop.f32.mrf.mxu0  ;;  %v1547_v31 = vpop.f32.mrf.mxu1 }
  0xe9   : > { %v1407_v32 = vpack.c.bf16 %v823_v24, %v823_v24  ;;  %v1439_v33 = vpack.c.bf16 %v855_v25, %v855_v25  ;;  %v821_v34 = vmax.f32 %v581_v26, 0.0  ;;  %v853_v36 = vmax.f32 %v709_v27, 0.0 }
  0xea   : > { %1141 = vst.msk [vmem:[%s1751_s29 + $0x10] sm:$0xf] %vm1136_vm1, %v1404_v28  ;;  %1173 = vst.msk [vmem:[%s1751_s29 + $0x90] sm:$0xf] %vm1136_vm1, %v1436_v29  ;;  %v602_v37 = vadd.f32 %v1515_v30, %v1740_v35  ;;  %v730_v38 = vadd.f32 %v1547_v31, %v1740_v35  ;;  %v593_v39 = vpop.f32.mrf.mxu0  ;;  %v721_v40 = vpop.f32.mrf.mxu1 }
  0xeb   : > { %1144 = vst.msk [vmem:[%s1751_s29 + $0x1c] sm:$0xf] %vm1136_vm1, %v1407_v32  ;;  %1176 = vst.msk [vmem:[%s1751_s29 + $0x9c] sm:$0xf] %vm1136_vm1, %v1439_v33  ;;  %v1405_v41 = vpack.c.bf16 %v821_v34, %v821_v34  ;;  %v1437_v42 = vpack.c.bf16 %v853_v36, %v853_v36  ;;  %v594_v43 = vadd.f32 %v1740_v35, %v593_v39 }
  0xec   : > { %v722_v44 = vadd.f32 %v1740_v35, %v721_v40  ;;  %v826_v45 = vmax.f32 %v602_v37, 0.0  ;;  %v858_v46 = vmax.f32 %v730_v38, 0.0  ;;  %v1516_v47 = vpop.f32.mrf.mxu0  ;;  %v1548_v48 = vpop.f32.mrf.mxu1 }
  0xed   : > { %1142 = vst.msk [vmem:[%s1751_s29 + $0x14] sm:$0xf] %vm1136_vm1, %v1405_v41  ;;  %1174 = vst.msk [vmem:[%s1751_s29 + $0x94] sm:$0xf] %vm1136_vm1, %v1437_v42  ;;  %v824_v49 = vmax.f32 %v594_v43, 0.0  ;;  %v605_v51 = vadd.f32 %v1516_v47, %v1740_v35  ;;  %v733_v52 = vadd.f32 %v1548_v48, %v1740_v35 }
  0xee   : > { %v856_v50 = vmax.f32 %v722_v44, 0.0  ;;  %v1410_v53 = vpack.c.bf16 %v826_v45, %v826_v45  ;;  %v1442_v54 = vpack.c.bf16 %v858_v46, %v858_v46  ;;  %v596_v55 = vpop.f32.mrf.mxu0  ;;  %v724_v56 = vpop.f32.mrf.mxu1 }
  0xef   : > { %v1408_v57 = vpack.c.bf16 %v824_v49, %v824_v49  ;;  %v827_v59 = vmax.f32 %v605_v51, 0.0  ;;  %v859_v60 = vmax.f32 %v733_v52, 0.0  ;;  %v597_v61 = vadd.f32 %v1740_v35, %v596_v55 }
  0xf0   : > { %v1440_v58 = vpack.c.bf16 %v856_v50, %v856_v50  ;;  %1147 = vst.msk [vmem:[%s1751_s29 + $0x28] sm:$0xf] %vm1136_vm1, %v1410_v53  ;;  %1179 = vst.msk [vmem:[%s1751_s29 + $0xa8] sm:$0xf] %vm1136_vm1, %v1442_v54  ;;  %v725_v62 = vadd.f32 %v1740_v35, %v724_v56  ;;  %v1519_v63 = vpop.f32.mrf.mxu0  ;;  %v1551_v0 = vpop.f32.mrf.mxu1 }
  0xf1   : > { %1145 = vst.msk [vmem:[%s1751_s29 + $0x20] sm:$0xf] %vm1136_vm1, %v1408_v57  ;;  %v1411_v1 = vpack.c.bf16 %v827_v59, %v827_v59  ;;  %v1443_v2 = vpack.c.bf16 %v859_v60, %v859_v60  ;;  %v618_v3 = vadd.f32 %v1519_v63, %v1740_v35  ;;  %v746_v4 = vadd.f32 %v1551_v0, %v1740_v35 }
  0xf2   : > { %1177 = vst.msk [vmem:[%s1751_s29 + $0xa0] sm:$0xf] %vm1136_vm1, %v1440_v58  ;;  %v825_v5 = vmax.f32 %v597_v61, 0.0  ;;  %v857_v6 = vmax.f32 %v725_v62, 0.0  ;;  %v609_v7 = vpop.f32.mrf.mxu0  ;;  %v737_v8 = vpop.f32.mrf.mxu1 }
  0xf3   : > { %1148 = vst.msk [vmem:[%s1751_s29 + $0x2c] sm:$0xf] %vm1136_vm1, %v1411_v1  ;;  %1180 = vst.msk [vmem:[%s1751_s29 + $0xac] sm:$0xf] %vm1136_vm1, %v1443_v2  ;;  %v830_v9 = vmax.f32 %v618_v3, 0.0  ;;  %v862_v10 = vmax.f32 %v746_v4, 0.0  ;;  %v610_v11 = vadd.f32 %v1740_v35, %v609_v7  ;;  %v738_v12 = vadd.f32 %v1740_v35, %v737_v8 }
  0xf4   : > { %v1409_v13 = vpack.c.bf16 %v825_v5, %v825_v5  ;;  %v1441_v14 = vpack.c.bf16 %v857_v6, %v857_v6  ;;  %v1520_v15 = vpop.f32.mrf.mxu0  ;;  %v1552_v16 = vpop.f32.mrf.mxu1 }
  0xf5   : > { %v1414_v17 = vpack.c.bf16 %v830_v9, %v830_v9  ;;  %v1446_v18 = vpack.c.bf16 %v862_v10, %v862_v10  ;;  %v828_v19 = vmax.f32 %v610_v11, 0.0  ;;  %v860_v20 = vmax.f32 %v738_v12, 0.0 }
  0xf6   : > { %1146 = vst.msk [vmem:[%s1751_s29 + $0x24] sm:$0xf] %vm1136_vm1, %v1409_v13  ;;  %1178 = vst.msk [vmem:[%s1751_s29 + $0xa4] sm:$0xf] %vm1136_vm1, %v1441_v14  ;;  %v621_v21 = vadd.f32 %v1520_v15, %v1740_v35  ;;  %v749_v22 = vadd.f32 %v1552_v16, %v1740_v35  ;;  %v612_v23 = vpop.f32.mrf.mxu0  ;;  %v740_v24 = vpop.f32.mrf.mxu1 }
  0xf7   : > { %1151 = vst.msk [vmem:[%s1751_s29 + $0x38] sm:$0xf] %vm1136_vm1, %v1414_v17  ;;  %1183 = vst.msk [vmem:[%s1751_s29 + $0xb8] sm:$0xf] %vm1136_vm1, %v1446_v18  ;;  %v1412_v25 = vpack.c.bf16 %v828_v19, %v828_v19  ;;  %v1444_v26 = vpack.c.bf16 %v860_v20, %v860_v20  ;;  %v613_v27 = vadd.f32 %v1740_v35, %v612_v23 }
  0xf8   : > { %v741_v28 = vadd.f32 %v1740_v35, %v740_v24  ;;  %v831_v29 = vmax.f32 %v621_v21, 0.0  ;;  %v863_v30 = vmax.f32 %v749_v22, 0.0  ;;  %v1523_v31 = vpop.f32.mrf.mxu0  ;;  %v1555_v32 = vpop.f32.mrf.mxu1 }
  0xf9   : > { %1149 = vst.msk [vmem:[%s1751_s29 + $0x30] sm:$0xf] %vm1136_vm1, %v1412_v25  ;;  %1181 = vst.msk [vmem:[%s1751_s29 + $0xb0] sm:$0xf] %vm1136_vm1, %v1444_v26  ;;  %v829_v33 = vmax.f32 %v613_v27, 0.0  ;;  %v634_v36 = vadd.f32 %v1523_v31, %v1740_v35  ;;  %v762_v37 = vadd.f32 %v1555_v32, %v1740_v35 }
  0xfa   : > { %v861_v34 = vmax.f32 %v741_v28, 0.0  ;;  %v1415_v38 = vpack.c.bf16 %v831_v29, %v831_v29  ;;  %v1447_v39 = vpack.c.bf16 %v863_v30, %v863_v30  ;;  %v625_v40 = vpop.f32.mrf.mxu0  ;;  %v753_v41 = vpop.f32.mrf.mxu1 }
  0xfb   : > { %v1413_v42 = vpack.c.bf16 %v829_v33, %v829_v33  ;;  %v834_v44 = vmax.f32 %v634_v36, 0.0  ;;  %v866_v45 = vmax.f32 %v762_v37, 0.0  ;;  %v626_v46 = vadd.f32 %v1740_v35, %v625_v40 }
  0xfc   : > { %v1445_v43 = vpack.c.bf16 %v861_v34, %v861_v34  ;;  %1152 = vst.msk [vmem:[%s1751_s29 + $0x3c] sm:$0xf] %vm1136_vm1, %v1415_v38  ;;  %1184 = vst.msk [vmem:[%s1751_s29 + $0xbc] sm:$0xf] %vm1136_vm1, %v1447_v39  ;;  %v754_v47 = vadd.f32 %v1740_v35, %v753_v41  ;;  %v1524_v48 = vpop.f32.mrf.mxu0  ;;  %v1556_v49 = vpop.f32.mrf.mxu1 }
  0xfd   : > { %1150 = vst.msk [vmem:[%s1751_s29 + $0x34] sm:$0xf] %vm1136_vm1, %v1413_v42  ;;  %v1418_v50 = vpack.c.bf16 %v834_v44, %v834_v44  ;;  %v1450_v51 = vpack.c.bf16 %v866_v45, %v866_v45  ;;  %v637_v52 = vadd.f32 %v1524_v48, %v1740_v35  ;;  %v765_v53 = vadd.f32 %v1556_v49, %v1740_v35 }
  0xfe   : > { %1182 = vst.msk [vmem:[%s1751_s29 + $0xb4] sm:$0xf] %vm1136_vm1, %v1445_v43  ;;  %v832_v54 = vmax.f32 %v626_v46, 0.0  ;;  %v864_v55 = vmax.f32 %v754_v47, 0.0  ;;  %v628_v56 = vpop.f32.mrf.mxu0  ;;  %v756_v57 = vpop.f32.mrf.mxu1 }
  0xff   : > { %1155 = vst.msk [vmem:[%s1751_s29 + $0x48] sm:$0xf] %vm1136_vm1, %v1418_v50  ;;  %1187 = vst.msk [vmem:[%s1751_s29 + $0xc8] sm:$0xf] %vm1136_vm1, %v1450_v51  ;;  %v835_v58 = vmax.f32 %v637_v52, 0.0  ;;  %v867_v59 = vmax.f32 %v765_v53, 0.0  ;;  %v629_v60 = vadd.f32 %v1740_v35, %v628_v56  ;;  %v757_v61 = vadd.f32 %v1740_v35, %v756_v57 }
 0x100   : > { %v1416_v62 = vpack.c.bf16 %v832_v54, %v832_v54  ;;  %v1448_v63 = vpack.c.bf16 %v864_v55, %v864_v55  ;;  %v1527_v0 = vpop.f32.mrf.mxu0  ;;  %v1559_v1 = vpop.f32.mrf.mxu1 }
 0x101   : > { %v1419_v2 = vpack.c.bf16 %v835_v58, %v835_v58  ;;  %v1451_v3 = vpack.c.bf16 %v867_v59, %v867_v59  ;;  %v833_v4 = vmax.f32 %v629_v60, 0.0  ;;  %v865_v5 = vmax.f32 %v757_v61, 0.0 }
 0x102   : > { %1153 = vst.msk [vmem:[%s1751_s29 + $0x40] sm:$0xf] %vm1136_vm1, %v1416_v62  ;;  %1185 = vst.msk [vmem:[%s1751_s29 + $0xc0] sm:$0xf] %vm1136_vm1, %v1448_v63  ;;  %v650_v6 = vadd.f32 %v1527_v0, %v1740_v35  ;;  %v778_v7 = vadd.f32 %v1559_v1, %v1740_v35  ;;  %v641_v8 = vpop.f32.mrf.mxu0  ;;  %v769_v9 = vpop.f32.mrf.mxu1 }
 0x103   : > { %1156 = vst.msk [vmem:[%s1751_s29 + $0x4c] sm:$0xf] %vm1136_vm1, %v1419_v2  ;;  %1188 = vst.msk [vmem:[%s1751_s29 + $0xcc] sm:$0xf] %vm1136_vm1, %v1451_v3  ;;  %v1417_v10 = vpack.c.bf16 %v833_v4, %v833_v4  ;;  %v1449_v11 = vpack.c.bf16 %v865_v5, %v865_v5  ;;  %v642_v12 = vadd.f32 %v1740_v35, %v641_v8 }
 0x104   : > { %v770_v13 = vadd.f32 %v1740_v35, %v769_v9  ;;  %v838_v14 = vmax.f32 %v650_v6, 0.0  ;;  %v870_v15 = vmax.f32 %v778_v7, 0.0  ;;  %v1528_v16 = vpop.f32.mrf.mxu0  ;;  %v1560_v17 = vpop.f32.mrf.mxu1 }
 0x105   : > { %1154 = vst.msk [vmem:[%s1751_s29 + $0x44] sm:$0xf] %vm1136_vm1, %v1417_v10  ;;  %1186 = vst.msk [vmem:[%s1751_s29 + $0xc4] sm:$0xf] %vm1136_vm1, %v1449_v11  ;;  %v836_v18 = vmax.f32 %v642_v12, 0.0  ;;  %v653_v20 = vadd.f32 %v1528_v16, %v1740_v35  ;;  %v781_v21 = vadd.f32 %v1560_v17, %v1740_v35 }
 0x106   : > { %v868_v19 = vmax.f32 %v770_v13, 0.0  ;;  %v1422_v22 = vpack.c.bf16 %v838_v14, %v838_v14  ;;  %v1454_v23 = vpack.c.bf16 %v870_v15, %v870_v15  ;;  %v644_v24 = vpop.f32.mrf.mxu0  ;;  %v772_v25 = vpop.f32.mrf.mxu1 }
 0x107   : > { %v1420_v26 = vpack.c.bf16 %v836_v18, %v836_v18  ;;  %v839_v28 = vmax.f32 %v653_v20, 0.0  ;;  %v871_v29 = vmax.f32 %v781_v21, 0.0  ;;  %v645_v30 = vadd.f32 %v1740_v35, %v644_v24 }
 0x108   : > { %v1452_v27 = vpack.c.bf16 %v868_v19, %v868_v19  ;;  %1159 = vst.msk [vmem:[%s1751_s29 + $0x58] sm:$0xf] %vm1136_vm1, %v1422_v22  ;;  %1191 = vst.msk [vmem:[%s1751_s29 + $0xd8] sm:$0xf] %vm1136_vm1, %v1454_v23  ;;  %v773_v31 = vadd.f32 %v1740_v35, %v772_v25  ;;  %v1531_v32 = vpop.f32.mrf.mxu0  ;;  %v1563_v33 = vpop.f32.mrf.mxu1 }
 0x109   : > { %1157 = vst.msk [vmem:[%s1751_s29 + $0x50] sm:$0xf] %vm1136_vm1, %v1420_v26  ;;  %v1423_v34 = vpack.c.bf16 %v839_v28, %v839_v28  ;;  %v1455_v36 = vpack.c.bf16 %v871_v29, %v871_v29  ;;  %v666_v37 = vadd.f32 %v1531_v32, %v1740_v35  ;;  %v794_v38 = vadd.f32 %v1563_v33, %v1740_v35 }
 0x10a   : > { %1189 = vst.msk [vmem:[%s1751_s29 + $0xd0] sm:$0xf] %vm1136_vm1, %v1452_v27  ;;  %v837_v39 = vmax.f32 %v645_v30, 0.0  ;;  %v869_v40 = vmax.f32 %v773_v31, 0.0  ;;  %v657_v41 = vpop.f32.mrf.mxu0  ;;  %v785_v42 = vpop.f32.mrf.mxu1 }
 0x10b   : > { %1160 = vst.msk [vmem:[%s1751_s29 + $0x5c] sm:$0xf] %vm1136_vm1, %v1423_v34  ;;  %1192 = vst.msk [vmem:[%s1751_s29 + $0xdc] sm:$0xf] %vm1136_vm1, %v1455_v36  ;;  %v842_v43 = vmax.f32 %v666_v37, 0.0  ;;  %v874_v44 = vmax.f32 %v794_v38, 0.0  ;;  %v658_v45 = vadd.f32 %v1740_v35, %v657_v41  ;;  %v786_v46 = vadd.f32 %v1740_v35, %v785_v42 }
 0x10c   : > { %v1421_v47 = vpack.c.bf16 %v837_v39, %v837_v39  ;;  %v1453_v48 = vpack.c.bf16 %v869_v40, %v869_v40  ;;  %v1532_v49 = vpop.f32.mrf.mxu0  ;;  %v1564_v50 = vpop.f32.mrf.mxu1 }
 0x10d   : > { %v1426_v51 = vpack.c.bf16 %v842_v43, %v842_v43  ;;  %v1458_v52 = vpack.c.bf16 %v874_v44, %v874_v44  ;;  %v840_v53 = vmax.f32 %v658_v45, 0.0  ;;  %v872_v54 = vmax.f32 %v786_v46, 0.0 }
 0x10e   : > { %1158 = vst.msk [vmem:[%s1751_s29 + $0x54] sm:$0xf] %vm1136_vm1, %v1421_v47  ;;  %1190 = vst.msk [vmem:[%s1751_s29 + $0xd4] sm:$0xf] %vm1136_vm1, %v1453_v48  ;;  %v669_v55 = vadd.f32 %v1532_v49, %v1740_v35  ;;  %v797_v56 = vadd.f32 %v1564_v50, %v1740_v35  ;;  %v660_v57 = vpop.f32.mrf.mxu0  ;;  %v788_v58 = vpop.f32.mrf.mxu1 }
 0x10f   : > { %1163 = vst.msk [vmem:[%s1751_s29 + $0x68] sm:$0xf] %vm1136_vm1, %v1426_v51  ;;  %1195 = vst.msk [vmem:[%s1751_s29 + $0xe8] sm:$0xf] %vm1136_vm1, %v1458_v52  ;;  %v1424_v59 = vpack.c.bf16 %v840_v53, %v840_v53  ;;  %v1456_v60 = vpack.c.bf16 %v872_v54, %v872_v54  ;;  %v661_v61 = vadd.f32 %v1740_v35, %v660_v57 }
 0x110   : > { %v789_v62 = vadd.f32 %v1740_v35, %v788_v58  ;;  %v843_v63 = vmax.f32 %v669_v55, 0.0  ;;  %v875_v0 = vmax.f32 %v797_v56, 0.0  ;;  %v1535_v1 = vpop.f32.mrf.mxu0  ;;  %v1567_v2 = vpop.f32.mrf.mxu1 }
 0x111   : > { %1161 = vst.msk [vmem:[%s1751_s29 + $0x60] sm:$0xf] %vm1136_vm1, %v1424_v59  ;;  %1193 = vst.msk [vmem:[%s1751_s29 + $0xe0] sm:$0xf] %vm1136_vm1, %v1456_v60  ;;  %v841_v3 = vmax.f32 %v661_v61, 0.0  ;;  %v682_v5 = vadd.f32 %v1535_v1, %v1740_v35  ;;  %v810_v6 = vadd.f32 %v1567_v2, %v1740_v35 }
 0x112   : > { %v873_v4 = vmax.f32 %v789_v62, 0.0  ;;  %v1427_v7 = vpack.c.bf16 %v843_v63, %v843_v63  ;;  %v1459_v8 = vpack.c.bf16 %v875_v0, %v875_v0  ;;  %v673_v9 = vpop.f32.mrf.mxu0  ;;  %v801_v10 = vpop.f32.mrf.mxu1 }
 0x113   : > { %v1425_v11 = vpack.c.bf16 %v841_v3, %v841_v3  ;;  %v846_v13 = vmax.f32 %v682_v5, 0.0  ;;  %v878_v14 = vmax.f32 %v810_v6, 0.0  ;;  %v674_v15 = vadd.f32 %v1740_v35, %v673_v9 }
 0x114   : > { %v1457_v12 = vpack.c.bf16 %v873_v4, %v873_v4  ;;  %1164 = vst.msk [vmem:[%s1751_s29 + $0x6c] sm:$0xf] %vm1136_vm1, %v1427_v7  ;;  %1196 = vst.msk [vmem:[%s1751_s29 + $0xec] sm:$0xf] %vm1136_vm1, %v1459_v8  ;;  %v802_v16 = vadd.f32 %v1740_v35, %v801_v10  ;;  %v1536_v17 = vpop.f32.mrf.mxu0  ;;  %v1568_v18 = vpop.f32.mrf.mxu1 }
 0x115   : > { %1162 = vst.msk [vmem:[%s1751_s29 + $0x64] sm:$0xf] %vm1136_vm1, %v1425_v11  ;;  %v1430_v19 = vpack.c.bf16 %v846_v13, %v846_v13  ;;  %v1462_v20 = vpack.c.bf16 %v878_v14, %v878_v14  ;;  %v685_v21 = vadd.f32 %v1536_v17, %v1740_v35  ;;  %v813_v22 = vadd.f32 %v1568_v18, %v1740_v35 }
 0x116   : > { %1194 = vst.msk [vmem:[%s1751_s29 + $0xe4] sm:$0xf] %vm1136_vm1, %v1457_v12  ;;  %v844_v23 = vmax.f32 %v674_v15, 0.0  ;;  %v876_v24 = vmax.f32 %v802_v16, 0.0  ;;  %v676_v25 = vpop.f32.mrf.mxu0  ;;  %v804_v26 = vpop.f32.mrf.mxu1 }
 0x117   : > { %1167 = vst.msk [vmem:[%s1751_s29 + $0x78] sm:$0xf] %vm1136_vm1, %v1430_v19  ;;  %1199 = vst.msk [vmem:[%s1751_s29 + $0xf8] sm:$0xf] %vm1136_vm1, %v1462_v20  ;;  %v847_v27 = vmax.f32 %v685_v21, 0.0  ;;  %v879_v28 = vmax.f32 %v813_v22, 0.0  ;;  %v677_v29 = vadd.f32 %v1740_v35, %v676_v25  ;;  %v805_v30 = vadd.f32 %v1740_v35, %v804_v26 }
 0x118   : > { %v1428_v31 = vpack.c.bf16 %v844_v23, %v844_v23  ;;  %v1460_v32 = vpack.c.bf16 %v876_v24, %v876_v24 }
 0x119   : > { %v1431_v33 = vpack.c.bf16 %v847_v27, %v847_v27  ;;  %v1463_v34 = vpack.c.bf16 %v879_v28, %v879_v28  ;;  %v845_v36 = vmax.f32 %v677_v29, 0.0  ;;  %v877_v37 = vmax.f32 %v805_v30, 0.0 }
 0x11a   : > { %1165 = vst.msk [vmem:[%s1751_s29 + $0x70] sm:$0xf] %vm1136_vm1, %v1428_v31  ;;  %1197 = vst.msk [vmem:[%s1751_s29 + $0xf0] sm:$0xf] %vm1136_vm1, %v1460_v32 }
 0x11b   : > { %1168 = vst.msk [vmem:[%s1751_s29 + $0x7c] sm:$0xf] %vm1136_vm1, %v1431_v33  ;;  %1200 = vst.msk [vmem:[%s1751_s29 + $0xfc] sm:$0xf] %vm1136_vm1, %v1463_v34  ;;  %v1429_v38 = vpack.c.bf16 %v845_v36, %v845_v36  ;;  %v1461_v39 = vpack.c.bf16 %v877_v37, %v877_v37 }
 0x11d   : > { %1166 = vst.msk [vmem:[%s1751_s29 + $0x74] sm:$0xf] %vm1136_vm1, %v1429_v38  ;;  %1198 = vst.msk [vmem:[%s1751_s29 + $0xf4] sm:$0xf] %vm1136_vm1, %v1461_v39 }
 0x11e PF: > { %s13_s12 = sadd.s32 1, %s1624_s12  }
 0x11f   : > { %p10_p4 = scmp.ge.s32.totalorder %s13_s12, 6  }
 0x121   :  { %12 = sbr.rel (!%p10_p4) target bundleno = 1 (0x1), region = 62 }

// kernel: ssidvae_forward.13
= control target key start
LH: loop header
LB: loop body
LE: loop exit
PB: predicated region body
PF: predicated region fallthrough
CT: control target
= control target key end

     0   :  { %s1958_s12 = smov 0   ;;  %s2246_s0 = inlined_call_operand.vmem [shape: bf16[512,512], index: 0, kind: input, shape index: {}]   ;;  %s2247_s1 = inlined_call_operand.vmem [shape: bf16[512,32], index: 1, kind: input, shape index: {}]   ;;  %s2248_s2 = inlined_call_operand.vmem [shape: f32[1,32], index: 2, kind: input, shape index: {}]   ;;  %s2249_s3 = inlined_call_operand.vmem [shape: bf16[512,32], index: 3, kind: output, shape index: {}]  }
   0x1 LB: > { %s1396_s13 = sadd.s32 4294967295, %s1936_s12   ;;  %p1400_p0 = scmp.ge.s32.totalorder %s1936_s12, 1  ;;  %s1936_s12 = sphi %s1958_s12, %s13_s12  }
   0x2   : > { %p139_p1 = scmp.lt.s32.totalorder %s1936_s12, 3 }
   0x4   : > { %p140_p2 = pnand %p1400_p0, %p139_p1 }
   0x5   : > { %s1401_s21 = sshll.u32 (!%p140_p2), %s1396_s13, 5 }
   0x6   : > { %143 = sbr.rel (%p140_p2) target bundleno = 375 (0x177), region = 32  ;;  %p165_p3 = scmp.lt.s32.totalorder (!%p140_p2), %s1401_s21, 63 }
   0xb   : > { %v1802_v0 = vld [vmem:[%s2247_s1 + $0x78] sm:$0xff]   ;;  %v1806_v4 = vld [vmem:[%s2247_s1 + $0x70] sm:$0xff]   ;;  %v1810_v8 = vld [vmem:[%s2247_s1 + $0x68] sm:$0xff]   ;;  %s2251_s21 = smov (!%p165_p3, %s1401_s21), 63  ;;  %vm1307_vm0 = vcmask 257024  }
   0xc   : > { %v1803_v1 = vld [vmem:[%s2247_s1 + $0xf8] sm:$0xff]   ;;  %1570 = vmatprep.subr.bf16.mxu0 %v1802_v0  ;;  %v1807_v5 = vld [vmem:[%s2247_s1 + $0xf0] sm:$0xff]   ;;  %v1811_v9 = vld [vmem:[%s2247_s1 + $0xe8] sm:$0xff]   ;;  %s1537_s18 = sshll.u32 %s2251_s21, 4  ;;  %s1405_s7 = sshll.u32 %s2251_s21, 2 }
   0xd   : > { %v1804_v2 = vld [vmem:[%s2247_s1 + $0x38] sm:$0xff]   ;;  %1682 = vmatprep.subr.bf16.mxu1 %v1803_v1  ;;  %v1808_v6 = vld [vmem:[%s2247_s1 + $0x30] sm:$0xff]   ;;  %v1812_v10 = vld [vmem:[%s2247_s1 + $0x28] sm:$0xff]   ;;  %s2064_s28 = scalar_lea.vmem %s2246_s0, %s1537_s18  ;;  %s2147_s10 = scalar_lea.vmem %s2249_s3, %s1405_s7 }
   0xe   : > { %v1805_v3 = vld [vmem:[%s2247_s1 + $0xb8] sm:$0xff]   ;;  %1571 = vmatpush3.bf16.msra.mxu0 %v1804_v2  ;;  %v1809_v7 = vld [vmem:[%s2247_s1 + $0xb0] sm:$0xff]   ;;  %v1813_v11 = vld [vmem:[%s2247_s1 + $0xa8] sm:$0xff]  }
   0xf   : > { %1683 = vmatpush3.bf16.msra.mxu1 %v1805_v3  ;;  %1572 = vmatprep.subr.bf16.mxu0 %v1806_v4  ;;  %v1814_v12 = vld [vmem:[%s2247_s1 + $0x60] sm:$0xff]   ;;  %v1818_v16 = vld [vmem:[%s2247_s1 + $0x58] sm:$0xff]   ;;  %v1822_v20 = vld [vmem:[%s2247_s1 + $0x50] sm:$0xff]  }
  0x10   : > { %1684 = vmatprep.subr.bf16.mxu1 %v1807_v5  ;;  %v1815_v13 = vld [vmem:[%s2247_s1 + $0xe0] sm:$0xff]   ;;  %v1819_v17 = vld [vmem:[%s2247_s1 + $0xd8] sm:$0xff]   ;;  %v1823_v21 = vld [vmem:[%s2247_s1 + $0xd0] sm:$0xff]  }
  0x11   : > { %v1816_v14 = vld [vmem:[%s2247_s1 + $0x20] sm:$0xff]   ;;  %v1820_v18 = vld [vmem:[%s2247_s1 + $0x18] sm:$0xff]   ;;  %v1824_v22 = vld [vmem:[%s2247_s1 + $0x10] sm:$0xff]  }
  0x12   : > { %1573 = vmatpush3.bf16.msra.mxu0 %v1808_v6  ;;  %v1817_v15 = vld [vmem:[%s2247_s1 + $0xa0] sm:$0xff]   ;;  %v1821_v19 = vld [vmem:[%s2247_s1 + $0x98] sm:$0xff]   ;;  %v1825_v23 = vld [vmem:[%s2247_s1 + $0x90] sm:$0xff]  }
  0x13   : > { %1685 = vmatpush3.bf16.msra.mxu1 %v1809_v7  ;;  %1574 = vmatprep.subr.bf16.mxu0 %v1810_v8  ;;  %v1826_v24 = vld [vmem:[%s2247_s1 + $0x48] sm:$0xff]   ;;  %v1830_v28 = vld [vmem:[%s2247_s1 + $0x40] sm:$0xff]  }
  0x14   : > { %1686 = vmatprep.subr.bf16.mxu1 %v1811_v9  ;;  %v1827_v25 = vld [vmem:[%s2247_s1 + $0xc8] sm:$0xff]   ;;  %v1831_v29 = vld [vmem:[%s2247_s1 + $0xc0] sm:$0xff]  }
  0x15   : > { %v1828_v26 = vld [vmem:[%s2247_s1 + $0x8] sm:$0xff]   ;;  %v1832_v30 = vld [vmem:[%s2247_s1] sm:$0xff]  }
  0x16   : > { %1575 = vmatpush3.bf16.msra.mxu0 %v1812_v10  ;;  %v1829_v27 = vld [vmem:[%s2247_s1 + $0x88] sm:$0xff]   ;;  %v1833_v31 = vld [vmem:[%s2247_s1 + $0x80] sm:$0xff]  }
  0x17   : > { %1687 = vmatpush3.bf16.msra.mxu1 %v1813_v11  ;;  %1576 = vmatprep.subr.bf16.mxu0 %v1814_v12  ;;  %v1834_v32 = vld [vmem:[%s2064_s28] ss:$16 sps:$4 sm:$0xff]   ;;  %v1836_v33 = vld [vmem:[%s2064_s28 + $0x4] ss:$16 sps:$4 sm:$0xff]   ;;  %v1837_v34 = vld [vmem:[%s2064_s28 + $0x8] ss:$16 sps:$4 sm:$0xff]  }
  0x18   : > { %1688 = vmatprep.subr.bf16.mxu1 %v1815_v13  ;;  %v1839_v35 = vld [vmem:[%s2064_s28 + $0xc] ss:$16 sps:$4 sm:$0xff]   ;;  %857 = vmatprep.mubr.bf16.mxu0 %v1836_v33  ;;  %v1840_v36 = vld [vmem:[%s2064_s28 + $0x24] ss:$16 sps:$4 sm:$0xff]   ;;  %v1844_v38 = vld [vmem:[%s2064_s28 + $0x20] ss:$16 sps:$4 sm:$0xff]  }
  0x19   : > { %1018 = vmatprep.mubr.bf16.mxu1 %v1839_v35  ;;  %v1842_v37 = vld [vmem:[%s2064_s28 + $0x2c] ss:$16 sps:$4 sm:$0xff]   ;;  %v1845_v39 = vld [vmem:[%s2064_s28 + $0x28] ss:$16 sps:$4 sm:$0xff]   ;;  %v1846_v40 = vld [vmem:[%s2064_s28 + $0x44] ss:$16 sps:$4 sm:$0xff]  }
  0x1a   : > { %1577 = vmatpush3.bf16.msra.mxu0 %v1816_v14  ;;  %v1848_v41 = vld [vmem:[%s2064_s28 + $0x4c] ss:$16 sps:$4 sm:$0xff]   ;;  %v1850_v42 = vld [vmem:[%s2064_s28 + $0x40] ss:$16 sps:$4 sm:$0xff]   ;;  %v1851_v43 = vld [vmem:[%s2064_s28 + $0x48] ss:$16 sps:$4 sm:$0xff]  }
  0x1b   : > { %1689 = vmatpush3.bf16.msra.mxu1 %v1817_v15  ;;  %1578 = vmatprep.subr.bf16.mxu0 %v1818_v16  ;;  %v1852_v44 = vld [vmem:[%s2064_s28 + $0x64] ss:$16 sps:$4 sm:$0xff]   ;;  %v1854_v45 = vld [vmem:[%s2064_s28 + $0x6c] ss:$16 sps:$4 sm:$0xff]   ;;  %v1856_v46 = vld [vmem:[%s2064_s28 + $0x60] ss:$16 sps:$4 sm:$0xff]  }
  0x1c   : > { %1690 = vmatprep.subr.bf16.mxu1 %v1819_v17  ;;  %v1857_v47 = vld [vmem:[%s2064_s28 + $0x68] ss:$16 sps:$4 sm:$0xff]   ;;  %v1858_v48 = vld [vmem:[%s2064_s28 + $0x84] ss:$16 sps:$4 sm:$0xff]   ;;  %v1860_v49 = vld [vmem:[%s2064_s28 + $0x8c] ss:$16 sps:$4 sm:$0xff]  }
  0x1d   : > { %v1862_v50 = vld [vmem:[%s2064_s28 + $0x80] ss:$16 sps:$4 sm:$0xff]   ;;  %v1863_v51 = vld [vmem:[%s2064_s28 + $0x88] ss:$16 sps:$4 sm:$0xff]   ;;  %v1864_v52 = vld [vmem:[%s2064_s28 + $0xa4] ss:$16 sps:$4 sm:$0xff]  }
  0x1e   : > { %1579 = vmatpush3.bf16.msra.mxu0 %v1820_v18  ;;  %v1866_v53 = vld [vmem:[%s2064_s28 + $0xac] ss:$16 sps:$4 sm:$0xff]   ;;  %v1868_v54 = vld [vmem:[%s2064_s28 + $0xa0] ss:$16 sps:$4 sm:$0xff]   ;;  %v1869_v55 = vld [vmem:[%s2064_s28 + $0xa8] ss:$16 sps:$4 sm:$0xff]  }
  0x1f   : > { %1691 = vmatpush3.bf16.msra.mxu1 %v1821_v19  ;;  %1580 = vmatprep.subr.bf16.mxu0 %v1822_v20  ;;  %v1870_v56 = vld [vmem:[%s2064_s28 + $0xc4] ss:$16 sps:$4 sm:$0xff]   ;;  %v1872_v57 = vld [vmem:[%s2064_s28 + $0xcc] ss:$16 sps:$4 sm:$0xff]   ;;  %v1874_v58 = vld [vmem:[%s2064_s28 + $0xc0] ss:$16 sps:$4 sm:$0xff]  }
  0x20   : > { %1692 = vmatprep.subr.bf16.mxu1 %v1823_v21  ;;  %v1875_v59 = vld [vmem:[%s2064_s28 + $0xc8] ss:$16 sps:$4 sm:$0xff]   ;;  %v1876_v60 = vld [vmem:[%s2064_s28 + $0xe4] ss:$16 sps:$4 sm:$0xff]   ;;  %v1878_v61 = vld [vmem:[%s2064_s28 + $0xec] ss:$16 sps:$4 sm:$0xff]  }
  0x21   : > { %v1880_v62 = vld [vmem:[%s2064_s28 + $0xe0] ss:$16 sps:$4 sm:$0xff]   ;;  %v1881_v63 = vld [vmem:[%s2064_s28 + $0xe8] ss:$16 sps:$4 sm:$0xff]   ;;  %v1882_v0 = vld [vmem:[%s2064_s28 + $0x104] ss:$16 sps:$4 sm:$0xff]  }
  0x22   : > { %1581 = vmatpush3.bf16.msra.mxu0 %v1824_v22  ;;  %v1884_v1 = vld [vmem:[%s2064_s28 + $0x10c] ss:$16 sps:$4 sm:$0xff]   ;;  %v1886_v2 = vld [vmem:[%s2064_s28 + $0x100] ss:$16 sps:$4 sm:$0xff]   ;;  %v1887_v3 = vld [vmem:[%s2064_s28 + $0x108] ss:$16 sps:$4 sm:$0xff]  }
  0x23   : > { %1693 = vmatpush3.bf16.msra.mxu1 %v1825_v23  ;;  %1582 = vmatprep.subr.bf16.mxu0 %v1826_v24  ;;  %v1888_v4 = vld [vmem:[%s2064_s28 + $0x124] ss:$16 sps:$4 sm:$0xff]   ;;  %v1890_v5 = vld [vmem:[%s2064_s28 + $0x12c] ss:$16 sps:$4 sm:$0xff]   ;;  %v1892_v6 = vld [vmem:[%s2064_s28 + $0x120] ss:$16 sps:$4 sm:$0xff]  }
  0x24   : > { %1694 = vmatprep.subr.bf16.mxu1 %v1827_v25  ;;  %v1893_v7 = vld [vmem:[%s2064_s28 + $0x128] ss:$16 sps:$4 sm:$0xff]   ;;  %v1894_v8 = vld [vmem:[%s2064_s28 + $0x144] ss:$16 sps:$4 sm:$0xff]   ;;  %v1896_v9 = vld [vmem:[%s2064_s28 + $0x14c] ss:$16 sps:$4 sm:$0xff]  }
  0x25   : > { %v1898_v10 = vld [vmem:[%s2064_s28 + $0x140] ss:$16 sps:$4 sm:$0xff]   ;;  %v1899_v11 = vld [vmem:[%s2064_s28 + $0x148] ss:$16 sps:$4 sm:$0xff]   ;;  %v1900_v12 = vld [vmem:[%s2064_s28 + $0x164] ss:$16 sps:$4 sm:$0xff]  }
  0x26   : > { %1583 = vmatpush3.bf16.msra.mxu0 %v1828_v26  ;;  %v1902_v13 = vld [vmem:[%s2064_s28 + $0x16c] ss:$16 sps:$4 sm:$0xff]   ;;  %v1904_v14 = vld [vmem:[%s2064_s28 + $0x160] ss:$16 sps:$4 sm:$0xff]   ;;  %v1905_v15 = vld [vmem:[%s2064_s28 + $0x168] ss:$16 sps:$4 sm:$0xff]  }
  0x27   : > { %1695 = vmatpush3.bf16.msra.mxu1 %v1829_v27  ;;  %1584 = vmatprep.subr.bf16.mxu0 %v1830_v28  ;;  %v1906_v16 = vld [vmem:[%s2064_s28 + $0x184] ss:$16 sps:$4 sm:$0xff]   ;;  %v1908_v17 = vld [vmem:[%s2064_s28 + $0x18c] ss:$16 sps:$4 sm:$0xff]   ;;  %v1910_v18 = vld [vmem:[%s2064_s28 + $0x180] ss:$16 sps:$4 sm:$0xff]  }
  0x28   : > { %1696 = vmatprep.subr.bf16.mxu1 %v1831_v29  ;;  %v1911_v19 = vld [vmem:[%s2064_s28 + $0x188] ss:$16 sps:$4 sm:$0xff]   ;;  %v1912_v20 = vld [vmem:[%s2064_s28 + $0x1a4] ss:$16 sps:$4 sm:$0xff]   ;;  %v1914_v21 = vld [vmem:[%s2064_s28 + $0x1ac] ss:$16 sps:$4 sm:$0xff]  }
  0x29   : > { %v1916_v22 = vld [vmem:[%s2064_s28 + $0x1a0] ss:$16 sps:$4 sm:$0xff]   ;;  %v1917_v23 = vld [vmem:[%s2064_s28 + $0x1a8] ss:$16 sps:$4 sm:$0xff]   ;;  %v1918_v24 = vld [vmem:[%s2064_s28 + $0x1c4] ss:$16 sps:$4 sm:$0xff]  }
  0x2a   : > { %1585 = vmatpush3.bf16.msra.mxu0 %v1832_v30  ;;  %v1920_v25 = vld [vmem:[%s2064_s28 + $0x1cc] ss:$16 sps:$4 sm:$0xff]   ;;  %v1922_v26 = vld [vmem:[%s2064_s28 + $0x1c0] ss:$16 sps:$4 sm:$0xff]   ;;  %v1923_v27 = vld [vmem:[%s2064_s28 + $0x1c8] ss:$16 sps:$4 sm:$0xff]  }
  0x2b   : > { %1697 = vmatpush3.bf16.msra.mxu1 %v1833_v31  ;;  %v1924_v28 = vld [vmem:[%s2064_s28 + $0x1e4] ss:$16 sps:$4 sm:$0xff]   ;;  %v1926_v29 = vld [vmem:[%s2064_s28 + $0x1ec] ss:$16 sps:$4 sm:$0xff]   ;;  %v1928_v30 = vld [vmem:[%s2064_s28 + $0x1e0] ss:$16 sps:$4 sm:$0xff]  }
  0x2c   : > { %v1929_v31 = vld [vmem:[%s2064_s28 + $0x1e8] ss:$16 sps:$4 sm:$0xff]  }
  0x2d   : > { %858 = vmatmul.mubr.bf16.vlgmr.msra.gmra.mxu0 %v1834_v32 }
  0x2e   : > { %1019 = vmatmul.mubr.bf16.vlgmr.msra.gmra.mxu1 %v1837_v34  ;;  %865 = vmatprep.mubr.bf16.mxu0 %v1840_v36  ;;  %v2139_v34 = vld [vmem:[%s2248_s2] ss:$0 sm:$0xff] }
  0x2f   : > { %1026 = vmatprep.mubr.bf16.mxu1 %v1842_v37 }
  0x35   : > { %866 = vmatmul.mubr.bf16.gmra.mxu0 %v1844_v38 }
  0x36   : > { %1027 = vmatmul.mubr.bf16.gmra.mxu1 %v1845_v39  ;;  %873 = vmatprep.mubr.bf16.mxu0 %v1846_v40 }
  0x37   : > { %1034 = vmatprep.mubr.bf16.mxu1 %v1848_v41 }
  0x3d   : > { %874 = vmatmul.mubr.bf16.gmra.mxu0 %v1850_v42 }
  0x3e   : > { %1035 = vmatmul.mubr.bf16.gmra.mxu1 %v1851_v43  ;;  %881 = vmatprep.mubr.bf16.mxu0 %v1852_v44 }
  0x3f   : > { %1042 = vmatprep.mubr.bf16.mxu1 %v1854_v45 }
  0x45   : > { %882 = vmatmul.mubr.bf16.gmra.mxu0 %v1856_v46 }
  0x46   : > { %1043 = vmatmul.mubr.bf16.gmra.mxu1 %v1857_v47  ;;  %889 = vmatprep.mubr.bf16.mxu0 %v1858_v48 }
  0x47   : > { %1050 = vmatprep.mubr.bf16.mxu1 %v1860_v49 }
  0x4d   : > { %890 = vmatmul.mubr.bf16.gmra.mxu0 %v1862_v50 }
  0x4e   : > { %1051 = vmatmul.mubr.bf16.gmra.mxu1 %v1863_v51  ;;  %897 = vmatprep.mubr.bf16.mxu0 %v1864_v52 }
  0x4f   : > { %1058 = vmatprep.mubr.bf16.mxu1 %v1866_v53 }
  0x55   : > { %898 = vmatmul.mubr.bf16.gmra.mxu0 %v1868_v54 }
  0x56   : > { %1059 = vmatmul.mubr.bf16.gmra.mxu1 %v1869_v55  ;;  %905 = vmatprep.mubr.bf16.mxu0 %v1870_v56 }
  0x57   : > { %1066 = vmatprep.mubr.bf16.mxu1 %v1872_v57 }
  0x5d   : > { %906 = vmatmul.mubr.bf16.gmra.mxu0 %v1874_v58 }
  0x5e   : > { %1067 = vmatmul.mubr.bf16.gmra.mxu1 %v1875_v59  ;;  %913 = vmatprep.mubr.bf16.mxu0 %v1876_v60 }
  0x5f   : > { %1074 = vmatprep.mubr.bf16.mxu1 %v1878_v61 }
  0x65   : > { %914 = vmatmul.mubr.bf16.gmra.mxu0 %v1880_v62 }
  0x66   : > { %1075 = vmatmul.mubr.bf16.gmra.mxu1 %v1881_v63  ;;  %921 = vmatprep.mubr.bf16.mxu0 %v1882_v0 }
  0x67   : > { %1082 = vmatprep.mubr.bf16.mxu1 %v1884_v1 }
  0x6d   : > { %922 = vmatmul.mubr.bf16.gmra.mxu0 %v1886_v2 }
  0x6e   : > { %1083 = vmatmul.mubr.bf16.gmra.mxu1 %v1887_v3  ;;  %929 = vmatprep.mubr.bf16.mxu0 %v1888_v4 }
  0x6f   : > { %1090 = vmatprep.mubr.bf16.mxu1 %v1890_v5 }
  0x75   : > { %930 = vmatmul.mubr.bf16.gmra.mxu0 %v1892_v6 }
  0x76   : > { %1091 = vmatmul.mubr.bf16.gmra.mxu1 %v1893_v7  ;;  %937 = vmatprep.mubr.bf16.mxu0 %v1894_v8 }
  0x77   : > { %1098 = vmatprep.mubr.bf16.mxu1 %v1896_v9 }
  0x7d   : > { %938 = vmatmul.mubr.bf16.gmra.mxu0 %v1898_v10 }
  0x7e   : > { %1099 = vmatmul.mubr.bf16.gmra.mxu1 %v1899_v11  ;;  %945 = vmatprep.mubr.bf16.mxu0 %v1900_v12 }
  0x7f   : > { %1106 = vmatprep.mubr.bf16.mxu1 %v1902_v13 }
  0x85   : > { %946 = vmatmul.mubr.bf16.gmra.mxu0 %v1904_v14 }
  0x86   : > { %1107 = vmatmul.mubr.bf16.gmra.mxu1 %v1905_v15  ;;  %953 = vmatprep.mubr.bf16.mxu0 %v1906_v16 }
  0x87   : > { %1114 = vmatprep.mubr.bf16.mxu1 %v1908_v17 }
  0x8d   : > { %954 = vmatmul.mubr.bf16.gmra.mxu0 %v1910_v18 }
  0x8e   : > { %1115 = vmatmul.mubr.bf16.gmra.mxu1 %v1911_v19  ;;  %961 = vmatprep.mubr.bf16.mxu0 %v1912_v20 }
  0x8f   : > { %1122 = vmatprep.mubr.bf16.mxu1 %v1914_v21 }
  0x95   : > { %962 = vmatmul.mubr.bf16.gmra.mxu0 %v1916_v22 }
  0x96   : > { %1123 = vmatmul.mubr.bf16.gmra.mxu1 %v1917_v23  ;;  %969 = vmatprep.mubr.bf16.mxu0 %v1918_v24 }
  0x97   : > { %1130 = vmatprep.mubr.bf16.mxu1 %v1920_v25 }
  0x9d   : > { %970 = vmatmul.mubr.bf16.gmra.mxu0 %v1922_v26 }
  0x9e   : > { %1131 = vmatmul.mubr.bf16.gmra.mxu1 %v1923_v27  ;;  %977 = vmatprep.mubr.bf16.mxu0 %v1924_v28 }
  0x9f   : > { %1138 = vmatprep.mubr.bf16.mxu1 %v1926_v29 }
  0xa5   : > { %978 = vmatmul.mubr.bf16.gmra.mxu0 %v1928_v30 }
  0xa6   : > { %1139 = vmatmul.mubr.bf16.gmra.mxu1 %v1929_v31 }
  0xed   : > { %v1586_v32 = vpop.f32.mrf.mxu0 }
  0xee   : > { %v1698_v33 = vpop.f32.mrf.mxu1 }
  0xef   : > { %v1587_v35 = vpop.f32.mrf.mxu0 }
  0xf0   : > { %v1588_v36 = vadd.f32 %v1587_v35, %v1586_v32  ;;  %v1699_v37 = vpop.f32.mrf.mxu1 }
  0xf1   : > { %v1589_v38 = vpop.f32.mrf.mxu0  ;;  %v1700_v40 = vadd.f32 %v1699_v37, %v1698_v33 }
  0xf2   : > { %v860_v39 = vadd.f32 %v1588_v36, %v2139_v34  ;;  %v1701_v41 = vpop.f32.mrf.mxu1 }
  0xf3   : > { %v1590_v42 = vpop.f32.mrf.mxu0 }
  0xf4   : > { %v1021_v43 = vadd.f32 %v1700_v40, %v860_v39  ;;  %v1591_v44 = vadd.f32 %v1590_v42, %v1589_v38  ;;  %v1702_v45 = vpop.f32.mrf.mxu1 }
  0xf5   : > { %v1592_v46 = vpop.f32.mrf.mxu0  ;;  %v1703_v49 = vadd.f32 %v1702_v45, %v1701_v41 }
  0xf6   : > { %v1147_v47 = vmax.f32 %v1021_v43, 0.0  ;;  %v863_v48 = vadd.f32 %v1591_v44, %v2139_v34  ;;  %v1704_v50 = vpop.f32.mrf.mxu1 }
  0xf7   : > { %v1593_v51 = vpop.f32.mrf.mxu0 }
  0xf8   : > { %v1538_v52 = vpack.c.bf16 %v1147_v47, %v1147_v47  ;;  %v1024_v53 = vadd.f32 %v1703_v49, %v863_v48  ;;  %v1594_v54 = vadd.f32 %v1593_v51, %v1592_v46  ;;  %v1705_v55 = vpop.f32.mrf.mxu1 }
  0xf9   : > { %v1595_v56 = vpop.f32.mrf.mxu0  ;;  %v1706_v59 = vadd.f32 %v1705_v55, %v1704_v50 }
  0xfa   : > { %1308 = vst.msk [vmem:[%s2147_s10] sm:$0xf] %vm1307_vm0, %v1538_v52  ;;  %v1148_v57 = vmax.f32 %v1024_v53, 0.0  ;;  %v868_v58 = vadd.f32 %v1594_v54, %v2139_v34  ;;  %v1707_v60 = vpop.f32.mrf.mxu1 }
  0xfb   : > { %v1596_v61 = vpop.f32.mrf.mxu0 }
  0xfc   : > { %v1539_v62 = vpack.c.bf16 %v1148_v57, %v1148_v57  ;;  %v1029_v63 = vadd.f32 %v1706_v59, %v868_v58  ;;  %v1597_v0 = vadd.f32 %v1596_v61, %v1595_v56  ;;  %v1708_v1 = vpop.f32.mrf.mxu1 }
  0xfd   : > { %v1598_v2 = vpop.f32.mrf.mxu0  ;;  %v1709_v5 = vadd.f32 %v1708_v1, %v1707_v60 }
  0xfe   : > { %1309 = vst.msk [vmem:[%s2147_s10 + $0x4] sm:$0xf] %vm1307_vm0, %v1539_v62  ;;  %v1149_v3 = vmax.f32 %v1029_v63, 0.0  ;;  %v871_v4 = vadd.f32 %v1597_v0, %v2139_v34  ;;  %v1710_v6 = vpop.f32.mrf.mxu1 }
  0xff   : > { %v1599_v7 = vpop.f32.mrf.mxu0 }
 0x100   : > { %v1540_v8 = vpack.c.bf16 %v1149_v3, %v1149_v3  ;;  %v1032_v9 = vadd.f32 %v1709_v5, %v871_v4  ;;  %v1600_v10 = vadd.f32 %v1599_v7, %v1598_v2  ;;  %v1711_v11 = vpop.f32.mrf.mxu1 }
 0x101   : > { %v1601_v12 = vpop.f32.mrf.mxu0  ;;  %v1712_v15 = vadd.f32 %v1711_v11, %v1710_v6 }
 0x102   : > { %1310 = vst.msk [vmem:[%s2147_s10 + $0x8] sm:$0xf] %vm1307_vm0, %v1540_v8  ;;  %v1150_v13 = vmax.f32 %v1032_v9, 0.0  ;;  %v876_v14 = vadd.f32 %v1600_v10, %v2139_v34  ;;  %v1713_v16 = vpop.f32.mrf.mxu1 }
 0x103   : > { %v1602_v17 = vpop.f32.mrf.mxu0 }
 0x104   : > { %v1541_v18 = vpack.c.bf16 %v1150_v13, %v1150_v13  ;;  %v1037_v19 = vadd.f32 %v1712_v15, %v876_v14  ;;  %v1603_v20 = vadd.f32 %v1602_v17, %v1601_v12  ;;  %v1714_v21 = vpop.f32.mrf.mxu1 }
 0x105   : > { %v1604_v22 = vpop.f32.mrf.mxu0  ;;  %v1715_v25 = vadd.f32 %v1714_v21, %v1713_v16 }
 0x106   : > { %1311 = vst.msk [vmem:[%s2147_s10 + $0xc] sm:$0xf] %vm1307_vm0, %v1541_v18  ;;  %v1151_v23 = vmax.f32 %v1037_v19, 0.0  ;;  %v879_v24 = vadd.f32 %v1603_v20, %v2139_v34  ;;  %v1716_v26 = vpop.f32.mrf.mxu1 }
 0x107   : > { %v1605_v27 = vpop.f32.mrf.mxu0 }
 0x108   : > { %v1542_v28 = vpack.c.bf16 %v1151_v23, %v1151_v23  ;;  %v1040_v29 = vadd.f32 %v1715_v25, %v879_v24  ;;  %v1606_v30 = vadd.f32 %v1605_v27, %v1604_v22  ;;  %v1717_v31 = vpop.f32.mrf.mxu1 }
 0x109   : > { %v1607_v32 = vpop.f32.mrf.mxu0  ;;  %v1718_v36 = vadd.f32 %v1717_v31, %v1716_v26 }
 0x10a   : > { %1312 = vst.msk [vmem:[%s2147_s10 + $0x10] sm:$0xf] %vm1307_vm0, %v1542_v28  ;;  %v1152_v33 = vmax.f32 %v1040_v29, 0.0  ;;  %v884_v35 = vadd.f32 %v1606_v30, %v2139_v34  ;;  %v1719_v37 = vpop.f32.mrf.mxu1 }
 0x10b   : > { %v1608_v38 = vpop.f32.mrf.mxu0 }
 0x10c   : > { %v1543_v39 = vpack.c.bf16 %v1152_v33, %v1152_v33  ;;  %v1045_v40 = vadd.f32 %v1718_v36, %v884_v35  ;;  %v1609_v41 = vadd.f32 %v1608_v38, %v1607_v32  ;;  %v1720_v42 = vpop.f32.mrf.mxu1 }
 0x10d   : > { %v1610_v43 = vpop.f32.mrf.mxu0  ;;  %v1721_v46 = vadd.f32 %v1720_v42, %v1719_v37 }
 0x10e   : > { %1313 = vst.msk [vmem:[%s2147_s10 + $0x14] sm:$0xf] %vm1307_vm0, %v1543_v39  ;;  %v1153_v44 = vmax.f32 %v1045_v40, 0.0  ;;  %v887_v45 = vadd.f32 %v1609_v41, %v2139_v34  ;;  %v1722_v47 = vpop.f32.mrf.mxu1 }
 0x10f   : > { %v1611_v48 = vpop.f32.mrf.mxu0 }
 0x110   : > { %v1544_v49 = vpack.c.bf16 %v1153_v44, %v1153_v44  ;;  %v1048_v50 = vadd.f32 %v1721_v46, %v887_v45  ;;  %v1612_v51 = vadd.f32 %v1611_v48, %v1610_v43  ;;  %v1723_v52 = vpop.f32.mrf.mxu1 }
 0x111   : > { %v1613_v53 = vpop.f32.mrf.mxu0  ;;  %v1724_v56 = vadd.f32 %v1723_v52, %v1722_v47 }
 0x112   : > { %1314 = vst.msk [vmem:[%s2147_s10 + $0x18] sm:$0xf] %vm1307_vm0, %v1544_v49  ;;  %v1154_v54 = vmax.f32 %v1048_v50, 0.0  ;;  %v892_v55 = vadd.f32 %v1612_v51, %v2139_v34  ;;  %v1725_v57 = vpop.f32.mrf.mxu1 }
 0x113   : > { %v1614_v58 = vpop.f32.mrf.mxu0 }
 0x114   : > { %v1545_v59 = vpack.c.bf16 %v1154_v54, %v1154_v54  ;;  %v1053_v60 = vadd.f32 %v1724_v56, %v892_v55  ;;  %v1615_v61 = vadd.f32 %v1614_v58, %v1613_v53  ;;  %v1726_v62 = vpop.f32.mrf.mxu1 }
 0x115   : > { %v1616_v63 = vpop.f32.mrf.mxu0  ;;  %v1727_v2 = vadd.f32 %v1726_v62, %v1725_v57 }
 0x116   : > { %1315 = vst.msk [vmem:[%s2147_s10 + $0x1c] sm:$0xf] %vm1307_vm0, %v1545_v59  ;;  %v1155_v0 = vmax.f32 %v1053_v60, 0.0  ;;  %v895_v1 = vadd.f32 %v1615_v61, %v2139_v34  ;;  %v1728_v3 = vpop.f32.mrf.mxu1 }
 0x117   : > { %v1617_v4 = vpop.f32.mrf.mxu0 }
 0x118   : > { %v1546_v5 = vpack.c.bf16 %v1155_v0, %v1155_v0  ;;  %v1056_v6 = vadd.f32 %v1727_v2, %v895_v1  ;;  %v1618_v7 = vadd.f32 %v1617_v4, %v1616_v63  ;;  %v1729_v8 = vpop.f32.mrf.mxu1 }
 0x119   : > { %v1619_v9 = vpop.f32.mrf.mxu0  ;;  %v1730_v12 = vadd.f32 %v1729_v8, %v1728_v3 }
 0x11a   : > { %1316 = vst.msk [vmem:[%s2147_s10 + $0x20] sm:$0xf] %vm1307_vm0, %v1546_v5  ;;  %v1156_v10 = vmax.f32 %v1056_v6, 0.0  ;;  %v900_v11 = vadd.f32 %v1618_v7, %v2139_v34  ;;  %v1731_v13 = vpop.f32.mrf.mxu1 }
 0x11b   : > { %v1620_v14 = vpop.f32.mrf.mxu0 }
 0x11c   : > { %v1547_v15 = vpack.c.bf16 %v1156_v10, %v1156_v10  ;;  %v1061_v16 = vadd.f32 %v1730_v12, %v900_v11  ;;  %v1621_v17 = vadd.f32 %v1620_v14, %v1619_v9  ;;  %v1732_v18 = vpop.f32.mrf.mxu1 }
 0x11d   : > { %v1622_v19 = vpop.f32.mrf.mxu0  ;;  %v1733_v22 = vadd.f32 %v1732_v18, %v1731_v13 }
 0x11e   : > { %1317 = vst.msk [vmem:[%s2147_s10 + $0x24] sm:$0xf] %vm1307_vm0, %v1547_v15  ;;  %v1157_v20 = vmax.f32 %v1061_v16, 0.0  ;;  %v903_v21 = vadd.f32 %v1621_v17, %v2139_v34  ;;  %v1734_v23 = vpop.f32.mrf.mxu1 }
 0x11f   : > { %v1623_v24 = vpop.f32.mrf.mxu0 }
 0x120   : > { %v1548_v25 = vpack.c.bf16 %v1157_v20, %v1157_v20  ;;  %v1064_v26 = vadd.f32 %v1733_v22, %v903_v21  ;;  %v1624_v27 = vadd.f32 %v1623_v24, %v1622_v19  ;;  %v1735_v28 = vpop.f32.mrf.mxu1 }
 0x121   : > { %v1625_v29 = vpop.f32.mrf.mxu0  ;;  %v1736_v32 = vadd.f32 %v1735_v28, %v1734_v23 }
 0x122   : > { %1318 = vst.msk [vmem:[%s2147_s10 + $0x28] sm:$0xf] %vm1307_vm0, %v1548_v25  ;;  %v1158_v30 = vmax.f32 %v1064_v26, 0.0  ;;  %v908_v31 = vadd.f32 %v1624_v27, %v2139_v34  ;;  %v1737_v33 = vpop.f32.mrf.mxu1 }
 0x123   : > { %v1626_v35 = vpop.f32.mrf.mxu0 }
 0x124   : > { %v1549_v36 = vpack.c.bf16 %v1158_v30, %v1158_v30  ;;  %v1069_v37 = vadd.f32 %v1736_v32, %v908_v31  ;;  %v1627_v38 = vadd.f32 %v1626_v35, %v1625_v29  ;;  %v1738_v39 = vpop.f32.mrf.mxu1 }
 0x125   : > { %v1628_v40 = vpop.f32.mrf.mxu0  ;;  %v1739_v43 = vadd.f32 %v1738_v39, %v1737_v33 }
 0x126   : > { %1319 = vst.msk [vmem:[%s2147_s10 + $0x2c] sm:$0xf] %vm1307_vm0, %v1549_v36  ;;  %v1159_v41 = vmax.f32 %v1069_v37, 0.0  ;;  %v911_v42 = vadd.f32 %v1627_v38, %v2139_v34  ;;  %v1740_v44 = vpop.f32.mrf.mxu1 }
 0x127   : > { %v1629_v45 = vpop.f32.mrf.mxu0 }
 0x128   : > { %v1550_v46 = vpack.c.bf16 %v1159_v41, %v1159_v41  ;;  %v1072_v47 = vadd.f32 %v1739_v43, %v911_v42  ;;  %v1630_v48 = vadd.f32 %v1629_v45, %v1628_v40  ;;  %v1741_v49 = vpop.f32.mrf.mxu1 }
 0x129   : > { %v1631_v50 = vpop.f32.mrf.mxu0  ;;  %v1742_v53 = vadd.f32 %v1741_v49, %v1740_v44 }
 0x12a   : > { %1320 = vst.msk [vmem:[%s2147_s10 + $0x30] sm:$0xf] %vm1307_vm0, %v1550_v46  ;;  %v1160_v51 = vmax.f32 %v1072_v47, 0.0  ;;  %v916_v52 = vadd.f32 %v1630_v48, %v2139_v34  ;;  %v1743_v54 = vpop.f32.mrf.mxu1 }
 0x12b   : > { %v1632_v55 = vpop.f32.mrf.mxu0 }
 0x12c   : > { %v1551_v56 = vpack.c.bf16 %v1160_v51, %v1160_v51  ;;  %v1077_v57 = vadd.f32 %v1742_v53, %v916_v52  ;;  %v1633_v58 = vadd.f32 %v1632_v55, %v1631_v50  ;;  %v1744_v59 = vpop.f32.mrf.mxu1 }
 0x12d   : > { %v1634_v60 = vpop.f32.mrf.mxu0  ;;  %v1745_v63 = vadd.f32 %v1744_v59, %v1743_v54 }
 0x12e   : > { %1321 = vst.msk [vmem:[%s2147_s10 + $0x34] sm:$0xf] %vm1307_vm0, %v1551_v56  ;;  %v1161_v61 = vmax.f32 %v1077_v57, 0.0  ;;  %v919_v62 = vadd.f32 %v1633_v58, %v2139_v34  ;;  %v1746_v0 = vpop.f32.mrf.mxu1 }
 0x12f   : > { %v1635_v1 = vpop.f32.mrf.mxu0 }
 0x130   : > { %v1552_v2 = vpack.c.bf16 %v1161_v61, %v1161_v61  ;;  %v1080_v3 = vadd.f32 %v1745_v63, %v919_v62  ;;  %v1636_v4 = vadd.f32 %v1635_v1, %v1634_v60  ;;  %v1747_v5 = vpop.f32.mrf.mxu1 }
 0x131   : > { %v1637_v6 = vpop.f32.mrf.mxu0  ;;  %v1748_v9 = vadd.f32 %v1747_v5, %v1746_v0 }
 0x132   : > { %1322 = vst.msk [vmem:[%s2147_s10 + $0x38] sm:$0xf] %vm1307_vm0, %v1552_v2  ;;  %v1162_v7 = vmax.f32 %v1080_v3, 0.0  ;;  %v924_v8 = vadd.f32 %v1636_v4, %v2139_v34  ;;  %v1749_v10 = vpop.f32.mrf.mxu1 }
 0x133   : > { %v1638_v11 = vpop.f32.mrf.mxu0 }
 0x134   : > { %v1553_v12 = vpack.c.bf16 %v1162_v7, %v1162_v7  ;;  %v1085_v13 = vadd.f32 %v1748_v9, %v924_v8  ;;  %v1639_v14 = vadd.f32 %v1638_v11, %v1637_v6  ;;  %v1750_v15 = vpop.f32.mrf.mxu1 }
 0x135   : > { %v1640_v16 = vpop.f32.mrf.mxu0  ;;  %v1751_v19 = vadd.f32 %v1750_v15, %v1749_v10 }
 0x136   : > { %1323 = vst.msk [vmem:[%s2147_s10 + $0x3c] sm:$0xf] %vm1307_vm0, %v1553_v12  ;;  %v1163_v17 = vmax.f32 %v1085_v13, 0.0  ;;  %v927_v18 = vadd.f32 %v1639_v14, %v2139_v34  ;;  %v1752_v20 = vpop.f32.mrf.mxu1 }
 0x137   : > { %v1641_v21 = vpop.f32.mrf.mxu0 }
 0x138   : > { %v1554_v22 = vpack.c.bf16 %v1163_v17, %v1163_v17  ;;  %v1088_v23 = vadd.f32 %v1751_v19, %v927_v18  ;;  %v1642_v24 = vadd.f32 %v1641_v21, %v1640_v16  ;;  %v1753_v25 = vpop.f32.mrf.mxu1 }
 0x139   : > { %v1643_v26 = vpop.f32.mrf.mxu0  ;;  %v1754_v29 = vadd.f32 %v1753_v25, %v1752_v20 }
 0x13a   : > { %1324 = vst.msk [vmem:[%s2147_s10 + $0x40] sm:$0xf] %vm1307_vm0, %v1554_v22  ;;  %v1164_v27 = vmax.f32 %v1088_v23, 0.0  ;;  %v932_v28 = vadd.f32 %v1642_v24, %v2139_v34  ;;  %v1755_v30 = vpop.f32.mrf.mxu1 }
 0x13b   : > { %v1644_v31 = vpop.f32.mrf.mxu0 }
 0x13c   : > { %v1555_v32 = vpack.c.bf16 %v1164_v27, %v1164_v27  ;;  %v1093_v33 = vadd.f32 %v1754_v29, %v932_v28  ;;  %v1645_v35 = vadd.f32 %v1644_v31, %v1643_v26  ;;  %v1756_v36 = vpop.f32.mrf.mxu1 }
 0x13d   : > { %v1646_v37 = vpop.f32.mrf.mxu0  ;;  %v1757_v40 = vadd.f32 %v1756_v36, %v1755_v30 }
 0x13e   : > { %1325 = vst.msk [vmem:[%s2147_s10 + $0x44] sm:$0xf] %vm1307_vm0, %v1555_v32  ;;  %v1165_v38 = vmax.f32 %v1093_v33, 0.0  ;;  %v935_v39 = vadd.f32 %v1645_v35, %v2139_v34  ;;  %v1758_v41 = vpop.f32.mrf.mxu1 }
 0x13f   : > { %v1647_v42 = vpop.f32.mrf.mxu0 }
 0x140   : > { %v1556_v43 = vpack.c.bf16 %v1165_v38, %v1165_v38  ;;  %v1096_v44 = vadd.f32 %v1757_v40, %v935_v39  ;;  %v1648_v45 = vadd.f32 %v1647_v42, %v1646_v37  ;;  %v1759_v46 = vpop.f32.mrf.mxu1 }
 0x141   : > { %v1649_v47 = vpop.f32.mrf.mxu0  ;;  %v1760_v50 = vadd.f32 %v1759_v46, %v1758_v41 }
 0x142   : > { %1326 = vst.msk [vmem:[%s2147_s10 + $0x48] sm:$0xf] %vm1307_vm0, %v1556_v43  ;;  %v1166_v48 = vmax.f32 %v1096_v44, 0.0  ;;  %v940_v49 = vadd.f32 %v1648_v45, %v2139_v34  ;;  %v1761_v51 = vpop.f32.mrf.mxu1 }
 0x143   : > { %v1650_v52 = vpop.f32.mrf.mxu0 }
 0x144   : > { %v1557_v53 = vpack.c.bf16 %v1166_v48, %v1166_v48  ;;  %v1101_v54 = vadd.f32 %v1760_v50, %v940_v49  ;;  %v1651_v55 = vadd.f32 %v1650_v52, %v1649_v47  ;;  %v1762_v56 = vpop.f32.mrf.mxu1 }
 0x145   : > { %v1652_v57 = vpop.f32.mrf.mxu0  ;;  %v1763_v60 = vadd.f32 %v1762_v56, %v1761_v51 }
 0x146   : > { %1327 = vst.msk [vmem:[%s2147_s10 + $0x4c] sm:$0xf] %vm1307_vm0, %v1557_v53  ;;  %v1167_v58 = vmax.f32 %v1101_v54, 0.0  ;;  %v943_v59 = vadd.f32 %v1651_v55, %v2139_v34  ;;  %v1764_v61 = vpop.f32.mrf.mxu1 }
 0x147   : > { %v1653_v62 = vpop.f32.mrf.mxu0 }
 0x148   : > { %v1558_v63 = vpack.c.bf16 %v1167_v58, %v1167_v58  ;;  %v1104_v0 = vadd.f32 %v1763_v60, %v943_v59  ;;  %v1654_v1 = vadd.f32 %v1653_v62, %v1652_v57  ;;  %v1765_v2 = vpop.f32.mrf.mxu1 }
 0x149   : > { %v1655_v3 = vpop.f32.mrf.mxu0  ;;  %v1766_v6 = vadd.f32 %v1765_v2, %v1764_v61 }
 0x14a   : > { %1328 = vst.msk [vmem:[%s2147_s10 + $0x50] sm:$0xf] %vm1307_vm0, %v1558_v63  ;;  %v1168_v4 = vmax.f32 %v1104_v0, 0.0  ;;  %v948_v5 = vadd.f32 %v1654_v1, %v2139_v34  ;;  %v1767_v7 = vpop.f32.mrf.mxu1 }
 0x14b   : > { %v1656_v8 = vpop.f32.mrf.mxu0 }
 0x14c   : > { %v1559_v9 = vpack.c.bf16 %v1168_v4, %v1168_v4  ;;  %v1109_v10 = vadd.f32 %v1766_v6, %v948_v5  ;;  %v1657_v11 = vadd.f32 %v1656_v8, %v1655_v3  ;;  %v1768_v12 = vpop.f32.mrf.mxu1 }
 0x14d   : > { %v1658_v13 = vpop.f32.mrf.mxu0  ;;  %v1769_v16 = vadd.f32 %v1768_v12, %v1767_v7 }
 0x14e   : > { %1329 = vst.msk [vmem:[%s2147_s10 + $0x54] sm:$0xf] %vm1307_vm0, %v1559_v9  ;;  %v1169_v14 = vmax.f32 %v1109_v10, 0.0  ;;  %v951_v15 = vadd.f32 %v1657_v11, %v2139_v34  ;;  %v1770_v17 = vpop.f32.mrf.mxu1 }
 0x14f   : > { %v1659_v18 = vpop.f32.mrf.mxu0 }
 0x150   : > { %v1560_v19 = vpack.c.bf16 %v1169_v14, %v1169_v14  ;;  %v1112_v20 = vadd.f32 %v1769_v16, %v951_v15  ;;  %v1660_v21 = vadd.f32 %v1659_v18, %v1658_v13  ;;  %v1771_v22 = vpop.f32.mrf.mxu1 }
 0x151   : > { %v1661_v23 = vpop.f32.mrf.mxu0  ;;  %v1772_v26 = vadd.f32 %v1771_v22, %v1770_v17 }
 0x152   : > { %1330 = vst.msk [vmem:[%s2147_s10 + $0x58] sm:$0xf] %vm1307_vm0, %v1560_v19  ;;  %v1170_v24 = vmax.f32 %v1112_v20, 0.0  ;;  %v956_v25 = vadd.f32 %v1660_v21, %v2139_v34  ;;  %v1773_v27 = vpop.f32.mrf.mxu1 }
 0x153   : > { %v1662_v28 = vpop.f32.mrf.mxu0 }
 0x154   : > { %v1561_v29 = vpack.c.bf16 %v1170_v24, %v1170_v24  ;;  %v1117_v30 = vadd.f32 %v1772_v26, %v956_v25  ;;  %v1663_v31 = vadd.f32 %v1662_v28, %v1661_v23  ;;  %v1774_v32 = vpop.f32.mrf.mxu1 }
 0x155   : > { %v1664_v33 = vpop.f32.mrf.mxu0  ;;  %v1775_v37 = vadd.f32 %v1774_v32, %v1773_v27 }
 0x156   : > { %1331 = vst.msk [vmem:[%s2147_s10 + $0x5c] sm:$0xf] %vm1307_vm0, %v1561_v29  ;;  %v1171_v35 = vmax.f32 %v1117_v30, 0.0  ;;  %v959_v36 = vadd.f32 %v1663_v31, %v2139_v34  ;;  %v1776_v38 = vpop.f32.mrf.mxu1 }
 0x157   : > { %v1665_v39 = vpop.f32.mrf.mxu0 }
 0x158   : > { %v1562_v40 = vpack.c.bf16 %v1171_v35, %v1171_v35  ;;  %v1120_v41 = vadd.f32 %v1775_v37, %v959_v36  ;;  %v1666_v42 = vadd.f32 %v1665_v39, %v1664_v33  ;;  %v1777_v43 = vpop.f32.mrf.mxu1 }
 0x159   : > { %v1667_v44 = vpop.f32.mrf.mxu0  ;;  %v1778_v47 = vadd.f32 %v1777_v43, %v1776_v38 }
 0x15a   : > { %1332 = vst.msk [vmem:[%s2147_s10 + $0x60] sm:$0xf] %vm1307_vm0, %v1562_v40  ;;  %v1172_v45 = vmax.f32 %v1120_v41, 0.0  ;;  %v964_v46 = vadd.f32 %v1666_v42, %v2139_v34  ;;  %v1779_v48 = vpop.f32.mrf.mxu1 }
 0x15b   : > { %v1668_v49 = vpop.f32.mrf.mxu0 }
 0x15c   : > { %v1563_v50 = vpack.c.bf16 %v1172_v45, %v1172_v45  ;;  %v1125_v51 = vadd.f32 %v1778_v47, %v964_v46  ;;  %v1669_v52 = vadd.f32 %v1668_v49, %v1667_v44  ;;  %v1780_v53 = vpop.f32.mrf.mxu1 }
 0x15d   : > { %v1670_v54 = vpop.f32.mrf.mxu0  ;;  %v1781_v57 = vadd.f32 %v1780_v53, %v1779_v48 }
 0x15e   : > { %1333 = vst.msk [vmem:[%s2147_s10 + $0x64] sm:$0xf] %vm1307_vm0, %v1563_v50  ;;  %v1173_v55 = vmax.f32 %v1125_v51, 0.0  ;;  %v967_v56 = vadd.f32 %v1669_v52, %v2139_v34  ;;  %v1782_v58 = vpop.f32.mrf.mxu1 }
 0x15f   : > { %v1671_v59 = vpop.f32.mrf.mxu0 }
 0x160   : > { %v1564_v60 = vpack.c.bf16 %v1173_v55, %v1173_v55  ;;  %v1128_v61 = vadd.f32 %v1781_v57, %v967_v56  ;;  %v1672_v62 = vadd.f32 %v1671_v59, %v1670_v54  ;;  %v1783_v63 = vpop.f32.mrf.mxu1 }
 0x161   : > { %v1673_v0 = vpop.f32.mrf.mxu0  ;;  %v1784_v3 = vadd.f32 %v1783_v63, %v1782_v58 }
 0x162   : > { %1334 = vst.msk [vmem:[%s2147_s10 + $0x68] sm:$0xf] %vm1307_vm0, %v1564_v60  ;;  %v1174_v1 = vmax.f32 %v1128_v61, 0.0  ;;  %v972_v2 = vadd.f32 %v1672_v62, %v2139_v34  ;;  %v1785_v4 = vpop.f32.mrf.mxu1 }
 0x163   : > { %v1674_v5 = vpop.f32.mrf.mxu0 }
 0x164   : > { %v1565_v6 = vpack.c.bf16 %v1174_v1, %v1174_v1  ;;  %v1133_v7 = vadd.f32 %v1784_v3, %v972_v2  ;;  %v1675_v8 = vadd.f32 %v1674_v5, %v1673_v0  ;;  %v1786_v9 = vpop.f32.mrf.mxu1 }
 0x165   : > { %v1676_v10 = vpop.f32.mrf.mxu0  ;;  %v1787_v13 = vadd.f32 %v1786_v9, %v1785_v4 }
 0x166   : > { %1335 = vst.msk [vmem:[%s2147_s10 + $0x6c] sm:$0xf] %vm1307_vm0, %v1565_v6  ;;  %v1175_v11 = vmax.f32 %v1133_v7, 0.0  ;;  %v975_v12 = vadd.f32 %v1675_v8, %v2139_v34  ;;  %v1788_v14 = vpop.f32.mrf.mxu1 }
 0x167   : > { %v1677_v15 = vpop.f32.mrf.mxu0 }
 0x168   : > { %v1566_v16 = vpack.c.bf16 %v1175_v11, %v1175_v11  ;;  %v1136_v17 = vadd.f32 %v1787_v13, %v975_v12  ;;  %v1678_v18 = vadd.f32 %v1677_v15, %v1676_v10  ;;  %v1789_v19 = vpop.f32.mrf.mxu1 }
 0x169   : > { %v1679_v20 = vpop.f32.mrf.mxu0  ;;  %v1790_v23 = vadd.f32 %v1789_v19, %v1788_v14 }
 0x16a   : > { %1336 = vst.msk [vmem:[%s2147_s10 + $0x70] sm:$0xf] %vm1307_vm0, %v1566_v16  ;;  %v1176_v21 = vmax.f32 %v1136_v17, 0.0  ;;  %v980_v22 = vadd.f32 %v1678_v18, %v2139_v34  ;;  %v1791_v24 = vpop.f32.mrf.mxu1 }
 0x16b   : > { %v1680_v25 = vpop.f32.mrf.mxu0 }
 0x16c   : > { %v1567_v26 = vpack.c.bf16 %v1176_v21, %v1176_v21  ;;  %v1141_v27 = vadd.f32 %v1790_v23, %v980_v22  ;;  %v1681_v28 = vadd.f32 %v1680_v25, %v1679_v20  ;;  %v1792_v29 = vpop.f32.mrf.mxu1 }
 0x16d   : > { %v1793_v32 = vadd.f32 %v1792_v29, %v1791_v24 }
 0x16e   : > { %1337 = vst.msk [vmem:[%s2147_s10 + $0x74] sm:$0xf] %vm1307_vm0, %v1567_v26  ;;  %v1177_v30 = vmax.f32 %v1141_v27, 0.0  ;;  %v983_v31 = vadd.f32 %v1681_v28, %v2139_v34 }
 0x170   : > { %v1568_v33 = vpack.c.bf16 %v1177_v30, %v1177_v30  ;;  %v1144_v35 = vadd.f32 %v1793_v32, %v983_v31 }
 0x172   : > { %1338 = vst.msk [vmem:[%s2147_s10 + $0x78] sm:$0xf] %vm1307_vm0, %v1568_v33  ;;  %v1178_v36 = vmax.f32 %v1144_v35, 0.0 }
 0x174   : > { %v1569_v37 = vpack.c.bf16 %v1178_v36, %v1178_v36 }
 0x176   : > { %1339 = vst.msk [vmem:[%s2147_s10 + $0x7c] sm:$0xf] %vm1307_vm0, %v1569_v37 }
 0x177 PF: > { %s13_s12 = sadd.s32 1, %s1936_s12  }
 0x178   : > { %p10_p4 = scmp.ge.s32.totalorder %s13_s12, 4  }
 0x17a   :  { %12 = sbr.rel (!%p10_p4) target bundleno = 1 (0x1), region = 62 }

// kernel: ssidvae_forward.14
= control target key start
LH: loop header
LB: loop body
LE: loop exit
PB: predicated region body
PF: predicated region fallthrough
CT: control target
= control target key end

     0   :  { %vm744_vm0 = vcmask 519168   ;;  %s1367_s1 = inlined_call_operand.vmem [shape: bf16[512,64], index: 1, kind: input, shape index: {}]   ;;  %s1368_s0 = inlined_call_operand.vmem [shape: bf16[128,512], index: 0, kind: input, shape index: {}]   ;;  %s1369_s2 = inlined_call_operand.vmem [shape: f32[1,64], index: 2, kind: input, shape index: {}]   ;;  %s1370_s3 = inlined_call_operand.vmem [shape: bf16[128,64], index: 3, kind: output, shape index: {}]  }
   0x1   :  { %v990_v0 = vld [vmem:[%s1367_s1 + $0x78] sm:$0xff]   ;;  %v994_v4 = vld [vmem:[%s1367_s1 + $0x70] sm:$0xff]   ;;  %v998_v8 = vld [vmem:[%s1367_s1 + $0x68] sm:$0xff]  }
   0x2   :  { %v991_v1 = vld [vmem:[%s1367_s1 + $0xf8] sm:$0xff]   ;;  %862 = vmatprep.subr.bf16.mxu0 %v990_v0  ;;  %v995_v5 = vld [vmem:[%s1367_s1 + $0xf0] sm:$0xff]   ;;  %v999_v9 = vld [vmem:[%s1367_s1 + $0xe8] sm:$0xff]  }
   0x3   :  { %v992_v2 = vld [vmem:[%s1367_s1 + $0x38] sm:$0xff]   ;;  %926 = vmatprep.subr.bf16.mxu1 %v991_v1  ;;  %v996_v6 = vld [vmem:[%s1367_s1 + $0x30] sm:$0xff]   ;;  %v1000_v10 = vld [vmem:[%s1367_s1 + $0x28] sm:$0xff]  }
   0x4   :  { %v993_v3 = vld [vmem:[%s1367_s1 + $0xb8] sm:$0xff]   ;;  %863 = vmatpush3.bf16.msra.mxu0 %v992_v2  ;;  %v997_v7 = vld [vmem:[%s1367_s1 + $0xb0] sm:$0xff]   ;;  %v1001_v11 = vld [vmem:[%s1367_s1 + $0xa8] sm:$0xff]  }
   0x5   :  { %927 = vmatpush3.bf16.msra.mxu1 %v993_v3  ;;  %864 = vmatprep.subr.bf16.mxu0 %v994_v4  ;;  %v1002_v12 = vld [vmem:[%s1367_s1 + $0x60] sm:$0xff]   ;;  %v1006_v16 = vld [vmem:[%s1367_s1 + $0x58] sm:$0xff]   ;;  %v1010_v20 = vld [vmem:[%s1367_s1 + $0x50] sm:$0xff]  }
   0x6   :  { %928 = vmatprep.subr.bf16.mxu1 %v995_v5  ;;  %v1003_v13 = vld [vmem:[%s1367_s1 + $0xe0] sm:$0xff]   ;;  %v1007_v17 = vld [vmem:[%s1367_s1 + $0xd8] sm:$0xff]   ;;  %v1011_v21 = vld [vmem:[%s1367_s1 + $0xd0] sm:$0xff]  }
   0x7   :  { %v1004_v14 = vld [vmem:[%s1367_s1 + $0x20] sm:$0xff]   ;;  %v1008_v18 = vld [vmem:[%s1367_s1 + $0x18] sm:$0xff]   ;;  %v1012_v22 = vld [vmem:[%s1367_s1 + $0x10] sm:$0xff]  }
   0x8   :  { %865 = vmatpush3.bf16.msra.mxu0 %v996_v6  ;;  %v1005_v15 = vld [vmem:[%s1367_s1 + $0xa0] sm:$0xff]   ;;  %v1009_v19 = vld [vmem:[%s1367_s1 + $0x98] sm:$0xff]   ;;  %v1013_v23 = vld [vmem:[%s1367_s1 + $0x90] sm:$0xff]  }
   0x9   :  { %929 = vmatpush3.bf16.msra.mxu1 %v997_v7  ;;  %866 = vmatprep.subr.bf16.mxu0 %v998_v8  ;;  %v1014_v24 = vld [vmem:[%s1367_s1 + $0x48] sm:$0xff]   ;;  %v1018_v28 = vld [vmem:[%s1367_s1 + $0x40] sm:$0xff]  }
   0xa   :  { %930 = vmatprep.subr.bf16.mxu1 %v999_v9  ;;  %v1015_v25 = vld [vmem:[%s1367_s1 + $0xc8] sm:$0xff]   ;;  %v1019_v29 = vld [vmem:[%s1367_s1 + $0xc0] sm:$0xff]  }
   0xb   :  { %v1016_v26 = vld [vmem:[%s1367_s1 + $0x8] sm:$0xff]   ;;  %v1020_v30 = vld [vmem:[%s1367_s1] sm:$0xff]  }
   0xc   :  { %867 = vmatpush3.bf16.msra.mxu0 %v1000_v10  ;;  %v1017_v27 = vld [vmem:[%s1367_s1 + $0x88] sm:$0xff]   ;;  %v1021_v31 = vld [vmem:[%s1367_s1 + $0x80] sm:$0xff]  }
   0xd   :  { %931 = vmatpush3.bf16.msra.mxu1 %v1001_v11  ;;  %868 = vmatprep.subr.bf16.mxu0 %v1002_v12  ;;  %v1022_v32 = vld [vmem:[%s1368_s0] ss:$16 sps:$4 sm:$0xff]   ;;  %v1024_v33 = vld [vmem:[%s1368_s0 + $0x4] ss:$16 sps:$4 sm:$0xff]   ;;  %v1025_v34 = vld [vmem:[%s1368_s0 + $0x8] ss:$16 sps:$4 sm:$0xff]  }
   0xe   :  { %932 = vmatprep.subr.bf16.mxu1 %v1003_v13  ;;  %v1027_v35 = vld [vmem:[%s1368_s0 + $0xc] ss:$16 sps:$4 sm:$0xff]   ;;  %502 = vmatprep.mubr.bf16.mxu0 %v1024_v33  ;;  %v1028_v36 = vld [vmem:[%s1368_s0 + $0x24] ss:$16 sps:$4 sm:$0xff]   ;;  %v1032_v38 = vld [vmem:[%s1368_s0 + $0x20] ss:$16 sps:$4 sm:$0xff]  }
   0xf   :  { %599 = vmatprep.mubr.bf16.mxu1 %v1027_v35  ;;  %v1030_v37 = vld [vmem:[%s1368_s0 + $0x2c] ss:$16 sps:$4 sm:$0xff]   ;;  %v1033_v39 = vld [vmem:[%s1368_s0 + $0x28] ss:$16 sps:$4 sm:$0xff]   ;;  %v1034_v40 = vld [vmem:[%s1368_s0 + $0x44] ss:$16 sps:$4 sm:$0xff]  }
  0x10   :  { %869 = vmatpush3.bf16.msra.mxu0 %v1004_v14  ;;  %v1036_v41 = vld [vmem:[%s1368_s0 + $0x4c] ss:$16 sps:$4 sm:$0xff]   ;;  %v1038_v42 = vld [vmem:[%s1368_s0 + $0x40] ss:$16 sps:$4 sm:$0xff]   ;;  %v1039_v43 = vld [vmem:[%s1368_s0 + $0x48] ss:$16 sps:$4 sm:$0xff]  }
  0x11   :  { %933 = vmatpush3.bf16.msra.mxu1 %v1005_v15  ;;  %870 = vmatprep.subr.bf16.mxu0 %v1006_v16  ;;  %v1040_v44 = vld [vmem:[%s1368_s0 + $0x64] ss:$16 sps:$4 sm:$0xff]   ;;  %v1042_v45 = vld [vmem:[%s1368_s0 + $0x6c] ss:$16 sps:$4 sm:$0xff]   ;;  %v1044_v46 = vld [vmem:[%s1368_s0 + $0x60] ss:$16 sps:$4 sm:$0xff]  }
  0x12   :  { %934 = vmatprep.subr.bf16.mxu1 %v1007_v17  ;;  %v1045_v47 = vld [vmem:[%s1368_s0 + $0x68] ss:$16 sps:$4 sm:$0xff]   ;;  %v1046_v48 = vld [vmem:[%s1368_s0 + $0x84] ss:$16 sps:$4 sm:$0xff]   ;;  %v1048_v49 = vld [vmem:[%s1368_s0 + $0x8c] ss:$16 sps:$4 sm:$0xff]  }
  0x13   :  { %v1050_v50 = vld [vmem:[%s1368_s0 + $0x80] ss:$16 sps:$4 sm:$0xff]   ;;  %v1051_v51 = vld [vmem:[%s1368_s0 + $0x88] ss:$16 sps:$4 sm:$0xff]   ;;  %v1052_v52 = vld [vmem:[%s1368_s0 + $0xa4] ss:$16 sps:$4 sm:$0xff]  }
  0x14   :  { %871 = vmatpush3.bf16.msra.mxu0 %v1008_v18  ;;  %v1054_v53 = vld [vmem:[%s1368_s0 + $0xac] ss:$16 sps:$4 sm:$0xff]   ;;  %v1056_v54 = vld [vmem:[%s1368_s0 + $0xa0] ss:$16 sps:$4 sm:$0xff]   ;;  %v1057_v55 = vld [vmem:[%s1368_s0 + $0xa8] ss:$16 sps:$4 sm:$0xff]  }
  0x15   :  { %935 = vmatpush3.bf16.msra.mxu1 %v1009_v19  ;;  %872 = vmatprep.subr.bf16.mxu0 %v1010_v20  ;;  %v1058_v56 = vld [vmem:[%s1368_s0 + $0xc4] ss:$16 sps:$4 sm:$0xff]   ;;  %v1060_v57 = vld [vmem:[%s1368_s0 + $0xcc] ss:$16 sps:$4 sm:$0xff]   ;;  %v1062_v58 = vld [vmem:[%s1368_s0 + $0xc0] ss:$16 sps:$4 sm:$0xff]  }
  0x16   :  { %936 = vmatprep.subr.bf16.mxu1 %v1011_v21  ;;  %v1063_v59 = vld [vmem:[%s1368_s0 + $0xc8] ss:$16 sps:$4 sm:$0xff]   ;;  %v1064_v60 = vld [vmem:[%s1368_s0 + $0xe4] ss:$16 sps:$4 sm:$0xff]   ;;  %v1066_v61 = vld [vmem:[%s1368_s0 + $0xec] ss:$16 sps:$4 sm:$0xff]  }
  0x17   :  { %v1068_v62 = vld [vmem:[%s1368_s0 + $0xe0] ss:$16 sps:$4 sm:$0xff]   ;;  %v1069_v63 = vld [vmem:[%s1368_s0 + $0xe8] ss:$16 sps:$4 sm:$0xff]  }
  0x18   :  { %873 = vmatpush3.bf16.msra.mxu0 %v1012_v22  ;;  %v1285_v2 = vld [vmem:[%s1369_s2] ss:$0 sm:$0xff] }
  0x19   :  { %937 = vmatpush3.bf16.msra.mxu1 %v1013_v23  ;;  %874 = vmatprep.subr.bf16.mxu0 %v1014_v24 }
  0x1a   :  { %938 = vmatprep.subr.bf16.mxu1 %v1015_v25 }
  0x1c   :  { %875 = vmatpush3.bf16.msra.mxu0 %v1016_v26 }
  0x1d   :  { %939 = vmatpush3.bf16.msra.mxu1 %v1017_v27  ;;  %876 = vmatprep.subr.bf16.mxu0 %v1018_v28 }
  0x1e   :  { %940 = vmatprep.subr.bf16.mxu1 %v1019_v29 }
  0x20   :  { %877 = vmatpush3.bf16.msra.mxu0 %v1020_v30 }
  0x21   :  { %941 = vmatpush3.bf16.msra.mxu1 %v1021_v31 }
  0x23   :  { %503 = vmatmul.mubr.bf16.vlgmr.msra.gmra.mxu0 %v1022_v32 }
  0x24   :  { %600 = vmatmul.mubr.bf16.vlgmr.msra.gmra.mxu1 %v1025_v34  ;;  %510 = vmatprep.mubr.bf16.mxu0 %v1028_v36 }
  0x25   :  { %607 = vmatprep.mubr.bf16.mxu1 %v1030_v37 }
  0x2b   :  { %511 = vmatmul.mubr.bf16.gmra.mxu0 %v1032_v38 }
  0x2c   :  { %608 = vmatmul.mubr.bf16.gmra.mxu1 %v1033_v39  ;;  %518 = vmatprep.mubr.bf16.mxu0 %v1034_v40 }
  0x2d   :  { %615 = vmatprep.mubr.bf16.mxu1 %v1036_v41 }
  0x33   :  { %519 = vmatmul.mubr.bf16.gmra.mxu0 %v1038_v42 }
  0x34   :  { %616 = vmatmul.mubr.bf16.gmra.mxu1 %v1039_v43  ;;  %526 = vmatprep.mubr.bf16.mxu0 %v1040_v44 }
  0x35   :  { %623 = vmatprep.mubr.bf16.mxu1 %v1042_v45 }
  0x3b   :  { %527 = vmatmul.mubr.bf16.gmra.mxu0 %v1044_v46 }
  0x3c   :  { %624 = vmatmul.mubr.bf16.gmra.mxu1 %v1045_v47  ;;  %534 = vmatprep.mubr.bf16.mxu0 %v1046_v48 }
  0x3d   :  { %631 = vmatprep.mubr.bf16.mxu1 %v1048_v49 }
  0x43   :  { %535 = vmatmul.mubr.bf16.gmra.mxu0 %v1050_v50 }
  0x44   :  { %632 = vmatmul.mubr.bf16.gmra.mxu1 %v1051_v51  ;;  %542 = vmatprep.mubr.bf16.mxu0 %v1052_v52 }
  0x45   :  { %639 = vmatprep.mubr.bf16.mxu1 %v1054_v53 }
  0x4b   :  { %543 = vmatmul.mubr.bf16.gmra.mxu0 %v1056_v54 }
  0x4c   :  { %640 = vmatmul.mubr.bf16.gmra.mxu1 %v1057_v55  ;;  %550 = vmatprep.mubr.bf16.mxu0 %v1058_v56 }
  0x4d   :  { %647 = vmatprep.mubr.bf16.mxu1 %v1060_v57 }
  0x53   :  { %551 = vmatmul.mubr.bf16.gmra.mxu0 %v1062_v58 }
  0x54   :  { %648 = vmatmul.mubr.bf16.gmra.mxu1 %v1063_v59  ;;  %558 = vmatprep.mubr.bf16.mxu0 %v1064_v60 }
  0x55   :  { %655 = vmatprep.mubr.bf16.mxu1 %v1066_v61 }
  0x5b   :  { %559 = vmatmul.mubr.bf16.gmra.mxu0 %v1068_v62 }
  0x5c   :  { %656 = vmatmul.mubr.bf16.gmra.mxu1 %v1069_v63 }
  0xe3   :  { %v878_v0 = vpop.f32.mrf.mxu0 }
  0xe4   :  { %v942_v1 = vpop.f32.mrf.mxu1 }
  0xe5   :  { %v879_v3 = vpop.f32.mrf.mxu0 }
  0xe6   :  { %v880_v4 = vadd.f32 %v879_v3, %v878_v0  ;;  %v943_v5 = vpop.f32.mrf.mxu1 }
  0xe7   :  { %v881_v6 = vpop.f32.mrf.mxu0  ;;  %v944_v8 = vadd.f32 %v943_v5, %v942_v1 }
  0xe8   :  { %v505_v7 = vadd.f32 %v880_v4, %v1285_v2  ;;  %v945_v9 = vpop.f32.mrf.mxu1 }
  0xe9   :  { %v882_v10 = vpop.f32.mrf.mxu0 }
  0xea   :  { %v602_v11 = vadd.f32 %v944_v8, %v505_v7  ;;  %v883_v12 = vadd.f32 %v882_v10, %v881_v6  ;;  %v946_v13 = vpop.f32.mrf.mxu1 }
  0xeb   :  { %v884_v14 = vpop.f32.mrf.mxu0  ;;  %v947_v17 = vadd.f32 %v946_v13, %v945_v9 }
  0xec   :  { %v664_v15 = vmax.f32 %v602_v11, 0.0  ;;  %v508_v16 = vadd.f32 %v883_v12, %v1285_v2  ;;  %v948_v18 = vpop.f32.mrf.mxu1 }
  0xed   :  { %v885_v19 = vpop.f32.mrf.mxu0 }
  0xee   :  { %v846_v20 = vpack.c.bf16 %v664_v15, %v664_v15  ;;  %v605_v21 = vadd.f32 %v947_v17, %v508_v16  ;;  %v886_v22 = vadd.f32 %v885_v19, %v884_v14  ;;  %v949_v23 = vpop.f32.mrf.mxu1 }
  0xef   :  { %v887_v24 = vpop.f32.mrf.mxu0  ;;  %v950_v27 = vadd.f32 %v949_v23, %v948_v18 }
  0xf0   :  { %745 = vst.msk [vmem:[%s1370_s3] sm:$0xf] %vm744_vm0, %v846_v20  ;;  %v665_v25 = vmax.f32 %v605_v21, 0.0  ;;  %v513_v26 = vadd.f32 %v886_v22, %v1285_v2  ;;  %v951_v28 = vpop.f32.mrf.mxu1 }
  0xf1   :  { %v888_v29 = vpop.f32.mrf.mxu0 }
  0xf2   :  { %v847_v30 = vpack.c.bf16 %v665_v25, %v665_v25  ;;  %v610_v31 = vadd.f32 %v950_v27, %v513_v26  ;;  %v889_v32 = vadd.f32 %v888_v29, %v887_v24  ;;  %v952_v33 = vpop.f32.mrf.mxu1 }
  0xf3   :  { %v890_v34 = vpop.f32.mrf.mxu0  ;;  %v953_v37 = vadd.f32 %v952_v33, %v951_v28 }
  0xf4   :  { %746 = vst.msk [vmem:[%s1370_s3 + $0x4] sm:$0xf] %vm744_vm0, %v847_v30  ;;  %v666_v35 = vmax.f32 %v610_v31, 0.0  ;;  %v516_v36 = vadd.f32 %v889_v32, %v1285_v2  ;;  %v954_v38 = vpop.f32.mrf.mxu1 }
  0xf5   :  { %v891_v39 = vpop.f32.mrf.mxu0 }
  0xf6   :  { %v848_v40 = vpack.c.bf16 %v666_v35, %v666_v35  ;;  %v613_v41 = vadd.f32 %v953_v37, %v516_v36  ;;  %v892_v42 = vadd.f32 %v891_v39, %v890_v34  ;;  %v955_v43 = vpop.f32.mrf.mxu1 }
  0xf7   :  { %v893_v44 = vpop.f32.mrf.mxu0  ;;  %v956_v47 = vadd.f32 %v955_v43, %v954_v38 }
  0xf8   :  { %747 = vst.msk [vmem:[%s1370_s3 + $0x8] sm:$0xf] %vm744_vm0, %v848_v40  ;;  %v667_v45 = vmax.f32 %v613_v41, 0.0  ;;  %v521_v46 = vadd.f32 %v892_v42, %v1285_v2  ;;  %v957_v48 = vpop.f32.mrf.mxu1 }
  0xf9   :  { %v894_v49 = vpop.f32.mrf.mxu0 }
  0xfa   :  { %v849_v50 = vpack.c.bf16 %v667_v45, %v667_v45  ;;  %v618_v51 = vadd.f32 %v956_v47, %v521_v46  ;;  %v895_v52 = vadd.f32 %v894_v49, %v893_v44  ;;  %v958_v53 = vpop.f32.mrf.mxu1 }
  0xfb   :  { %v896_v54 = vpop.f32.mrf.mxu0  ;;  %v959_v57 = vadd.f32 %v958_v53, %v957_v48 }
  0xfc   :  { %748 = vst.msk [vmem:[%s1370_s3 + $0xc] sm:$0xf] %vm744_vm0, %v849_v50  ;;  %v668_v55 = vmax.f32 %v618_v51, 0.0  ;;  %v524_v56 = vadd.f32 %v895_v52, %v1285_v2  ;;  %v960_v58 = vpop.f32.mrf.mxu1 }
  0xfd   :  { %v897_v59 = vpop.f32.mrf.mxu0 }
  0xfe   :  { %v850_v60 = vpack.c.bf16 %v668_v55, %v668_v55  ;;  %v621_v61 = vadd.f32 %v959_v57, %v524_v56  ;;  %v898_v62 = vadd.f32 %v897_v59, %v896_v54  ;;  %v961_v63 = vpop.f32.mrf.mxu1 }
  0xff   :  { %v899_v0 = vpop.f32.mrf.mxu0  ;;  %v962_v4 = vadd.f32 %v961_v63, %v960_v58 }
 0x100   :  { %749 = vst.msk [vmem:[%s1370_s3 + $0x10] sm:$0xf] %vm744_vm0, %v850_v60  ;;  %v669_v1 = vmax.f32 %v621_v61, 0.0  ;;  %v529_v3 = vadd.f32 %v898_v62, %v1285_v2  ;;  %v963_v5 = vpop.f32.mrf.mxu1 }
 0x101   :  { %v900_v6 = vpop.f32.mrf.mxu0 }
 0x102   :  { %v851_v7 = vpack.c.bf16 %v669_v1, %v669_v1  ;;  %v626_v8 = vadd.f32 %v962_v4, %v529_v3  ;;  %v901_v9 = vadd.f32 %v900_v6, %v899_v0  ;;  %v964_v10 = vpop.f32.mrf.mxu1 }
 0x103   :  { %v902_v11 = vpop.f32.mrf.mxu0  ;;  %v965_v14 = vadd.f32 %v964_v10, %v963_v5 }
 0x104   :  { %750 = vst.msk [vmem:[%s1370_s3 + $0x14] sm:$0xf] %vm744_vm0, %v851_v7  ;;  %v670_v12 = vmax.f32 %v626_v8, 0.0  ;;  %v532_v13 = vadd.f32 %v901_v9, %v1285_v2  ;;  %v966_v15 = vpop.f32.mrf.mxu1 }
 0x105   :  { %v903_v16 = vpop.f32.mrf.mxu0 }
 0x106   :  { %v852_v17 = vpack.c.bf16 %v670_v12, %v670_v12  ;;  %v629_v18 = vadd.f32 %v965_v14, %v532_v13  ;;  %v904_v19 = vadd.f32 %v903_v16, %v902_v11  ;;  %v967_v20 = vpop.f32.mrf.mxu1 }
 0x107   :  { %v905_v21 = vpop.f32.mrf.mxu0  ;;  %v968_v24 = vadd.f32 %v967_v20, %v966_v15 }
 0x108   :  { %751 = vst.msk [vmem:[%s1370_s3 + $0x18] sm:$0xf] %vm744_vm0, %v852_v17  ;;  %v671_v22 = vmax.f32 %v629_v18, 0.0  ;;  %v537_v23 = vadd.f32 %v904_v19, %v1285_v2  ;;  %v969_v25 = vpop.f32.mrf.mxu1 }
 0x109   :  { %v906_v26 = vpop.f32.mrf.mxu0 }
 0x10a   :  { %v853_v27 = vpack.c.bf16 %v671_v22, %v671_v22  ;;  %v634_v28 = vadd.f32 %v968_v24, %v537_v23  ;;  %v907_v29 = vadd.f32 %v906_v26, %v905_v21  ;;  %v970_v30 = vpop.f32.mrf.mxu1 }
 0x10b   :  { %v908_v31 = vpop.f32.mrf.mxu0  ;;  %v971_v34 = vadd.f32 %v970_v30, %v969_v25 }
 0x10c   :  { %752 = vst.msk [vmem:[%s1370_s3 + $0x1c] sm:$0xf] %vm744_vm0, %v853_v27  ;;  %v672_v32 = vmax.f32 %v634_v28, 0.0  ;;  %v540_v33 = vadd.f32 %v907_v29, %v1285_v2  ;;  %v972_v35 = vpop.f32.mrf.mxu1 }
 0x10d   :  { %v909_v36 = vpop.f32.mrf.mxu0 }
 0x10e   :  { %v854_v37 = vpack.c.bf16 %v672_v32, %v672_v32  ;;  %v637_v38 = vadd.f32 %v971_v34, %v540_v33  ;;  %v910_v39 = vadd.f32 %v909_v36, %v908_v31  ;;  %v973_v40 = vpop.f32.mrf.mxu1 }
 0x10f   :  { %v911_v41 = vpop.f32.mrf.mxu0  ;;  %v974_v44 = vadd.f32 %v973_v40, %v972_v35 }
 0x110   :  { %753 = vst.msk [vmem:[%s1370_s3 + $0x20] sm:$0xf] %vm744_vm0, %v854_v37  ;;  %v673_v42 = vmax.f32 %v637_v38, 0.0  ;;  %v545_v43 = vadd.f32 %v910_v39, %v1285_v2  ;;  %v975_v45 = vpop.f32.mrf.mxu1 }
 0x111   :  { %v912_v46 = vpop.f32.mrf.mxu0 }
 0x112   :  { %v855_v47 = vpack.c.bf16 %v673_v42, %v673_v42  ;;  %v642_v48 = vadd.f32 %v974_v44, %v545_v43  ;;  %v913_v49 = vadd.f32 %v912_v46, %v911_v41  ;;  %v976_v50 = vpop.f32.mrf.mxu1 }
 0x113   :  { %v914_v51 = vpop.f32.mrf.mxu0  ;;  %v977_v54 = vadd.f32 %v976_v50, %v975_v45 }
 0x114   :  { %754 = vst.msk [vmem:[%s1370_s3 + $0x24] sm:$0xf] %vm744_vm0, %v855_v47  ;;  %v674_v52 = vmax.f32 %v642_v48, 0.0  ;;  %v548_v53 = vadd.f32 %v913_v49, %v1285_v2  ;;  %v978_v55 = vpop.f32.mrf.mxu1 }
 0x115   :  { %v915_v56 = vpop.f32.mrf.mxu0 }
 0x116   :  { %v856_v57 = vpack.c.bf16 %v674_v52, %v674_v52  ;;  %v645_v58 = vadd.f32 %v977_v54, %v548_v53  ;;  %v916_v59 = vadd.f32 %v915_v56, %v914_v51  ;;  %v979_v60 = vpop.f32.mrf.mxu1 }
 0x117   :  { %v917_v61 = vpop.f32.mrf.mxu0  ;;  %v980_v0 = vadd.f32 %v979_v60, %v978_v55 }
 0x118   :  { %755 = vst.msk [vmem:[%s1370_s3 + $0x28] sm:$0xf] %vm744_vm0, %v856_v57  ;;  %v675_v62 = vmax.f32 %v645_v58, 0.0  ;;  %v553_v63 = vadd.f32 %v916_v59, %v1285_v2  ;;  %v981_v1 = vpop.f32.mrf.mxu1 }
 0x119   :  { %v918_v3 = vpop.f32.mrf.mxu0 }
 0x11a   :  { %v857_v4 = vpack.c.bf16 %v675_v62, %v675_v62  ;;  %v650_v5 = vadd.f32 %v980_v0, %v553_v63  ;;  %v919_v6 = vadd.f32 %v918_v3, %v917_v61  ;;  %v982_v7 = vpop.f32.mrf.mxu1 }
 0x11b   :  { %v920_v8 = vpop.f32.mrf.mxu0  ;;  %v983_v11 = vadd.f32 %v982_v7, %v981_v1 }
 0x11c   :  { %756 = vst.msk [vmem:[%s1370_s3 + $0x2c] sm:$0xf] %vm744_vm0, %v857_v4  ;;  %v676_v9 = vmax.f32 %v650_v5, 0.0  ;;  %v556_v10 = vadd.f32 %v919_v6, %v1285_v2  ;;  %v984_v12 = vpop.f32.mrf.mxu1 }
 0x11d   :  { %v921_v13 = vpop.f32.mrf.mxu0 }
 0x11e   :  { %v858_v14 = vpack.c.bf16 %v676_v9, %v676_v9  ;;  %v653_v15 = vadd.f32 %v983_v11, %v556_v10  ;;  %v922_v16 = vadd.f32 %v921_v13, %v920_v8  ;;  %v985_v17 = vpop.f32.mrf.mxu1 }
 0x11f   :  { %v923_v18 = vpop.f32.mrf.mxu0  ;;  %v986_v21 = vadd.f32 %v985_v17, %v984_v12 }
 0x120   :  { %757 = vst.msk [vmem:[%s1370_s3 + $0x30] sm:$0xf] %vm744_vm0, %v858_v14  ;;  %v677_v19 = vmax.f32 %v653_v15, 0.0  ;;  %v561_v20 = vadd.f32 %v922_v16, %v1285_v2  ;;  %v987_v22 = vpop.f32.mrf.mxu1 }
 0x121   :  { %v924_v23 = vpop.f32.mrf.mxu0 }
 0x122   :  { %v859_v24 = vpack.c.bf16 %v677_v19, %v677_v19  ;;  %v658_v25 = vadd.f32 %v986_v21, %v561_v20  ;;  %v925_v26 = vadd.f32 %v924_v23, %v923_v18  ;;  %v988_v27 = vpop.f32.mrf.mxu1 }
 0x123   :  { %v989_v30 = vadd.f32 %v988_v27, %v987_v22 }
 0x124   :  { %758 = vst.msk [vmem:[%s1370_s3 + $0x34] sm:$0xf] %vm744_vm0, %v859_v24  ;;  %v678_v28 = vmax.f32 %v658_v25, 0.0  ;;  %v564_v29 = vadd.f32 %v925_v26, %v1285_v2 }
 0x126   :  { %v860_v31 = vpack.c.bf16 %v678_v28, %v678_v28  ;;  %v661_v32 = vadd.f32 %v989_v30, %v564_v29 }
 0x128   :  { %759 = vst.msk [vmem:[%s1370_s3 + $0x38] sm:$0xf] %vm744_vm0, %v860_v31  ;;  %v679_v33 = vmax.f32 %v661_v32, 0.0 }
 0x12a   :  { %v861_v34 = vpack.c.bf16 %v679_v33, %v679_v33 }
 0x12c   :  { %760 = vst.msk [vmem:[%s1370_s3 + $0x3c] sm:$0xf] %vm744_vm0, %v861_v34 }

// kernel: ssidvae_forward.15
= control target key start
LH: loop header
LB: loop body
LE: loop exit
PB: predicated region body
PF: predicated region fallthrough
CT: control target
= control target key end

     0   :  { %vm830_vm0 = vcmask 523264   ;;  %s1375_s1 = inlined_call_operand.vmem [shape: bf16[1024,64], index: 1, kind: input, shape index: {}]   ;;  %s1376_s0 = inlined_call_operand.vmem [shape: bf16[32,1024], index: 0, kind: input, shape index: {}]   ;;  %s1377_s2 = inlined_call_operand.vmem [shape: f32[1,64], index: 2, kind: input, shape index: {}]   ;;  %s1378_s3 = inlined_call_operand.vmem [shape: f32[32,64], index: 3, kind: output, shape index: {}]  }
   0x1   :  { %v1032_v0 = vld [vmem:[%s1375_s1 + $0x78] sm:$0xff]   ;;  %v1036_v4 = vld [vmem:[%s1375_s1 + $0x70] sm:$0xff]   ;;  %v1040_v8 = vld [vmem:[%s1375_s1 + $0x68] sm:$0xff]  }
   0x2   :  { %v1033_v1 = vld [vmem:[%s1375_s1 + $0xf8] sm:$0xff]   ;;  %920 = vmatprep.subr.bf16.mxu0 %v1032_v0  ;;  %v1037_v5 = vld [vmem:[%s1375_s1 + $0xf0] sm:$0xff]   ;;  %v1041_v9 = vld [vmem:[%s1375_s1 + $0xe8] sm:$0xff]  }
   0x3   :  { %v1034_v2 = vld [vmem:[%s1375_s1 + $0x38] sm:$0xff]   ;;  %948 = vmatprep.subr.bf16.mxu1 %v1033_v1  ;;  %v1038_v6 = vld [vmem:[%s1375_s1 + $0x30] sm:$0xff]   ;;  %v1042_v10 = vld [vmem:[%s1375_s1 + $0x28] sm:$0xff]  }
   0x4   :  { %v1035_v3 = vld [vmem:[%s1375_s1 + $0xb8] sm:$0xff]   ;;  %921 = vmatpush3.bf16.msra.mxu0 %v1034_v2  ;;  %v1039_v7 = vld [vmem:[%s1375_s1 + $0xb0] sm:$0xff]   ;;  %v1043_v11 = vld [vmem:[%s1375_s1 + $0xa8] sm:$0xff]  }
   0x5   :  { %949 = vmatpush3.bf16.msra.mxu1 %v1035_v3  ;;  %922 = vmatprep.subr.bf16.mxu0 %v1036_v4  ;;  %v1044_v12 = vld [vmem:[%s1375_s1 + $0x60] sm:$0xff]   ;;  %v1048_v16 = vld [vmem:[%s1375_s1 + $0x58] sm:$0xff]   ;;  %v1052_v20 = vld [vmem:[%s1375_s1 + $0x50] sm:$0xff]  }
   0x6   :  { %950 = vmatprep.subr.bf16.mxu1 %v1037_v5  ;;  %v1045_v13 = vld [vmem:[%s1375_s1 + $0xe0] sm:$0xff]   ;;  %v1049_v17 = vld [vmem:[%s1375_s1 + $0xd8] sm:$0xff]   ;;  %v1053_v21 = vld [vmem:[%s1375_s1 + $0xd0] sm:$0xff]  }
   0x7   :  { %v1046_v14 = vld [vmem:[%s1375_s1 + $0x20] sm:$0xff]   ;;  %v1050_v18 = vld [vmem:[%s1375_s1 + $0x18] sm:$0xff]   ;;  %v1054_v22 = vld [vmem:[%s1375_s1 + $0x10] sm:$0xff]  }
   0x8   :  { %923 = vmatpush3.bf16.msra.mxu0 %v1038_v6  ;;  %v1047_v15 = vld [vmem:[%s1375_s1 + $0xa0] sm:$0xff]   ;;  %v1051_v19 = vld [vmem:[%s1375_s1 + $0x98] sm:$0xff]   ;;  %v1055_v23 = vld [vmem:[%s1375_s1 + $0x90] sm:$0xff]  }
   0x9   :  { %951 = vmatpush3.bf16.msra.mxu1 %v1039_v7  ;;  %924 = vmatprep.subr.bf16.mxu0 %v1040_v8  ;;  %v1056_v24 = vld [vmem:[%s1375_s1 + $0x48] sm:$0xff]   ;;  %v1060_v28 = vld [vmem:[%s1375_s1 + $0x40] sm:$0xff]   ;;  %v1064_v40 = vld [vmem:[%s1375_s1 + $0x178] sm:$0xff]  }
   0xa   :  { %952 = vmatprep.subr.bf16.mxu1 %v1041_v9  ;;  %v1057_v25 = vld [vmem:[%s1375_s1 + $0xc8] sm:$0xff]   ;;  %v1061_v29 = vld [vmem:[%s1375_s1 + $0xc0] sm:$0xff]   ;;  %v1065_v41 = vld [vmem:[%s1375_s1 + $0x1f8] sm:$0xff]  }
   0xb   :  { %v1058_v26 = vld [vmem:[%s1375_s1 + $0x8] sm:$0xff]   ;;  %v1062_v30 = vld [vmem:[%s1375_s1] sm:$0xff]   ;;  %v1066_v42 = vld [vmem:[%s1375_s1 + $0x138] sm:$0xff]  }
   0xc   :  { %925 = vmatpush3.bf16.msra.mxu0 %v1042_v10  ;;  %v1059_v27 = vld [vmem:[%s1375_s1 + $0x88] sm:$0xff]   ;;  %v1063_v31 = vld [vmem:[%s1375_s1 + $0x80] sm:$0xff]   ;;  %v1067_v43 = vld [vmem:[%s1375_s1 + $0x1b8] sm:$0xff]  }
   0xd   :  { %953 = vmatpush3.bf16.msra.mxu1 %v1043_v11  ;;  %926 = vmatprep.subr.bf16.mxu0 %v1044_v12  ;;  %v15_v32 = vld [vmem:[%s1376_s0] sm:$0xff]  ;;  %v16_v34 = vld [vmem:[%s1376_s0 + $0x8] sm:$0xff]  ;;  %v1068_v44 = vld [vmem:[%s1375_s1 + $0x170] sm:$0xff]  }
   0xe   :  { %954 = vmatprep.subr.bf16.mxu1 %v1045_v13  ;;  %v19_v33 = vld [vmem:[%s1376_s0 + $0x20] sm:$0xff]  ;;  %v20_v37 = vld [vmem:[%s1376_s0 + $0x28] sm:$0xff]  ;;  %v1069_v45 = vld [vmem:[%s1375_s1 + $0x1f0] sm:$0xff]  }
   0xf   :  { %v840_v35 = vcombine.low %v15_v32, %v19_v33  ;;  %v841_v36 = vcombine.high %v15_v32, %v19_v33  ;;  %v842_v38 = vcombine.low %v16_v34, %v20_v37  ;;  %v843_v39 = vcombine.high %v16_v34, %v20_v37  ;;  %v1070_v46 = vld [vmem:[%s1375_s1 + $0x130] sm:$0xff]   ;;  %v1072_v48 = vld [vmem:[%s1375_s1 + $0x168] sm:$0xff]   ;;  %v1076_v52 = vld [vmem:[%s1375_s1 + $0x160] sm:$0xff]  }
  0x10   :  { %927 = vmatpush3.bf16.msra.mxu0 %v1046_v14  ;;  %v1071_v47 = vld [vmem:[%s1375_s1 + $0x1b0] sm:$0xff]   ;;  %v1073_v49 = vld [vmem:[%s1375_s1 + $0x1e8] sm:$0xff]   ;;  %v1077_v53 = vld [vmem:[%s1375_s1 + $0x1e0] sm:$0xff]  }
  0x11   :  { %955 = vmatpush3.bf16.msra.mxu1 %v1047_v15  ;;  %928 = vmatprep.subr.bf16.mxu0 %v1048_v16  ;;  %v1074_v50 = vld [vmem:[%s1375_s1 + $0x128] sm:$0xff]   ;;  %v1078_v54 = vld [vmem:[%s1375_s1 + $0x120] sm:$0xff]   ;;  %v1080_v56 = vld [vmem:[%s1375_s1 + $0x158] sm:$0xff]  }
  0x12   :  { %956 = vmatprep.subr.bf16.mxu1 %v1049_v17  ;;  %662 = vmatprep.mubr.bf16.mxu0 %v841_v36  ;;  %v1075_v51 = vld [vmem:[%s1375_s1 + $0x1a8] sm:$0xff]   ;;  %v1079_v55 = vld [vmem:[%s1375_s1 + $0x1a0] sm:$0xff]   ;;  %v1081_v57 = vld [vmem:[%s1375_s1 + $0x1d8] sm:$0xff]  }
  0x13   :  { %711 = vmatprep.mubr.bf16.mxu1 %v843_v39  ;;  %v23_v58 = vld [vmem:[%s1376_s0 + $0x40] sm:$0xff]  ;;  %v1082_v61 = vld [vmem:[%s1375_s1 + $0x118] sm:$0xff]   ;;  %v24_v0 = vld [vmem:[%s1376_s0 + $0x48] sm:$0xff] }
  0x14   :  { %929 = vmatpush3.bf16.msra.mxu0 %v1050_v18  ;;  %v27_v59 = vld [vmem:[%s1376_s0 + $0x60] sm:$0xff]  ;;  %v1083_v63 = vld [vmem:[%s1375_s1 + $0x198] sm:$0xff]   ;;  %v28_v1 = vld [vmem:[%s1376_s0 + $0x68] sm:$0xff] }
  0x15   :  { %957 = vmatpush3.bf16.msra.mxu1 %v1051_v19  ;;  %930 = vmatprep.subr.bf16.mxu0 %v1052_v20  ;;  %v849_v60 = vcombine.high %v23_v58, %v27_v59  ;;  %v848_v62 = vcombine.low %v23_v58, %v27_v59  ;;  %v851_v2 = vcombine.high %v24_v0, %v28_v1  ;;  %v1084_v4 = vld [vmem:[%s1375_s1 + $0x150] sm:$0xff]   ;;  %v1088_v8 = vld [vmem:[%s1375_s1 + $0x148] sm:$0xff]   ;;  %v1092_v12 = vld [vmem:[%s1375_s1 + $0x140] sm:$0xff]  }
  0x16   :  { %958 = vmatprep.subr.bf16.mxu1 %v1053_v21  ;;  %v850_v3 = vcombine.low %v24_v0, %v28_v1  ;;  %v1085_v5 = vld [vmem:[%s1375_s1 + $0x1d0] sm:$0xff]   ;;  %v1089_v9 = vld [vmem:[%s1375_s1 + $0x1c8] sm:$0xff]   ;;  %v1093_v13 = vld [vmem:[%s1375_s1 + $0x1c0] sm:$0xff]  }
  0x17   :  { %v1086_v6 = vld [vmem:[%s1375_s1 + $0x110] sm:$0xff]   ;;  %v1090_v10 = vld [vmem:[%s1375_s1 + $0x108] sm:$0xff]   ;;  %v1094_v14 = vld [vmem:[%s1375_s1 + $0x100] sm:$0xff]  }
  0x18   :  { %931 = vmatpush3.bf16.msra.mxu0 %v1054_v22  ;;  %v1087_v7 = vld [vmem:[%s1375_s1 + $0x190] sm:$0xff]   ;;  %v1091_v11 = vld [vmem:[%s1375_s1 + $0x188] sm:$0xff]   ;;  %v1095_v15 = vld [vmem:[%s1375_s1 + $0x180] sm:$0xff]  }
  0x19   :  { %959 = vmatpush3.bf16.msra.mxu1 %v1055_v23  ;;  %932 = vmatprep.subr.bf16.mxu0 %v1056_v24  ;;  %v17_v16 = vld [vmem:[%s1376_s0 + $0x10] sm:$0xff]  ;;  %v18_v18 = vld [vmem:[%s1376_s0 + $0x18] sm:$0xff] }
  0x1a   :  { %960 = vmatprep.subr.bf16.mxu1 %v1057_v25  ;;  %v21_v17 = vld [vmem:[%s1376_s0 + $0x30] sm:$0xff]  ;;  %v22_v19 = vld [vmem:[%s1376_s0 + $0x38] sm:$0xff] }
  0x1b   :  { %v844_v20 = vcombine.low %v17_v16, %v21_v17  ;;  %v845_v21 = vcombine.high %v17_v16, %v21_v17  ;;  %v846_v22 = vcombine.low %v18_v18, %v22_v19  ;;  %v847_v23 = vcombine.high %v18_v18, %v22_v19  ;;  %v25_v24 = vld [vmem:[%s1376_s0 + $0x50] sm:$0xff] }
  0x1c   :  { %933 = vmatpush3.bf16.msra.mxu0 %v1058_v26  ;;  %v29_v25 = vld [vmem:[%s1376_s0 + $0x70] sm:$0xff]  ;;  %v26_v26 = vld [vmem:[%s1376_s0 + $0x58] sm:$0xff] }
  0x1d   :  { %961 = vmatpush3.bf16.msra.mxu1 %v1059_v27  ;;  %934 = vmatprep.subr.bf16.mxu0 %v1060_v28  ;;  %v853_v27 = vcombine.high %v25_v24, %v29_v25  ;;  %v30_v28 = vld [vmem:[%s1376_s0 + $0x78] sm:$0xff] }
  0x1e   :  { %962 = vmatprep.subr.bf16.mxu1 %v1061_v29  ;;  %v855_v29 = vcombine.high %v26_v26, %v30_v28 }
  0x20   :  { %935 = vmatpush3.bf16.msra.mxu0 %v1062_v30  ;;  %v852_v30 = vcombine.low %v25_v24, %v29_v25 }
  0x21   :  { %963 = vmatpush3.bf16.msra.mxu1 %v1063_v31  ;;  %976 = vmatprep.subr.bf16.mxu0 %v1064_v40  ;;  %v854_v31 = vcombine.low %v26_v26, %v30_v28 }
  0x22   :  { %1004 = vmatprep.subr.bf16.mxu1 %v1065_v41 }
  0x23   :  { %663 = vmatmul.mubr.bf16.vlgmr.msra.gmra.mxu0 %v840_v35 }
  0x24   :  { %712 = vmatmul.mubr.bf16.vlgmr.msra.gmra.mxu1 %v842_v38  ;;  %977 = vmatpush3.bf16.msra.mxu0 %v1066_v42 }
  0x25   :  { %1005 = vmatpush3.bf16.msra.mxu1 %v1067_v43  ;;  %978 = vmatprep.subr.bf16.mxu0 %v1068_v44 }
  0x26   :  { %1006 = vmatprep.subr.bf16.mxu1 %v1069_v45  ;;  %670 = vmatprep.mubr.bf16.mxu0 %v849_v60 }
  0x27   :  { %719 = vmatprep.mubr.bf16.mxu1 %v851_v2 }
  0x28   :  { %979 = vmatpush3.bf16.msra.mxu0 %v1070_v46 }
  0x29   :  { %1007 = vmatpush3.bf16.msra.mxu1 %v1071_v47  ;;  %980 = vmatprep.subr.bf16.mxu0 %v1072_v48  ;;  %v839_v47 = vld [vmem:[%s1377_s2] ss:$0 sm:$0xff] }
  0x2a   :  { %1008 = vmatprep.subr.bf16.mxu1 %v1073_v49 }
  0x2b   :  { %671 = vmatmul.mubr.bf16.gmra.mxu0 %v848_v62 }
  0x2c   :  { %981 = vmatpush3.bf16.msra.mxu0 %v1074_v50  ;;  %720 = vmatmul.mubr.bf16.gmra.mxu1 %v850_v3 }
  0x2d   :  { %1009 = vmatpush3.bf16.msra.mxu1 %v1075_v51  ;;  %982 = vmatprep.subr.bf16.mxu0 %v1076_v52 }
  0x2e   :  { %1010 = vmatprep.subr.bf16.mxu1 %v1077_v53  ;;  %760 = vmatprep.mubr.bf16.mxu0 %v845_v21 }
  0x2f   :  { %809 = vmatprep.mubr.bf16.mxu1 %v847_v23 }
  0x30   :  { %983 = vmatpush3.bf16.msra.mxu0 %v1078_v54 }
  0x31   :  { %1011 = vmatpush3.bf16.msra.mxu1 %v1079_v55  ;;  %984 = vmatprep.subr.bf16.mxu0 %v1080_v56 }
  0x32   :  { %1012 = vmatprep.subr.bf16.mxu1 %v1081_v57 }
  0x34   :  { %985 = vmatpush3.bf16.msra.mxu0 %v1082_v61 }
  0x35   :  { %1013 = vmatpush3.bf16.msra.mxu1 %v1083_v63  ;;  %986 = vmatprep.subr.bf16.mxu0 %v1084_v4 }
  0x36   :  { %1014 = vmatprep.subr.bf16.mxu1 %v1085_v5 }
  0x38   :  { %987 = vmatpush3.bf16.msra.mxu0 %v1086_v6 }
  0x39   :  { %1015 = vmatpush3.bf16.msra.mxu1 %v1087_v7  ;;  %988 = vmatprep.subr.bf16.mxu0 %v1088_v8 }
  0x3a   :  { %1016 = vmatprep.subr.bf16.mxu1 %v1089_v9 }
  0x3c   :  { %989 = vmatpush3.bf16.msra.mxu0 %v1090_v10 }
  0x3d   :  { %1017 = vmatpush3.bf16.msra.mxu1 %v1091_v11  ;;  %990 = vmatprep.subr.bf16.mxu0 %v1092_v12 }
  0x3e   :  { %1018 = vmatprep.subr.bf16.mxu1 %v1093_v13 }
  0x40   :  { %991 = vmatpush3.bf16.msra.mxu0 %v1094_v14 }
  0x41   :  { %1019 = vmatpush3.bf16.msra.mxu1 %v1095_v15 }
  0x43   :  { %761 = vmatmul.mubr.bf16.vlgmr.msra.gmra.mxu0 %v844_v20 }
  0x44   :  { %810 = vmatmul.mubr.bf16.vlgmr.msra.gmra.mxu1 %v846_v22  ;;  %768 = vmatprep.mubr.bf16.mxu0 %v853_v27 }
  0x45   :  { %817 = vmatprep.mubr.bf16.mxu1 %v855_v29 }
  0x4b   :  { %769 = vmatmul.mubr.bf16.gmra.mxu0 %v852_v30 }
  0x4c   :  { %818 = vmatmul.mubr.bf16.gmra.mxu1 %v854_v31 }
  0xe3   :  { %v936_v32 = vpop.f32.mrf.mxu0 }
  0xe4   :  { %v964_v33 = vpop.f32.mrf.mxu1 }
  0xe5   :  { %v937_v34 = vpop.f32.mrf.mxu0 }
  0xe6   :  { %v965_v35 = vpop.f32.mrf.mxu1  ;;  %v938_v46 = vadd.f32 %v937_v34, %v936_v32 }
  0xe7   :  { %v939_v36 = vpop.f32.mrf.mxu0  ;;  %v966_v51 = vadd.f32 %v965_v35, %v964_v33 }
  0xe8   :  { %v967_v37 = vpop.f32.mrf.mxu1  ;;  %v665_v50 = vadd.f32 %v938_v46, %v839_v47 }
  0xe9   :  { %v940_v38 = vpop.f32.mrf.mxu0 }
  0xea   :  { %v968_v39 = vpop.f32.mrf.mxu1  ;;  %v941_v52 = vadd.f32 %v940_v38, %v939_v36  ;;  %v714_v58 = vadd.f32 %v966_v51, %v665_v50 }
  0xeb   :  { %v942_v40 = vpop.f32.mrf.mxu0  ;;  %v969_v63 = vadd.f32 %v968_v39, %v967_v37 }
  0xec   :  { %v970_v41 = vpop.f32.mrf.mxu1  ;;  %v668_v59 = vadd.f32 %v941_v52, %v839_v47 }
  0xed   :  { %v943_v42 = vpop.f32.mrf.mxu0 }
  0xee   :  { %v971_v43 = vpop.f32.mrf.mxu1  ;;  %v944_v55 = vadd.f32 %v943_v42, %v942_v40  ;;  %v717_v6 = vadd.f32 %v969_v63, %v668_v59 }
  0xef   :  { %v945_v44 = vpop.f32.mrf.mxu0  ;;  %v972_v3 = vadd.f32 %v971_v43, %v970_v41 }
  0xf0   :  { %v973_v45 = vpop.f32.mrf.mxu1  ;;  %v673_v2 = vadd.f32 %v944_v55, %v839_v47 }
  0xf1   :  { %v946_v48 = vpop.f32.mrf.mxu0 }
  0xf2   :  { %v974_v49 = vpop.f32.mrf.mxu1  ;;  %v947_v7 = vadd.f32 %v946_v48, %v945_v44  ;;  %v722_v15 = vadd.f32 %v972_v3, %v673_v2 }
  0xf3   :  { %v975_v19 = vadd.f32 %v974_v49, %v973_v45 }
  0xf4   :  { %v676_v18 = vadd.f32 %v947_v7, %v839_v47 }
  0xf6   :  { %v725_v29 = vadd.f32 %v975_v19, %v676_v18 }
 0x103   :  { %v992_v53 = vpop.f32.mrf.mxu0 }
 0x104   :  { %v1020_v54 = vpop.f32.mrf.mxu1 }
 0x105   :  { %v993_v56 = vpop.f32.mrf.mxu0 }
 0x106   :  { %v1021_v57 = vpop.f32.mrf.mxu1  ;;  %v994_v60 = vadd.f32 %v993_v56, %v992_v53 }
 0x107   :  { %v995_v61 = vpop.f32.mrf.mxu0  ;;  %v1022_v1 = vadd.f32 %v1021_v57, %v1020_v54 }
 0x108   :  { %v1023_v62 = vpop.f32.mrf.mxu1  ;;  %v763_v0 = vadd.f32 %v994_v60, %v714_v58 }
 0x109   :  { %v996_v4 = vpop.f32.mrf.mxu0 }
 0x10a   :  { %v1024_v5 = vpop.f32.mrf.mxu1  ;;  %v812_v8 = vadd.f32 %v1022_v1, %v763_v0  ;;  %v997_v9 = vadd.f32 %v996_v4, %v995_v61 }
 0x10b   :  { %v998_v10 = vpop.f32.mrf.mxu0  ;;  %v1025_v14 = vadd.f32 %v1024_v5, %v1023_v62 }
 0x10c   :  { %v1026_v11 = vpop.f32.mrf.mxu1  ;;  %v826_v12 = vmax.f32 %v812_v8, 0.0  ;;  %v766_v13 = vadd.f32 %v997_v9, %v717_v6 }
 0x10d   :  { %v999_v16 = vpop.f32.mrf.mxu0 }
 0x10e   :  { %v1027_v17 = vpop.f32.mrf.mxu1  ;;  %831 = vst.msk [vmem:[%s1378_s3] sm:$0xff] %vm830_vm0, %v826_v12  ;;  %v815_v20 = vadd.f32 %v1025_v14, %v766_v13  ;;  %v1000_v21 = vadd.f32 %v999_v16, %v998_v10 }
 0x10f   :  { %v1001_v22 = vpop.f32.mrf.mxu0  ;;  %v1028_v26 = vadd.f32 %v1027_v17, %v1026_v11 }
 0x110   :  { %v1029_v23 = vpop.f32.mrf.mxu1  ;;  %v827_v24 = vmax.f32 %v815_v20, 0.0  ;;  %v771_v25 = vadd.f32 %v1000_v21, %v722_v15 }
 0x111   :  { %v1002_v27 = vpop.f32.mrf.mxu0 }
 0x112   :  { %v1030_v28 = vpop.f32.mrf.mxu1  ;;  %832 = vst.msk [vmem:[%s1378_s3 + $0x8] sm:$0xff] %vm830_vm0, %v827_v24  ;;  %v820_v30 = vadd.f32 %v1028_v26, %v771_v25  ;;  %v1003_v31 = vadd.f32 %v1002_v27, %v1001_v22 }
 0x113   :  { %v1031_v34 = vadd.f32 %v1030_v28, %v1029_v23 }
 0x114   :  { %v828_v32 = vmax.f32 %v820_v30, 0.0  ;;  %v774_v33 = vadd.f32 %v1003_v31, %v725_v29 }
 0x116   :  { %833 = vst.msk [vmem:[%s1378_s3 + $0x10] sm:$0xff] %vm830_vm0, %v828_v32  ;;  %v823_v35 = vadd.f32 %v1031_v34, %v774_v33 }
 0x118   :  { %v829_v36 = vmax.f32 %v823_v35, 0.0 }
 0x11a   :  { %834 = vst.msk [vmem:[%s1378_s3 + $0x18] sm:$0xff] %vm830_vm0, %v829_v36 }

// kernel: ssidvae_forward.17
= control target key start
LH: loop header
LB: loop body
LE: loop exit
PB: predicated region body
PF: predicated region fallthrough
CT: control target
= control target key end

     0   :  { %14 = vsyncpa [#allocation3], 0  ;;  %v323_v1 = vmov 0.0   ;;  %vm324_vm0 = vmmov 0   ;;  %s422_s0 = inlined_call_operand.vmem [shape: f32[2,32], index: 0, kind: input, shape index: {}]   ;;  %s423_s1 = inlined_call_operand.vmem [shape: f32[32,10], index: 1, kind: input, shape index: {}]   ;;  %s424_s2 = inlined_call_operand.vmem [shape: f32[1,10], index: 2, kind: input, shape index: {}]   ;;  %s425_s3 = inlined_call_operand.vmem [shape: f32[32,10], index: 3, kind: input, shape index: {}]   ;;  %s426_s4 = inlined_call_operand.vmem [shape: f32[1,10], index: 4, kind: input, shape index: {}]   ;;  %s427_s5 = inlined_call_operand.vmem [shape: f32[2,10], index: 5, kind: input, shape index: {}]   ;;  %s428_s6 = inlined_call_operand.hbm [shape: f32[2,10], index: 6, kind: output, shape index: {0}]   ;;  %s429_s7 = inlined_call_operand.hbm [shape: f32[2,10], index: 7, kind: output, shape index: {1}]   ;;  %s430_s8 = inlined_call_operand.vmem [shape: f32[2,10], index: 8, kind: output, shape index: {2}]  }
   0x1   :  { %v117_v0 = vld [vmem:[%s425_s3 + $0x18] sm:$0xff]  ;;  %262 = vmatprep.subr.mxu1 %v323_v1  ;;  %v116_v2 = vld [vmem:[%s425_s3 + $0x10] sm:$0xff]  ;;  %270 = vmatprep.mubr.msk.f32.mxu1 %vm324_vm0, %v323_v1  ;;  %v115_v5 = vld [vmem:[%s425_s3 + $0x8] sm:$0xff] }
   0x2   :  { %v32_v3 = vld [vmem:[%s423_s1 + $0x18] sm:$0xff]  ;;  %263 = vmatpush3.msra.mxu1 %v117_v0  ;;  %251 = vmatprep.subr.mxu0 %v323_v1  ;;  %v31_v4 = vld [vmem:[%s423_s1 + $0x10] sm:$0xff] }
   0x3   :  { %264 = vmatprep.subr.mxu1 %v323_v1  ;;  %252 = vmatpush3.msra.mxu0 %v32_v3 }
   0x4   :  { %15 = vsyncpa [#allocation5], 0  ;;  %265 = vmatpush3.msra.mxu1 %v116_v2  ;;  %253 = vmatprep.subr.mxu0 %v323_v1  ;;  %v30_v6 = vld [vmem:[%s423_s1 + $0x8] sm:$0xff]  ;;  %v114_v7 = vld [vmem:[%s425_s3] sm:$0xff]  ;;  %vm40_vm1 = vcmask 261120   ;;  %vm195_vm2 = vcmask 74752  }
   0x5   :  { %266 = vmatprep.subr.mxu1 %v323_v1  ;;  %254 = vmatpush3.msra.mxu0 %v31_v4  ;;  %v28_v8 = vld [vmem:[%s422_s0] sm:$0x3]  ;;  %s325_s0 = smov [#allocation4]  }
   0x6   :  { %267 = vmatpush3.msra.mxu1 %v115_v5  ;;  %255 = vmatprep.subr.mxu0 %v323_v1  ;;  %v29_v9 = vld [vmem:[%s423_s1] sm:$0xff]  ;;  %s221_s24 = sshll.u32 %s325_s0, 4  ;;  %s326_s1 = smov [#allocation2]   ;;  %s222_s24 = int_to_ptr.vmem [resolvable:$true] %s221_s24 }
   0x7   :  { %268 = vmatprep.subr.mxu1 %v323_v1  ;;  %256 = vmatpush3.msra.mxu0 %v30_v6  ;;  %v239_v10 = vld [vmem:[%s426_s4] ss:$0 sm:$0xff]  ;;  %s211_s27 = sshll.u32 %s326_s1, 4  ;;  %s279_s4 = scalar_lea.vmem %s222_s24, 32  ;;  %s212_s27 = int_to_ptr.vmem [resolvable:$true] %s211_s27 }
   0x8   :  { %269 = vmatpush3.msra.mxu1 %v114_v7  ;;  %257 = vmatprep.subr.mxu0 %v323_v1  ;;  %v237_v12 = vld [vmem:[%s424_s2] ss:$0 sm:$0xff]  ;;  %p280_p0 = scmp.ne.s32.totalorder %s222_s24, %s279_s4  ;;  %p284_p1 = scmp.lt.s32.totalorder %s222_s24, %s222_s24 }
   0x9   :  { %271 = vmatmul.mubr.msk.f32.vlgmr.msra.gmra.mxu1 %vm40_vm1, %v28_v8  ;;  %258 = vmatpush3.msra.mxu0 %v29_v9  ;;  %p285_p2 = scmp.lt.s32.totalorder %s279_s4, %s279_s4 }
   0xa   :  { %259 = vmatprep.mubr.msk.f32.mxu0 %vm324_vm0, %v323_v1 }
   0xb   :  { %260 = vmatmul.mubr.msk.f32.vlgmr.msra.gmra.mxu0 %vm40_vm1, %v28_v8  ;;  %p286_p3 = por %p285_p2, %p284_p1 }
   0xd   :  { %p287_p4 = pnand %p286_p3, %p280_p0 }
  0xc9   :  { %v191_v11 = vpop.f32.mrf.mxu1 }
  0xca   :  { %v192_v13 = vadd.f32 %v239_v10, %v191_v11 }
  0xcb   :  { %v272_v14 = vpop.f32.mrf.mxu1  ;;  %v110_v15 = vpop.f32.mrf.mxu0 }
  0xcc   :  { %v199_v16 = vmul.f32 0.5, %v192_v13  ;;  %v111_v17 = vadd.f32 %v237_v12, %v110_v15  ;;  %197 = vst.msk [vmem:[#allocation4] sm:$0x3] %vm195_vm2, %v192_v13 }
  0xcd   :  { %v261_v18 = vpop.f32.mrf.mxu0 }
  0xce   :  { %290 = shalt.err (!%p287_p4)
}
  0xcf   :  { %224 = dma.vmem_to_hbm [thread:$0]  %s222_s24, 32, %s429_s7, [#allocation5]   ;;  %v200_v19 = vmul.f32 1.442695, %v199_v16  ;;  %196 = vst.msk [vmem:[#allocation2] sm:$0x3] %vm195_vm2, %v111_v17 }
  0xd0   :  { %s299_s29 = scalar_lea.vmem %s212_s27, 32  ;;  %p304_p6 = scmp.lt.s32.totalorder %s212_s27, %s212_s27 }
  0xd1   :  { %p300_p5 = scmp.ne.s32.totalorder %s212_s27, %s299_s29  ;;  %p305_p7 = scmp.lt.s32.totalorder %s299_s29, %s299_s29 }
  0xd3   :  { %p306_p8 = por %p305_p7, %p304_p6 }
  0xd5   :  { %p307_p9 = pnand %p306_p8, %p300_p5 }
  0xd7   :  { %310 = shalt.err (!%p307_p9)
}
  0xd8   :  { %214 = dma.vmem_to_hbm [thread:$0]  %s212_s27, 32, %s428_s6, [#allocation3]   ;;  %277 = vpow2.f32 %v200_v19  ;;  %v198_v20 = vld [vmem:[%s427_s5] sm:$0x3] }
  0xe5   :  { %v278_v21 = vpop.eup %277 }
  0xe6   :  { %v202_v22 = vmul.f32 %v278_v21, %v198_v20 }
  0xe8   :  { %v203_v23 = vadd.f32 %v202_v22, %v111_v17 }
  0xea   :  { %204 = vst.msk [vmem:[%s430_s8] sm:$0x3] %vm195_vm2, %v203_v23 }
  0xeb   :  { %319 = dma.done.wait [#allocation3], 32  }
  0xec   :  { %320 = vsyncadd [#allocation3], 4294967264 }
  0xed   :  { %321 = dma.done.wait [#allocation5], 32  }
  0xee   :  { %322 = vsyncadd [#allocation5], 4294967264 }
  0xef   :  { %235 = vsyncpa [#allocation3], 1 }
  0xf0   :  { %236 = vsyncpa [#allocation5], 1 }

// kernel: ssidvae_forward.16
= control target key start
LH: loop header
LB: loop body
LE: loop exit
PB: predicated region body
PF: predicated region fallthrough
CT: control target
= control target key end

     0   :  { %v725_v30 = vmov 1983009808   ;;  %v160_v32 = vlaneseq  ;;  %vm208_vm0 = vcmask 1044480   ;;  %vm727_vm1 = vmmov 0   ;;  %s1156_s1 = inlined_call_operand.vmem [shape: f32[1029,32], index: 1, kind: input, shape index: {}]   ;;  %s1157_s0 = inlined_call_operand.vmem [shape: f32[2,1029], index: 0, kind: input, shape index: {}]   ;;  %s1158_s2 = inlined_call_operand.vmem [shape: f32[1,32], index: 2, kind: input, shape index: {}]   ;;  %s1159_s3 = inlined_call_operand.vmem [shape: f32[2,32], index: 3, kind: output, shape index: {}]  }
   0x1   :  { %v48_v0 = vld [vmem:[%s1156_s1 + $0xf8] sm:$0xff]  ;;  %v47_v4 = vld [vmem:[%s1156_s1 + $0xf0] sm:$0xff]  ;;  %v46_v8 = vld [vmem:[%s1156_s1 + $0xe8] sm:$0xff]  ;;  %v158_v31 = vunpack.c.l.s4 %v725_v30  ;;  %vm205_vm2 = vcmask 39936   ;;  %vm563_vm3 = vcmask 254976  }
   0x2   :  { %v80_v1 = vld [vmem:[%s1156_s1 + $0x1f8] sm:$0xff]  ;;  %573 = vmatprep.subr.mxu0 %v48_v0  ;;  %v79_v5 = vld [vmem:[%s1156_s1 + $0x1f0] sm:$0xff]  ;;  %v78_v9 = vld [vmem:[%s1156_s1 + $0x1e8] sm:$0xff]  ;;  %v161_v42 = vshrl.u32 %v160_v32, 7 }
   0x3   :  { %v32_v2 = vld [vmem:[%s1156_s1 + $0x78] sm:$0xff]  ;;  %608 = vmatprep.subr.mxu1 %v80_v1  ;;  %v31_v6 = vld [vmem:[%s1156_s1 + $0x70] sm:$0xff]  ;;  %v30_v10 = vld [vmem:[%s1156_s1 + $0x68] sm:$0xff]  ;;  %v159_v41 = vunpack.c.0.s8 %v158_v31 }
   0x4   :  { %v64_v3 = vld [vmem:[%s1156_s1 + $0x178] sm:$0xff]  ;;  %574 = vmatpush3.msra.mxu0 %v32_v2  ;;  %v63_v7 = vld [vmem:[%s1156_s1 + $0x170] sm:$0xff]  ;;  %v62_v11 = vld [vmem:[%s1156_s1 + $0x168] sm:$0xff] }
   0x5   :  { %609 = vmatpush3.msra.mxu1 %v64_v3  ;;  %575 = vmatprep.subr.mxu0 %v47_v4  ;;  %v45_v12 = vld [vmem:[%s1156_s1 + $0xe0] sm:$0xff]  ;;  %v44_v16 = vld [vmem:[%s1156_s1 + $0xd8] sm:$0xff]  ;;  %v43_v20 = vld [vmem:[%s1156_s1 + $0xd0] sm:$0xff]  ;;  %v886_v51 = vsub.s32 %v159_v41, %v161_v42 }
   0x6   :  { %610 = vmatprep.subr.mxu1 %v79_v5  ;;  %576 = vmatpush3.msra.mxu0 %v31_v6  ;;  %v77_v13 = vld [vmem:[%s1156_s1 + $0x1e0] sm:$0xff]  ;;  %v76_v17 = vld [vmem:[%s1156_s1 + $0x1d8] sm:$0xff]  ;;  %v75_v21 = vld [vmem:[%s1156_s1 + $0x1d0] sm:$0xff] }
   0x7   :  { %611 = vmatpush3.msra.mxu1 %v63_v7  ;;  %577 = vmatprep.subr.mxu0 %v46_v8  ;;  %v29_v14 = vld [vmem:[%s1156_s1 + $0x60] sm:$0xff]  ;;  %v28_v18 = vld [vmem:[%s1156_s1 + $0x58] sm:$0xff]  ;;  %v27_v22 = vld [vmem:[%s1156_s1 + $0x50] sm:$0xff] }
   0x8   :  { %612 = vmatprep.subr.mxu1 %v78_v9  ;;  %v61_v15 = vld [vmem:[%s1156_s1 + $0x160] sm:$0xff]  ;;  %578 = vmatpush3.msra.mxu0 %v30_v10  ;;  %v60_v19 = vld [vmem:[%s1156_s1 + $0x158] sm:$0xff]  ;;  %v59_v23 = vld [vmem:[%s1156_s1 + $0x150] sm:$0xff] }
   0x9   :  { %613 = vmatpush3.msra.mxu1 %v62_v11  ;;  %579 = vmatprep.subr.mxu0 %v45_v12  ;;  %v42_v24 = vld [vmem:[%s1156_s1 + $0xc8] sm:$0xff]  ;;  %v41_v28 = vld [vmem:[%s1156_s1 + $0xc0] sm:$0xff]  ;;  %v40_v35 = vld [vmem:[%s1156_s1 + $0xb8] sm:$0xff] }
   0xa   :  { %614 = vmatprep.subr.mxu1 %v77_v13  ;;  %580 = vmatpush3.msra.mxu0 %v29_v14  ;;  %v74_v25 = vld [vmem:[%s1156_s1 + $0x1c8] sm:$0xff]  ;;  %v73_v29 = vld [vmem:[%s1156_s1 + $0x1c0] sm:$0xff]  ;;  %v72_v36 = vld [vmem:[%s1156_s1 + $0x1b8] sm:$0xff] }
   0xb   :  { %615 = vmatpush3.msra.mxu1 %v61_v15  ;;  %581 = vmatprep.subr.mxu0 %v44_v16  ;;  %v26_v26 = vld [vmem:[%s1156_s1 + $0x48] sm:$0xff]  ;;  %v25_v33 = vld [vmem:[%s1156_s1 + $0x40] sm:$0xff]  ;;  %v24_v37 = vld [vmem:[%s1156_s1 + $0x38] sm:$0xff] }
   0xc   :  { %616 = vmatprep.subr.mxu1 %v76_v17  ;;  %582 = vmatpush3.msra.mxu0 %v28_v18  ;;  %v58_v27 = vld [vmem:[%s1156_s1 + $0x148] sm:$0xff]  ;;  %v57_v34 = vld [vmem:[%s1156_s1 + $0x140] sm:$0xff]  ;;  %v56_v38 = vld [vmem:[%s1156_s1 + $0x138] sm:$0xff] }
   0xd   :  { %617 = vmatpush3.msra.mxu1 %v60_v19  ;;  %583 = vmatprep.subr.mxu0 %v43_v20  ;;  %v39_v39 = vld [vmem:[%s1156_s1 + $0xb0] sm:$0xff]  ;;  %v38_v45 = vld [vmem:[%s1156_s1 + $0xa8] sm:$0xff]  ;;  %v37_v49 = vld [vmem:[%s1156_s1 + $0xa0] sm:$0xff] }
   0xe   :  { %618 = vmatprep.subr.mxu1 %v75_v21  ;;  %584 = vmatpush3.msra.mxu0 %v27_v22  ;;  %v71_v40 = vld [vmem:[%s1156_s1 + $0x1b0] sm:$0xff]  ;;  %v70_v46 = vld [vmem:[%s1156_s1 + $0x1a8] sm:$0xff]  ;;  %v69_v50 = vld [vmem:[%s1156_s1 + $0x1a0] sm:$0xff] }
   0xf   :  { %619 = vmatpush3.msra.mxu1 %v59_v23  ;;  %585 = vmatprep.subr.mxu0 %v42_v24  ;;  %v23_v43 = vld [vmem:[%s1156_s1 + $0x30] sm:$0xff]  ;;  %v22_v47 = vld [vmem:[%s1156_s1 + $0x28] sm:$0xff]  ;;  %v21_v52 = vld [vmem:[%s1156_s1 + $0x20] sm:$0xff] }
  0x10   :  { %620 = vmatprep.subr.mxu1 %v74_v25  ;;  %586 = vmatpush3.msra.mxu0 %v26_v26  ;;  %v55_v44 = vld [vmem:[%s1156_s1 + $0x130] sm:$0xff]  ;;  %v54_v48 = vld [vmem:[%s1156_s1 + $0x128] sm:$0xff]  ;;  %v53_v53 = vld [vmem:[%s1156_s1 + $0x120] sm:$0xff] }
  0x11   :  { %621 = vmatpush3.msra.mxu1 %v58_v27  ;;  %587 = vmatprep.subr.mxu0 %v41_v28  ;;  %v14_v54 = vld [vmem:[%s1157_s0] sm:$0xff]  ;;  %v36_v55 = vld [vmem:[%s1156_s1 + $0x98] sm:$0xff]  ;;  %v35_v60 = vld [vmem:[%s1156_s1 + $0x90] sm:$0xff] }
  0x12   :  { %622 = vmatprep.subr.mxu1 %v73_v29  ;;  %588 = vmatpush3.msra.mxu0 %v25_v33  ;;  %v68_v56 = vld [vmem:[%s1156_s1 + $0x198] sm:$0xff]  ;;  %v156_v57 = vcombine.high %v14_v54, %v14_v54  ;;  %v67_v61 = vld [vmem:[%s1156_s1 + $0x190] sm:$0xff]  ;;  %v163_v62 = vrot.slane %v14_v54, %v886_v51  ;;  %v34_v1 = vld [vmem:[%s1156_s1 + $0x88] sm:$0xff] }
  0x13   :  { %623 = vmatpush3.msra.mxu1 %v57_v34  ;;  %589 = vmatprep.subr.mxu0 %v40_v35  ;;  %v20_v58 = vld [vmem:[%s1156_s1 + $0x18] sm:$0xff]  ;;  %v19_v63 = vld [vmem:[%s1156_s1 + $0x10] sm:$0xff]  ;;  %v66_v2 = vld [vmem:[%s1156_s1 + $0x188] sm:$0xff] }
  0x14   :  { %624 = vmatprep.subr.mxu1 %v72_v36  ;;  %590 = vmatpush3.msra.mxu0 %v24_v37  ;;  %v52_v59 = vld [vmem:[%s1156_s1 + $0x118] sm:$0xff]  ;;  %v51_v0 = vld [vmem:[%s1156_s1 + $0x110] sm:$0xff]  ;;  %v170_v3 = vrot.slane %v156_v57, %v886_v51  ;;  %v18_v4 = vld [vmem:[%s1156_s1 + $0x8] sm:$0xff]  ;;  %v171_v8 = vcombine.high %v163_v62, %v163_v62 }
  0x15   :  { %625 = vmatpush3.msra.mxu1 %v56_v38  ;;  %591 = vmatprep.subr.mxu0 %v39_v39  ;;  %v50_v5 = vld [vmem:[%s1156_s1 + $0x108] sm:$0xff]  ;;  %v33_v6 = vld [vmem:[%s1156_s1 + $0x80] sm:$0xff]  ;;  %v112_v12 = vld [vmem:[%s1156_s1 + $0x2f8] sm:$0xff] }
  0x16   :  { %626 = vmatprep.subr.mxu1 %v71_v40  ;;  %592 = vmatpush3.msra.mxu0 %v23_v43  ;;  %v65_v7 = vld [vmem:[%s1156_s1 + $0x180] sm:$0xff]  ;;  %v172_v11 = vcombine.high %v170_v3, %v170_v3  ;;  %v144_v13 = vld [vmem:[%s1156_s1 + $0x3f8] sm:$0xff]  ;;  %v111_v16 = vld [vmem:[%s1156_s1 + $0x2f0] sm:$0xff] }
  0x17   :  { %627 = vmatpush3.msra.mxu1 %v55_v44  ;;  %593 = vmatprep.subr.mxu0 %v38_v45  ;;  %v17_v9 = vld [vmem:[%s1156_s1] sm:$0xff]  ;;  %v96_v14 = vld [vmem:[%s1156_s1 + $0x278] sm:$0xff]  ;;  %v143_v17 = vld [vmem:[%s1156_s1 + $0x3f0] sm:$0xff] }
  0x18   :  { %628 = vmatprep.subr.mxu1 %v70_v46  ;;  %594 = vmatpush3.msra.mxu0 %v22_v47  ;;  %v49_v10 = vld [vmem:[%s1156_s1 + $0x100] sm:$0xff]  ;;  %v128_v15 = vld [vmem:[%s1156_s1 + $0x378] sm:$0xff]  ;;  %v95_v18 = vld [vmem:[%s1156_s1 + $0x270] sm:$0xff] }
  0x19   :  { %629 = vmatpush3.msra.mxu1 %v54_v48  ;;  %595 = vmatprep.subr.mxu0 %v37_v49  ;;  %v127_v19 = vld [vmem:[%s1156_s1 + $0x370] sm:$0xff]  ;;  %v110_v20 = vld [vmem:[%s1156_s1 + $0x2e8] sm:$0xff]  ;;  %v109_v24 = vld [vmem:[%s1156_s1 + $0x2e0] sm:$0xff] }
  0x1a   :  { %630 = vmatprep.subr.mxu1 %v69_v50  ;;  %596 = vmatpush3.msra.mxu0 %v21_v52  ;;  %v142_v21 = vld [vmem:[%s1156_s1 + $0x3e8] sm:$0xff]  ;;  %v141_v25 = vld [vmem:[%s1156_s1 + $0x3e0] sm:$0xff]  ;;  %v108_v28 = vld [vmem:[%s1156_s1 + $0x2d8] sm:$0xff] }
  0x1b   :  { %631 = vmatpush3.msra.mxu1 %v53_v53  ;;  %597 = vmatprep.subr.mxu0 %v36_v55  ;;  %v94_v22 = vld [vmem:[%s1156_s1 + $0x268] sm:$0xff]  ;;  %v93_v26 = vld [vmem:[%s1156_s1 + $0x260] sm:$0xff]  ;;  %v140_v29 = vld [vmem:[%s1156_s1 + $0x3d8] sm:$0xff] }
  0x1c   :  { %632 = vmatprep.subr.mxu1 %v68_v56  ;;  %598 = vmatpush3.msra.mxu0 %v20_v58  ;;  %v126_v23 = vld [vmem:[%s1156_s1 + $0x368] sm:$0xff]  ;;  %v125_v27 = vld [vmem:[%s1156_s1 + $0x360] sm:$0xff]  ;;  %v92_v30 = vld [vmem:[%s1156_s1 + $0x258] sm:$0xff] }
  0x1d   :  { %633 = vmatpush3.msra.mxu1 %v52_v59  ;;  %599 = vmatprep.subr.mxu0 %v35_v60  ;;  %v124_v31 = vld [vmem:[%s1156_s1 + $0x358] sm:$0xff]  ;;  %v107_v32 = vld [vmem:[%s1156_s1 + $0x2d0] sm:$0xff]  ;;  %v106_v36 = vld [vmem:[%s1156_s1 + $0x2c8] sm:$0xff] }
  0x1e   :  { %634 = vmatprep.subr.mxu1 %v67_v61  ;;  %600 = vmatpush3.msra.mxu0 %v19_v63  ;;  %v139_v33 = vld [vmem:[%s1156_s1 + $0x3d0] sm:$0xff]  ;;  %v138_v37 = vld [vmem:[%s1156_s1 + $0x3c8] sm:$0xff]  ;;  %v105_v40 = vld [vmem:[%s1156_s1 + $0x2c0] sm:$0xff] }
  0x1f   :  { %635 = vmatpush3.msra.mxu1 %v51_v0  ;;  %601 = vmatprep.subr.mxu0 %v34_v1  ;;  %v91_v34 = vld [vmem:[%s1156_s1 + $0x250] sm:$0xff]  ;;  %v90_v38 = vld [vmem:[%s1156_s1 + $0x248] sm:$0xff]  ;;  %v137_v41 = vld [vmem:[%s1156_s1 + $0x3c0] sm:$0xff] }
  0x20   :  { %636 = vmatprep.subr.mxu1 %v66_v2  ;;  %602 = vmatpush3.msra.mxu0 %v18_v4  ;;  %v123_v35 = vld [vmem:[%s1156_s1 + $0x350] sm:$0xff]  ;;  %v122_v39 = vld [vmem:[%s1156_s1 + $0x348] sm:$0xff]  ;;  %v89_v42 = vld [vmem:[%s1156_s1 + $0x240] sm:$0xff] }
  0x21   :  { %637 = vmatpush3.msra.mxu1 %v50_v5  ;;  %603 = vmatprep.subr.mxu0 %v33_v6  ;;  %v121_v43 = vld [vmem:[%s1156_s1 + $0x340] sm:$0xff]  ;;  %v104_v44 = vld [vmem:[%s1156_s1 + $0x2b8] sm:$0xff]  ;;  %v103_v48 = vld [vmem:[%s1156_s1 + $0x2b0] sm:$0xff] }
  0x22   :  { %638 = vmatprep.subr.mxu1 %v65_v7  ;;  %604 = vmatpush3.msra.mxu0 %v17_v9  ;;  %v136_v45 = vld [vmem:[%s1156_s1 + $0x3b8] sm:$0xff]  ;;  %v135_v49 = vld [vmem:[%s1156_s1 + $0x3b0] sm:$0xff]  ;;  %v102_v53 = vld [vmem:[%s1156_s1 + $0x2a8] sm:$0xff] }
  0x23   :  { %276 = vmatprep.mubr.f32.mxu0 %v171_v8  ;;  %639 = vmatpush3.msra.mxu1 %v49_v10  ;;  %v88_v46 = vld [vmem:[%s1156_s1 + $0x238] sm:$0xff]  ;;  %v87_v50 = vld [vmem:[%s1156_s1 + $0x230] sm:$0xff]  ;;  %v134_v54 = vld [vmem:[%s1156_s1 + $0x3a8] sm:$0xff] }
  0x24   :  { %277 = vmatmul.mubr.f32.vlgmr.msra.gmra.mxu0 %v163_v62  ;;  %346 = vmatprep.mubr.f32.mxu1 %v172_v11  ;;  %v120_v47 = vld [vmem:[%s1156_s1 + $0x338] sm:$0xff]  ;;  %v119_v52 = vld [vmem:[%s1156_s1 + $0x330] sm:$0xff]  ;;  %v15_v55 = vld [vmem:[%s1157_s0 + $0x8] sm:$0xff] }
  0x25   :  { %643 = vmatprep.subr.mxu0 %v112_v12  ;;  %678 = vmatprep.subr.mxu1 %v144_v13  ;;  %v86_v56 = vld [vmem:[%s1156_s1 + $0x228] sm:$0xff]  ;;  %v101_v58 = vld [vmem:[%s1156_s1 + $0x2a0] sm:$0xff]  ;;  %v173_v62 = vcombine.high %v15_v55, %v15_v55  ;;  %v100_v63 = vld [vmem:[%s1156_s1 + $0x298] sm:$0xff]  ;;  %v180_v5 = vrot.slane %v15_v55, %v886_v51 }
  0x26   :  { %347 = vmatmul.mubr.f32.vlgmr.msra.gmra.mxu1 %v170_v3  ;;  %644 = vmatpush3.msra.mxu0 %v96_v14  ;;  %v118_v57 = vld [vmem:[%s1156_s1 + $0x328] sm:$0xff]  ;;  %v133_v59 = vld [vmem:[%s1156_s1 + $0x3a0] sm:$0xff]  ;;  %v132_v0 = vld [vmem:[%s1156_s1 + $0x398] sm:$0xff] }
  0x27   :  { %679 = vmatpush3.msra.mxu1 %v128_v15  ;;  %645 = vmatprep.subr.mxu0 %v111_v16  ;;  %v85_v60 = vld [vmem:[%s1156_s1 + $0x220] sm:$0xff]  ;;  %v84_v1 = vld [vmem:[%s1156_s1 + $0x218] sm:$0xff]  ;;  %v99_v3 = vld [vmem:[%s1156_s1 + $0x290] sm:$0xff]  ;;  %v187_v8 = vrot.slane %v173_v62, %v886_v51  ;;  %v188_v14 = vcombine.high %v180_v5, %v180_v5 }
  0x28   :  { %680 = vmatprep.subr.mxu1 %v143_v17  ;;  %646 = vmatpush3.msra.mxu0 %v95_v18  ;;  %v117_v61 = vld [vmem:[%s1156_s1 + $0x320] sm:$0xff]  ;;  %v116_v2 = vld [vmem:[%s1156_s1 + $0x318] sm:$0xff]  ;;  %v131_v4 = vld [vmem:[%s1156_s1 + $0x390] sm:$0xff] }
  0x29   :  { %681 = vmatpush3.msra.mxu1 %v127_v19  ;;  %647 = vmatprep.subr.mxu0 %v110_v20  ;;  %v83_v6 = vld [vmem:[%s1156_s1 + $0x210] sm:$0xff]  ;;  %v98_v9 = vld [vmem:[%s1156_s1 + $0x288] sm:$0xff]  ;;  %v97_v12 = vld [vmem:[%s1156_s1 + $0x280] sm:$0xff]  ;;  %v189_v16 = vcombine.high %v187_v8, %v187_v8  ;;  %v726_v19 = vmov 0.0  }
  0x2a   :  { %682 = vmatprep.subr.mxu1 %v142_v21  ;;  %648 = vmatpush3.msra.mxu0 %v94_v22  ;;  %v115_v7 = vld [vmem:[%s1156_s1 + $0x310] sm:$0xff]  ;;  %v130_v10 = vld [vmem:[%s1156_s1 + $0x388] sm:$0xff]  ;;  %v129_v13 = vld [vmem:[%s1156_s1 + $0x380] sm:$0xff] }
  0x2b   :  { %683 = vmatpush3.msra.mxu1 %v126_v23  ;;  %649 = vmatprep.subr.mxu0 %v109_v24  ;;  %v82_v11 = vld [vmem:[%s1156_s1 + $0x208] sm:$0xff]  ;;  %v81_v15 = vld [vmem:[%s1156_s1 + $0x200] sm:$0xff]  ;;  %v570_v20 = vld.sshfl [vmem:[%s1157_s0 + $0x10] sm:$0x3 pattern:$0x76325410] }
  0x2c   :  { %684 = vmatprep.subr.mxu1 %v141_v25  ;;  %650 = vmatpush3.msra.mxu0 %v93_v26  ;;  %v114_v51 = vld [vmem:[%s1156_s1 + $0x308] sm:$0xff]  ;;  %v113_v17 = vld [vmem:[%s1156_s1 + $0x300] sm:$0xff] }
  0x2d   :  { %685 = vmatpush3.msra.mxu1 %v125_v27  ;;  %651 = vmatprep.subr.mxu0 %v108_v28  ;;  %v145_v18 = vld [vmem:[%s1156_s1 + $0x400] sm:$0x1f] }
  0x2e   :  { %686 = vmatprep.subr.mxu1 %v140_v29  ;;  %652 = vmatpush3.msra.mxu0 %v92_v30  ;;  %v569_v25 = vld [vmem:[%s1158_s2] ss:$0 sm:$0xff] }
  0x2f   :  { %687 = vmatpush3.msra.mxu1 %v124_v31  ;;  %653 = vmatprep.subr.mxu0 %v107_v32 }
  0x30   :  { %688 = vmatprep.subr.mxu1 %v139_v33  ;;  %654 = vmatpush3.msra.mxu0 %v91_v34 }
  0x31   :  { %689 = vmatpush3.msra.mxu1 %v123_v35  ;;  %655 = vmatprep.subr.mxu0 %v106_v36 }
  0x32   :  { %690 = vmatprep.subr.mxu1 %v138_v37  ;;  %656 = vmatpush3.msra.mxu0 %v90_v38 }
  0x33   :  { %691 = vmatpush3.msra.mxu1 %v122_v39  ;;  %657 = vmatprep.subr.mxu0 %v105_v40 }
  0x34   :  { %692 = vmatprep.subr.mxu1 %v137_v41  ;;  %658 = vmatpush3.msra.mxu0 %v89_v42 }
  0x35   :  { %693 = vmatpush3.msra.mxu1 %v121_v43  ;;  %659 = vmatprep.subr.mxu0 %v104_v44 }
  0x36   :  { %694 = vmatprep.subr.mxu1 %v136_v45  ;;  %660 = vmatpush3.msra.mxu0 %v88_v46 }
  0x37   :  { %695 = vmatpush3.msra.mxu1 %v120_v47  ;;  %661 = vmatprep.subr.mxu0 %v103_v48 }
  0x38   :  { %696 = vmatprep.subr.mxu1 %v135_v49  ;;  %662 = vmatpush3.msra.mxu0 %v87_v50 }
  0x39   :  { %697 = vmatpush3.msra.mxu1 %v119_v52  ;;  %663 = vmatprep.subr.mxu0 %v102_v53 }
  0x3a   :  { %698 = vmatprep.subr.mxu1 %v134_v54  ;;  %664 = vmatpush3.msra.mxu0 %v86_v56 }
  0x3b   :  { %699 = vmatpush3.msra.mxu1 %v118_v57  ;;  %665 = vmatprep.subr.mxu0 %v101_v58 }
  0x3c   :  { %700 = vmatprep.subr.mxu1 %v133_v59  ;;  %666 = vmatpush3.msra.mxu0 %v85_v60 }
  0x3d   :  { %701 = vmatpush3.msra.mxu1 %v117_v61  ;;  %667 = vmatprep.subr.mxu0 %v100_v63 }
  0x3e   :  { %702 = vmatprep.subr.mxu1 %v132_v0  ;;  %668 = vmatpush3.msra.mxu0 %v84_v1 }
  0x3f   :  { %703 = vmatpush3.msra.mxu1 %v116_v2  ;;  %669 = vmatprep.subr.mxu0 %v99_v3 }
  0x40   :  { %704 = vmatprep.subr.mxu1 %v131_v4  ;;  %670 = vmatpush3.msra.mxu0 %v83_v6 }
  0x41   :  { %705 = vmatpush3.msra.mxu1 %v115_v7  ;;  %671 = vmatprep.subr.mxu0 %v98_v9 }
  0x42   :  { %706 = vmatprep.subr.mxu1 %v130_v10  ;;  %672 = vmatpush3.msra.mxu0 %v82_v11 }
  0x43   :  { %707 = vmatpush3.msra.mxu1 %v114_v51  ;;  %673 = vmatprep.subr.mxu0 %v97_v12 }
  0x44   :  { %708 = vmatprep.subr.mxu1 %v129_v13  ;;  %674 = vmatpush3.msra.mxu0 %v81_v15 }
  0x45   :  { %416 = vmatprep.mubr.f32.mxu0 %v188_v14  ;;  %709 = vmatpush3.msra.mxu1 %v113_v17 }
  0x46   :  { %486 = vmatprep.mubr.f32.mxu1 %v189_v16  ;;  %417 = vmatmul.mubr.f32.vlgmr.msra.gmra.mxu0 %v180_v5 }
  0x47   :  { %487 = vmatmul.mubr.f32.vlgmr.msra.gmra.mxu1 %v187_v8  ;;  %715 = vmatprep.subr.mxu0 %v726_v19 }
  0x48   :  { %717 = vmatprep.mubr.msk.f32.mxu0 %vm727_vm1, %v726_v19  ;;  %716 = vmatpush3.msk.msra.mxu0 %vm208_vm0, %v145_v18 }
  0x4a   :  { %718 = vmatmul.mubr.msk.f32.vlgmr.msra.gmra.mxu0 %vm205_vm2, %v570_v20 }
  0xe4   :  { %v605_v21 = vpop.f32.mrf.mxu0 }
  0xe6   :  { %v640_v22 = vpop.f32.mrf.mxu1  ;;  %v606_v23 = vpop.f32.mrf.mxu0 }
  0xe7   :  { %v607_v24 = vadd.f32 %v606_v23, %v605_v21 }
  0xe8   :  { %v641_v26 = vpop.f32.mrf.mxu1 }
  0xe9   :  { %v279_v27 = vadd.f32 %v607_v24, %v569_v25  ;;  %v642_v28 = vadd.f32 %v641_v26, %v640_v22 }
  0xeb   :  { %v349_v33 = vadd.f32 %v642_v28, %v279_v27 }
 0x106   :  { %v675_v29 = vpop.f32.mrf.mxu0 }
 0x107   :  { %v710_v30 = vpop.f32.mrf.mxu1 }
 0x108   :  { %v676_v31 = vpop.f32.mrf.mxu0 }
 0x109   :  { %v711_v32 = vpop.f32.mrf.mxu1  ;;  %v677_v34 = vadd.f32 %v676_v31, %v675_v29 }
 0x10a   :  { %v558_v35 = vpop.f32.mrf.mxu0  ;;  %v712_v37 = vadd.f32 %v711_v32, %v710_v30 }
 0x10b   :  { %v419_v36 = vadd.f32 %v677_v34, %v349_v33 }
 0x10c   :  { %v719_v38 = vpop.f32.mrf.mxu0 }
 0x10d   :  { %v489_v39 = vadd.f32 %v712_v37, %v419_v36 }
 0x10f   :  { %v559_v40 = vadd.f32 %v558_v35, %v489_v39 }
 0x111   :  { %v562_v41 = vmax.f32 %v559_v40, 0.0 }
 0x113   :  { %564 = vst.msk [vmem:[%s1159_s3] sm:$0x3] %vm563_vm3, %v562_v41 }

// kernel: ssidvae_forward.18
= control target key start
LH: loop header
LB: loop body
LE: loop exit
PB: predicated region body
PF: predicated region fallthrough
CT: control target
= control target key end

     0   :  { %vm28_vm0 = vcmask 1041408   ;;  %v124_v0 = vmov 0.0   ;;  %vm125_vm1 = vmmov 0   ;;  %vm24_vm2 = vcmask 80896   ;;  %s161_s1 = inlined_call_operand.vmem [shape: f32[10,32], index: 1, kind: input, shape index: {}]   ;;  %s162_s0 = inlined_call_operand.vmem [shape: f32[2,10], index: 0, kind: input, shape index: {}]   ;;  %s163_s2 = inlined_call_operand.vmem [shape: f32[1,32], index: 2, kind: input, shape index: {}]   ;;  %s164_s3 = inlined_call_operand.vmem [shape: f32[2,32], index: 3, kind: output, shape index: {}]  }
   0x1   :  { %115 = vmatprep.subr.mxu0 %v124_v0  ;;  %v16_v1 = vld [vmem:[%s161_s1 + $0x8] sm:$0x3]  ;;  %v15_v2 = vld [vmem:[%s161_s1] sm:$0xff]  ;;  %119 = vmatprep.mubr.msk.f32.mxu0 %vm125_vm1, %v124_v0  ;;  %vm103_vm3 = vcmask 254976  }
   0x2   :  { %116 = vmatpush3.msk.msra.mxu0 %vm28_vm0, %v16_v1  ;;  %v14_v3 = vld [vmem:[%s162_s0] sm:$0x3] }
   0x3   :  { %117 = vmatprep.subr.mxu0 %v124_v0  ;;  %v109_v4 = vld [vmem:[%s163_s2] ss:$0 sm:$0xff] }
   0x4   :  { %118 = vmatpush3.msra.mxu0 %v15_v2 }
   0x5   :  { %120 = vmatmul.mubr.msk.f32.vlgmr.msra.gmra.mxu0 %vm24_vm2, %v14_v3 }
  0xc5   :  { %v98_v5 = vpop.f32.mrf.mxu0 }
  0xc6   :  { %v99_v6 = vadd.f32 %v109_v4, %v98_v5 }
  0xc7   :  { %v121_v7 = vpop.f32.mrf.mxu0 }
  0xc8   :  { %v102_v8 = vmax.f32 %v99_v6, 0.0 }
  0xca   :  { %104 = vst.msk [vmem:[%s164_s3] sm:$0x3] %vm103_vm3, %v102_v8 }

// kernel: ssidvae_forward.19
= control target key start
LH: loop header
LB: loop body
LE: loop exit
PB: predicated region body
PF: predicated region fallthrough
CT: control target
= control target key end

     0   :  { %v466_v3 = vmov 0.0   ;;  %vm89_vm0 = vcmask 261120   ;;  %v49_v34 = vlaneseq  ;;  %v467_v49 = vmov 1966171168   ;;  %s601_s1 = inlined_call_operand.vmem [shape: f32[32,1024], index: 1, kind: input, shape index: {}]   ;;  %s602_s0 = inlined_call_operand.vmem [shape: f32[2,32], index: 0, kind: input, shape index: {}]   ;;  %s603_s2 = inlined_call_operand.vmem [shape: f32[1,1024], index: 2, kind: input, shape index: {}]   ;;  %s604_s3 = inlined_call_operand.vmem [shape: bf16[2,1024], index: 3, kind: output, shape index: {}]  }
   0x1   :  { %v40_v0 = vld [vmem:[%s601_s1 + $0xc8] sm:$0xff]  ;;  %v42_v1 = vld [vmem:[%s601_s1 + $0xd8] sm:$0xff]  ;;  %v39_v2 = vld [vmem:[%s601_s1 + $0xc0] sm:$0xff]  ;;  %157 = vmatprep.mubr.f32.mxu0 %v466_v3  ;;  %228 = vmatprep.mubr.f32.mxu1 %v466_v3  ;;  %v406_v50 = vunpack.c.l.s4 %v467_v49 }
   0x2   :  { %117 = vmatprep.subr.mxu0 %v40_v0  ;;  %188 = vmatprep.subr.mxu1 %v42_v1  ;;  %v41_v4 = vld [vmem:[%s601_s1 + $0xd0] sm:$0xff]  ;;  %v32_v5 = vld [vmem:[%s601_s1 + $0x88] sm:$0xff]  ;;  %v34_v6 = vld [vmem:[%s601_s1 + $0x98] sm:$0xff]  ;;  %v50_v35 = vshrl.u32 %v49_v34, 7 }
   0x3   :  { %118 = vmatpush1.msra.mxu0 %v39_v2  ;;  %189 = vmatpush1.msra.mxu1 %v41_v4  ;;  %v31_v7 = vld [vmem:[%s601_s1 + $0x80] sm:$0xff]  ;;  %v33_v8 = vld [vmem:[%s601_s1 + $0x90] sm:$0xff]  ;;  %v24_v9 = vld [vmem:[%s601_s1 + $0x48] sm:$0xff]  ;;  %v407_v59 = vunpack.c.0.s8 %v406_v50 }
   0x4   :  { %119 = vmatprep.subr.mxu0 %v32_v5  ;;  %190 = vmatprep.subr.mxu1 %v34_v6  ;;  %v26_v10 = vld [vmem:[%s601_s1 + $0x58] sm:$0xff]  ;;  %v23_v11 = vld [vmem:[%s601_s1 + $0x40] sm:$0xff]  ;;  %v25_v12 = vld [vmem:[%s601_s1 + $0x50] sm:$0xff]  ;;  %v51_v36 = vsub.s32 0, %v50_v35  ;;  %v59_v38 = vsub.s32 2, %v50_v35  ;;  %v55_v39 = vsub.s32 1, %v50_v35 }
   0x5   :  { %120 = vmatpush1.msra.mxu0 %v31_v7  ;;  %191 = vmatpush1.msra.mxu1 %v33_v8  ;;  %v16_v13 = vld [vmem:[%s601_s1 + $0x8] sm:$0xff]  ;;  %v18_v14 = vld [vmem:[%s601_s1 + $0x18] sm:$0xff]  ;;  %v15_v15 = vld [vmem:[%s601_s1] sm:$0xff]  ;;  %v63_v40 = vsub.s32 3, %v50_v35  ;;  %v67_v51 = vsub.s32 4, %v50_v35  ;;  %v75_v52 = vsub.s32 6, %v50_v35  ;;  %v410_v8 = vsub.s32 %v407_v59, %v50_v35 }
   0x6   :  { %121 = vmatprep.subr.mxu0 %v24_v9  ;;  %192 = vmatprep.subr.mxu1 %v26_v10  ;;  %v17_v16 = vld [vmem:[%s601_s1 + $0x10] sm:$0xff]  ;;  %v14_v17 = vld [vmem:[%s602_s0] sm:$0x3]  ;;  %v44_v18 = vld [vmem:[%s601_s1 + $0xe8] sm:$0xff]  ;;  %v71_v57 = vsub.s32 5, %v50_v35  ;;  %v79_v58 = vsub.s32 7, %v50_v35 }
   0x7   :  { %122 = vmatpush1.msra.mxu0 %v23_v11  ;;  %193 = vmatpush1.msra.mxu1 %v25_v12  ;;  %v46_v19 = vld [vmem:[%s601_s1 + $0xf8] sm:$0xff]  ;;  %v43_v20 = vld [vmem:[%s601_s1 + $0xe0] sm:$0xff]  ;;  %v45_v21 = vld [vmem:[%s601_s1 + $0xf0] sm:$0xff] }
   0x8   :  { %123 = vmatprep.subr.mxu0 %v16_v13  ;;  %194 = vmatprep.subr.mxu1 %v18_v14  ;;  %v36_v22 = vld [vmem:[%s601_s1 + $0xa8] sm:$0xff]  ;;  %v38_v23 = vld [vmem:[%s601_s1 + $0xb8] sm:$0xff]  ;;  %v35_v24 = vld [vmem:[%s601_s1 + $0xa0] sm:$0xff] }
   0x9   :  { %124 = vmatpush1.msra.mxu0 %v15_v15  ;;  %195 = vmatpush1.msra.mxu1 %v17_v16  ;;  %v37_v25 = vld [vmem:[%s601_s1 + $0xb0] sm:$0xff]  ;;  %v28_v26 = vld [vmem:[%s601_s1 + $0x68] sm:$0xff]  ;;  %v30_v27 = vld [vmem:[%s601_s1 + $0x78] sm:$0xff] }
   0xa   :  { %456 = vmatmul.mubr.msk.f32.vlgmr.msra.gmra.mxu0 %vm89_vm0, %v14_v17  ;;  %457 = vmatmul.mubr.msk.f32.vlgmr.msra.gmra.mxu1 %vm89_vm0, %v14_v17  ;;  %v27_v28 = vld [vmem:[%s601_s1 + $0x60] sm:$0xff]  ;;  %v29_v29 = vld [vmem:[%s601_s1 + $0x70] sm:$0xff]  ;;  %v20_v30 = vld [vmem:[%s601_s1 + $0x28] sm:$0xff] }
   0xb   :  { %259 = vmatprep.subr.mxu0 %v44_v18  ;;  %330 = vmatprep.subr.mxu1 %v46_v19  ;;  %v22_v31 = vld [vmem:[%s601_s1 + $0x38] sm:$0xff]  ;;  %v19_v32 = vld [vmem:[%s601_s1 + $0x20] sm:$0xff]  ;;  %v21_v33 = vld [vmem:[%s601_s1 + $0x30] sm:$0xff] }
   0xc   :  { %260 = vmatpush1.msra.mxu0 %v43_v20  ;;  %331 = vmatpush1.msra.mxu1 %v45_v21  ;;  %v47_v37 = vld [vmem:[%s603_s2] sm:$0xff] }
   0xd   :  { %261 = vmatprep.subr.mxu0 %v36_v22  ;;  %332 = vmatprep.subr.mxu1 %v38_v23  ;;  %v52_v41 = vrot.slane %v47_v37, %v51_v36  ;;  %v60_v43 = vrot.slane %v47_v37, %v59_v38  ;;  %v56_v45 = vrot.slane %v47_v37, %v55_v39 }
   0xe   :  { %262 = vmatpush1.msra.mxu0 %v35_v24  ;;  %333 = vmatpush1.msra.mxu1 %v37_v25  ;;  %v64_v46 = vrot.slane %v47_v37, %v63_v40  ;;  %v68_v60 = vrot.slane %v47_v37, %v67_v51  ;;  %v76_v61 = vrot.slane %v47_v37, %v75_v52 }
   0xf   :  { %263 = vmatprep.subr.mxu0 %v28_v26  ;;  %334 = vmatprep.subr.mxu1 %v30_v27  ;;  %v72_v2 = vrot.slane %v47_v37, %v71_v57  ;;  %v80_v5 = vrot.slane %v47_v37, %v79_v58 }
  0x10   :  { %264 = vmatpush1.msra.mxu0 %v27_v28  ;;  %335 = vmatpush1.msra.mxu1 %v29_v29 }
  0x11   :  { %265 = vmatprep.subr.mxu0 %v20_v30  ;;  %336 = vmatprep.subr.mxu1 %v22_v31 }
  0x12   :  { %266 = vmatpush1.msra.mxu0 %v19_v32  ;;  %299 = vmatprep.mubr.f32.mxu0 %v466_v3 }
  0x13   :  { %337 = vmatpush1.msra.mxu1 %v21_v33  ;;  %370 = vmatprep.mubr.f32.mxu1 %v466_v3 }
  0x14   :  { %458 = vmatmul.mubr.msk.f32.vlgmr.msra.gmra.mxu0 %vm89_vm0, %v14_v17  ;;  %459 = vmatmul.mubr.msk.f32.vlgmr.msra.gmra.mxu1 %vm89_vm0, %v14_v17 }
  0xca   :  { %v159_v42 = vpop.f32.mrf.mxu0  ;;  %v230_v44 = vpop.f32.mrf.mxu1 }
  0xcb   :  { %v160_v53 = vadd.f32 %v159_v42, %v52_v41  ;;  %v231_v54 = vadd.f32 %v230_v44, %v60_v43 }
  0xcc   :  { %v161_v47 = vpop.f32.mrf.mxu0  ;;  %v232_v48 = vpop.f32.mrf.mxu1 }
  0xcd   :  { %v162_v55 = vadd.f32 %v161_v47, %v56_v45  ;;  %v233_v56 = vadd.f32 %v232_v48, %v64_v46  ;;  %v377_v62 = vmax.f32 %v160_v53, 0.0  ;;  %v379_v63 = vmax.f32 %v231_v54, 0.0 }
  0xcf   :  { %v378_v0 = vmax.f32 %v162_v55, 0.0  ;;  %v380_v1 = vmax.f32 %v233_v56, 0.0 }
  0xd1   :  { %v460_v7 = vpack.c.bf16 %v378_v0, %v377_v62  ;;  %v461_v9 = vpack.c.bf16 %v380_v1, %v379_v63 }
  0xd3   :  { %v411_v17 = vrot.slane %v460_v7, %v410_v8  ;;  %v418_v18 = vrot.slane %v461_v9, %v410_v8 }
  0xd4   :  { %v301_v3 = vpop.f32.mrf.mxu0  ;;  %v372_v4 = vpop.f32.mrf.mxu1 }
  0xd5   :  { %v302_v6 = vadd.f32 %v301_v3, %v68_v60  ;;  %v373_v10 = vadd.f32 %v372_v4, %v76_v61  ;;  %v433_v24 = vcombine.low %v411_v17, %v418_v18 }
  0xd6   :  { %v303_v11 = vpop.f32.mrf.mxu0  ;;  %v374_v12 = vpop.f32.mrf.mxu1 }
  0xd7   :  { %v304_v13 = vadd.f32 %v303_v11, %v72_v2  ;;  %v375_v14 = vadd.f32 %v374_v12, %v80_v5  ;;  %v381_v15 = vmax.f32 %v302_v6, 0.0  ;;  %v383_v19 = vmax.f32 %v373_v10, 0.0 }
  0xd8   :  { %v441_v27 = vrot.slane %v433_v24, %v410_v8 }
  0xd9   :  { %v382_v16 = vmax.f32 %v304_v13, 0.0  ;;  %v384_v20 = vmax.f32 %v375_v14, 0.0 }
  0xdb   :  { %v462_v21 = vpack.c.bf16 %v382_v16, %v381_v15  ;;  %v463_v22 = vpack.c.bf16 %v384_v20, %v383_v19 }
  0xdd   :  { %v425_v23 = vrot.slane %v462_v21, %v410_v8  ;;  %v432_v25 = vrot.slane %v463_v22, %v410_v8 }
  0xdf   :  { %v434_v26 = vcombine.low %v425_v23, %v432_v25 }
  0xe1   :  { %v448_v28 = vrot.slane %v434_v26, %v410_v8 }
  0xe3   :  { %v449_v29 = vcombine.low %v441_v27, %v448_v28 }
  0xe5   :  { %451 = vst [vmem:[%s604_s3] sm:$0xff] %v449_v29 }

// kernel: ssidvae_forward.20
= control target key start
LH: loop header
LB: loop body
LE: loop exit
PB: predicated region body
PF: predicated region fallthrough
CT: control target
= control target key end

     0   :  { %v55_v41 = vlaneseq  ;;  %s708_s1 = inlined_call_operand.vmem [shape: bf16[256,256], index: 1, kind: input, shape index: {}]   ;;  %s709_s0 = inlined_call_operand.vmem [shape: bf16[50,256], index: 0, kind: input, shape index: {}]   ;;  %s710_s2 = inlined_call_operand.vmem [shape: f32[1,256], index: 2, kind: input, shape index: {}]   ;;  %s711_s3 = inlined_call_operand.vmem [shape: bf16[50,256], index: 3, kind: output, shape index: {}]  }
   0x1   :  { %v488_v0 = vld [vmem:[%s708_s1 + $0x74] ss:$8 sps:$4 sm:$0xff]   ;;  %v490_v1 = vld [vmem:[%s708_s1 + $0x70] ss:$8 sps:$4 sm:$0xff]   ;;  %v491_v2 = vld [vmem:[%s708_s1 + $0x64] ss:$8 sps:$4 sm:$0xff]  }
   0x2   :  { %262 = vmatprep.subr.bf16.mxu0 %v488_v0  ;;  %456 = vmatprep.subr.bf16.mxu1 %v488_v0  ;;  %v493_v3 = vld [vmem:[%s708_s1 + $0x60] ss:$8 sps:$4 sm:$0xff]   ;;  %v494_v4 = vld [vmem:[%s708_s1 + $0x54] ss:$8 sps:$4 sm:$0xff]   ;;  %v496_v5 = vld [vmem:[%s708_s1 + $0x50] ss:$8 sps:$4 sm:$0xff]  }
   0x3   :  { %263 = vmatpush1.bf16.msra.mxu0 %v490_v1  ;;  %472 = vmatpush1.bf16.msra.mxu1 %v490_v1  ;;  %v497_v6 = vld [vmem:[%s708_s1 + $0x44] ss:$8 sps:$4 sm:$0xff]   ;;  %v499_v7 = vld [vmem:[%s708_s1 + $0x40] ss:$8 sps:$4 sm:$0xff]   ;;  %v500_v8 = vld [vmem:[%s708_s1 + $0x34] ss:$8 sps:$4 sm:$0xff]  }
   0x4   :  { %264 = vmatprep.subr.bf16.mxu0 %v491_v2  ;;  %457 = vmatprep.subr.bf16.mxu1 %v491_v2  ;;  %v502_v9 = vld [vmem:[%s708_s1 + $0x30] ss:$8 sps:$4 sm:$0xff]   ;;  %v503_v10 = vld [vmem:[%s708_s1 + $0x24] ss:$8 sps:$4 sm:$0xff]   ;;  %v505_v11 = vld [vmem:[%s708_s1 + $0x20] ss:$8 sps:$4 sm:$0xff]  }
   0x5   :  { %v506_v12 = vld [vmem:[%s708_s1 + $0x14] ss:$8 sps:$4 sm:$0xff]   ;;  %v538_v13 = vld [vmem:[%s709_s0 + $0x4] ss:$8 sps:$4 sm:$0xff]   ;;  %v508_v14 = vld [vmem:[%s708_s1 + $0x10] ss:$8 sps:$4 sm:$0xff]  }
   0x6   :  { %v541_v15 = vld [vmem:[%s709_s0 + $0x24] ss:$8 sps:$4 sm:$0xff]   ;;  %294 = vmatprep.mubr.bf16.mxu0 %v538_v13  ;;  %v511_v17 = vld [vmem:[%s708_s1] ss:$8 sps:$4 sm:$0xff]   ;;  %v512_v18 = vld [vmem:[%s708_s1 + $0xf4] ss:$8 sps:$4 sm:$0xff]  }
   0x7   :  { %265 = vmatpush1.bf16.msra.mxu0 %v493_v3  ;;  %473 = vmatpush1.bf16.msra.mxu1 %v493_v3  ;;  %v509_v16 = vld [vmem:[%s708_s1 + $0x4] ss:$8 sps:$4 sm:$0xff]   ;;  %v514_v19 = vld [vmem:[%s708_s1 + $0xf0] ss:$8 sps:$4 sm:$0xff]   ;;  %v517_v21 = vld [vmem:[%s708_s1 + $0xe0] ss:$8 sps:$4 sm:$0xff]  }
   0x8   :  { %266 = vmatprep.subr.bf16.mxu0 %v494_v4  ;;  %458 = vmatprep.subr.bf16.mxu1 %v494_v4  ;;  %v515_v20 = vld [vmem:[%s708_s1 + $0xe4] ss:$8 sps:$4 sm:$0xff]   ;;  %v518_v22 = vld [vmem:[%s708_s1 + $0xd4] ss:$8 sps:$4 sm:$0xff]   ;;  %v520_v23 = vld [vmem:[%s708_s1 + $0xd0] ss:$8 sps:$4 sm:$0xff]  }
   0x9   :  { %314 = vmatprep.mubr.bf16.mxu1 %v541_v15  ;;  %v521_v24 = vld [vmem:[%s708_s1 + $0xc4] ss:$8 sps:$4 sm:$0xff]   ;;  %v523_v25 = vld [vmem:[%s708_s1 + $0xc0] ss:$8 sps:$4 sm:$0xff]   ;;  %v524_v26 = vld [vmem:[%s708_s1 + $0xb4] ss:$8 sps:$4 sm:$0xff]  }
   0xa   :  { %v526_v27 = vld [vmem:[%s708_s1 + $0xb0] ss:$8 sps:$4 sm:$0xff]   ;;  %v527_v28 = vld [vmem:[%s708_s1 + $0xa4] ss:$8 sps:$4 sm:$0xff]   ;;  %v529_v29 = vld [vmem:[%s708_s1 + $0xa0] ss:$8 sps:$4 sm:$0xff]  }
   0xb   :  { %267 = vmatpush1.bf16.msra.mxu0 %v496_v5  ;;  %474 = vmatpush1.bf16.msra.mxu1 %v496_v5  ;;  %v530_v30 = vld [vmem:[%s708_s1 + $0x94] ss:$8 sps:$4 sm:$0xff]   ;;  %v532_v31 = vld [vmem:[%s708_s1 + $0x90] ss:$8 sps:$4 sm:$0xff]   ;;  %v533_v32 = vld [vmem:[%s708_s1 + $0x84] ss:$8 sps:$4 sm:$0xff]  }
   0xc   :  { %268 = vmatprep.subr.bf16.mxu0 %v497_v6  ;;  %459 = vmatprep.subr.bf16.mxu1 %v497_v6  ;;  %v535_v33 = vld [vmem:[%s708_s1 + $0x80] ss:$8 sps:$4 sm:$0xff]   ;;  %v20_v34 = vld [vmem:[%s709_s0 + $0x30] sm:$0x11]  ;;  %v56_v42 = vshrl.u32 %v55_v41, 7 }
   0xd   :  { %v536_v35 = vld [vmem:[%s709_s0] ss:$8 sps:$4 sm:$0xff]   ;;  %v542_v37 = vld [vmem:[%s709_s0 + $0x14] ss:$8 sps:$4 sm:$0xff]   ;;  %v409_v38 = vcombine.high %v20_v34, %v20_v34  ;;  %v545_v39 = vld [vmem:[%s709_s0 + $0x10] ss:$8 sps:$4 sm:$0xff]   ;;  %v408_v40 = vcombine.low %v20_v34, %v20_v34 }
   0xe   :  { %v539_v36 = vld [vmem:[%s709_s0 + $0x20] ss:$8 sps:$4 sm:$0xff]   ;;  %v57_v43 = vsub.s32 0, %v56_v42  ;;  %v61_v45 = vsub.s32 1, %v56_v42 }
   0xf   :  { %269 = vmatpush1.bf16.msra.mxu0 %v499_v7  ;;  %475 = vmatpush1.bf16.msra.mxu1 %v499_v7  ;;  %v53_v44 = vld [vmem:[%s710_s2] sm:$0x3] }
  0x10   :  { %270 = vmatprep.subr.bf16.mxu0 %v500_v8  ;;  %460 = vmatprep.subr.bf16.mxu1 %v500_v8  ;;  %v58_v46 = vrot.slane %v53_v44, %v57_v43  ;;  %v62_v47 = vrot.slane %v53_v44, %v61_v45 }
  0x13   :  { %271 = vmatpush1.bf16.msra.mxu0 %v502_v9  ;;  %476 = vmatpush1.bf16.msra.mxu1 %v502_v9 }
  0x14   :  { %272 = vmatprep.subr.bf16.mxu0 %v503_v10  ;;  %461 = vmatprep.subr.bf16.mxu1 %v503_v10 }
  0x17   :  { %273 = vmatpush1.bf16.msra.mxu0 %v505_v11  ;;  %477 = vmatpush1.bf16.msra.mxu1 %v505_v11 }
  0x18   :  { %274 = vmatprep.subr.bf16.mxu0 %v506_v12  ;;  %462 = vmatprep.subr.bf16.mxu1 %v506_v12 }
  0x1b   :  { %275 = vmatpush1.bf16.msra.mxu0 %v508_v14  ;;  %478 = vmatpush1.bf16.msra.mxu1 %v508_v14 }
  0x1c   :  { %276 = vmatprep.subr.bf16.mxu0 %v509_v16  ;;  %463 = vmatprep.subr.bf16.mxu1 %v509_v16 }
  0x1f   :  { %277 = vmatpush1.bf16.msra.mxu0 %v511_v17  ;;  %479 = vmatpush1.bf16.msra.mxu1 %v511_v17 }
  0x20   :  { %278 = vmatprep.subr.bf16.mxu0 %v512_v18  ;;  %464 = vmatprep.subr.bf16.mxu1 %v512_v18 }
  0x23   :  { %279 = vmatpush2.bf16.msra.mxu0 %v514_v19  ;;  %480 = vmatpush2.bf16.msra.mxu1 %v514_v19 }
  0x24   :  { %280 = vmatprep.subr.bf16.mxu0 %v515_v20  ;;  %465 = vmatprep.subr.bf16.mxu1 %v515_v20 }
  0x27   :  { %281 = vmatpush2.bf16.msra.mxu0 %v517_v21  ;;  %481 = vmatpush2.bf16.msra.mxu1 %v517_v21 }
  0x28   :  { %282 = vmatprep.subr.bf16.mxu0 %v518_v22  ;;  %466 = vmatprep.subr.bf16.mxu1 %v518_v22 }
  0x2b   :  { %283 = vmatpush2.bf16.msra.mxu0 %v520_v23  ;;  %482 = vmatpush2.bf16.msra.mxu1 %v520_v23 }
  0x2c   :  { %284 = vmatprep.subr.bf16.mxu0 %v521_v24  ;;  %467 = vmatprep.subr.bf16.mxu1 %v521_v24 }
  0x2f   :  { %285 = vmatpush2.bf16.msra.mxu0 %v523_v25  ;;  %483 = vmatpush2.bf16.msra.mxu1 %v523_v25 }
  0x30   :  { %286 = vmatprep.subr.bf16.mxu0 %v524_v26  ;;  %468 = vmatprep.subr.bf16.mxu1 %v524_v26 }
  0x33   :  { %287 = vmatpush2.bf16.msra.mxu0 %v526_v27  ;;  %484 = vmatpush2.bf16.msra.mxu1 %v526_v27 }
  0x34   :  { %288 = vmatprep.subr.bf16.mxu0 %v527_v28  ;;  %469 = vmatprep.subr.bf16.mxu1 %v527_v28 }
  0x37   :  { %289 = vmatpush2.bf16.msra.mxu0 %v529_v29  ;;  %485 = vmatpush2.bf16.msra.mxu1 %v529_v29 }
  0x38   :  { %290 = vmatprep.subr.bf16.mxu0 %v530_v30  ;;  %470 = vmatprep.subr.bf16.mxu1 %v530_v30 }
  0x3b   :  { %291 = vmatpush2.bf16.msra.mxu0 %v532_v31  ;;  %486 = vmatpush2.bf16.msra.mxu1 %v532_v31 }
  0x3c   :  { %292 = vmatprep.subr.bf16.mxu0 %v533_v32  ;;  %471 = vmatprep.subr.bf16.mxu1 %v533_v32 }
  0x3f   :  { %293 = vmatpush2.bf16.msra.mxu0 %v535_v33  ;;  %487 = vmatpush2.bf16.msra.mxu1 %v535_v33 }
  0x42   :  { %295 = vmatmul.mubr.bf16.vlgmr.msra.gmra.mxu0 %v536_v35  ;;  %315 = vmatmul.mubr.bf16.vlgmr.msra.gmra.mxu1 %v539_v36 }
  0x43   :  { %304 = vmatprep.mubr.bf16.mxu0 %v542_v37  ;;  %324 = vmatprep.mubr.bf16.mxu1 %v409_v38 }
  0x4a   :  { %305 = vmatmul.mubr.bf16.gmra.mxu0 %v545_v39  ;;  %325 = vmatmul.mubr.bf16.gmra.mxu1 %v408_v40 }
 0x102   :  { %v296_v48 = vpop.f32.mrf.mxu0  ;;  %v316_v49 = vpop.f32.mrf.mxu1 }
 0x103   :  { %v297_v50 = vadd.f32 %v296_v48, %v58_v46  ;;  %v317_v51 = vadd.f32 %v316_v49, %v58_v46 }
 0x104   :  { %v298_v52 = vpop.f32.mrf.mxu0  ;;  %v318_v53 = vpop.f32.mrf.mxu1 }
 0x105   :  { %v341_v54 = vmax.f32 %v317_v51, 0.0  ;;  %v299_v55 = vadd.f32 %v298_v52, %v62_v47  ;;  %v319_v56 = vadd.f32 %v318_v53, %v62_v47  ;;  %v333_v59 = vmax.f32 %v297_v50, 0.0 }
 0x106   :  { %v300_v57 = vpop.f32.mrf.mxu0  ;;  %v320_v58 = vpop.f32.mrf.mxu1 }
 0x107   :  { %v334_v60 = vmax.f32 %v299_v55, 0.0  ;;  %v342_v61 = vmax.f32 %v319_v56, 0.0  ;;  %v301_v62 = vadd.f32 %v300_v57, %v58_v46  ;;  %v321_v63 = vadd.f32 %v320_v58, %v58_v46 }
 0x108   :  { %v302_v0 = vpop.f32.mrf.mxu0  ;;  %v322_v1 = vpop.f32.mrf.mxu1 }
 0x109   :  { %v449_v2 = vpack.c.bf16 %v334_v60, %v333_v59  ;;  %v453_v3 = vpack.c.bf16 %v342_v61, %v341_v54  ;;  %v303_v4 = vadd.f32 %v302_v0, %v62_v47  ;;  %v323_v5 = vadd.f32 %v322_v1, %v62_v47 }
 0x10a   :  { %v306_v6 = vpop.f32.mrf.mxu0  ;;  %v326_v7 = vpop.f32.mrf.mxu1  ;;  %v335_v10 = vmax.f32 %v301_v62, 0.0  ;;  %v343_v11 = vmax.f32 %v321_v63, 0.0 }
 0x10b   :  { %391 = vst [vmem:[%s711_s3] sm:$0xff] %v449_v2  ;;  %395 = vst [vmem:[%s711_s3 + $0x20] sm:$0xff] %v453_v3  ;;  %v307_v8 = vadd.f32 %v306_v6, %v58_v46  ;;  %v327_v9 = vadd.f32 %v326_v7, %v58_v46  ;;  %v336_v12 = vmax.f32 %v303_v4, 0.0  ;;  %v344_v13 = vmax.f32 %v323_v5, 0.0 }
 0x10c   :  { %v308_v14 = vpop.f32.mrf.mxu0  ;;  %v328_v15 = vpop.f32.mrf.mxu1 }
 0x10d   :  { %v345_v16 = vmax.f32 %v327_v9, 0.0  ;;  %v309_v17 = vadd.f32 %v308_v14, %v62_v47  ;;  %v329_v18 = vadd.f32 %v328_v15, %v62_v47  ;;  %v450_v19 = vpack.c.bf16 %v336_v12, %v335_v10 }
 0x10e   :  { %v454_v20 = vpack.c.bf16 %v344_v13, %v343_v11  ;;  %v310_v21 = vpop.f32.mrf.mxu0  ;;  %v330_v22 = vpop.f32.mrf.mxu1  ;;  %v337_v23 = vmax.f32 %v307_v8, 0.0 }
 0x10f   :  { %v338_v24 = vmax.f32 %v309_v17, 0.0  ;;  %v346_v25 = vmax.f32 %v329_v18, 0.0  ;;  %v311_v26 = vadd.f32 %v310_v21, %v58_v46  ;;  %392 = vst [vmem:[%s711_s3 + $0x8] sm:$0xff] %v450_v19 }
 0x110   :  { %396 = vst [vmem:[%s711_s3 + $0x28] sm:$0xff] %v454_v20  ;;  %v312_v27 = vpop.f32.mrf.mxu0  ;;  %v331_v28 = vpop.f32.mrf.mxu1 }
 0x111   :  { %v451_v29 = vpack.c.bf16 %v338_v24, %v337_v23  ;;  %v455_v30 = vpack.c.bf16 %v346_v25, %v345_v16  ;;  %v313_v31 = vadd.f32 %v312_v27, %v62_v47  ;;  %v339_v32 = vmax.f32 %v311_v26, 0.0 }
 0x113   :  { %393 = vst [vmem:[%s711_s3 + $0x10] sm:$0xff] %v451_v29  ;;  %397 = vst [vmem:[%s711_s3 + $0x30] sm:$0x11] %v455_v30  ;;  %v340_v33 = vmax.f32 %v313_v31, 0.0 }
 0x115   :  { %v452_v34 = vpack.c.bf16 %v340_v33, %v339_v32 }
 0x117   :  { %394 = vst [vmem:[%s711_s3 + $0x18] sm:$0xff] %v452_v34 }

// kernel: ssidvae_forward.21
= control target key start
LH: loop header
LB: loop body
LE: loop exit
PB: predicated region body
PF: predicated region fallthrough
CT: control target
= control target key end

     0   :  { %s1005_s1 = inlined_call_operand.vmem [shape: bf16[256,128], index: 1, kind: input, shape index: {}]   ;;  %s1006_s0 = inlined_call_operand.vmem [shape: bf16[162,256], index: 0, kind: input, shape index: {}]   ;;  %s1007_s2 = inlined_call_operand.vmem [shape: f32[1,128], index: 2, kind: input, shape index: {}]   ;;  %s1008_s3 = inlined_call_operand.vmem [shape: bf16[162,128], index: 3, kind: output, shape index: {}]  }
   0x1   :  { %v767_v0 = vld [vmem:[%s1005_s1 + $0x78] sm:$0xff]   ;;  %v769_v2 = vld [vmem:[%s1005_s1 + $0x70] sm:$0xff]   ;;  %v771_v4 = vld [vmem:[%s1005_s1 + $0x68] sm:$0xff]  }
   0x2   :  { %v768_v1 = vld [vmem:[%s1005_s1 + $0x38] sm:$0xff]   ;;  %669 = vmatprep.subr.bf16.mxu0 %v767_v0  ;;  %751 = vmatprep.subr.bf16.mxu1 %v767_v0  ;;  %v770_v3 = vld [vmem:[%s1005_s1 + $0x30] sm:$0xff]   ;;  %v772_v5 = vld [vmem:[%s1005_s1 + $0x28] sm:$0xff]  }
   0x3   :  { %670 = vmatpush3.bf16.msra.mxu0 %v768_v1  ;;  %759 = vmatpush3.bf16.msra.mxu1 %v768_v1  ;;  %v773_v6 = vld [vmem:[%s1005_s1 + $0x60] sm:$0xff]   ;;  %v775_v8 = vld [vmem:[%s1005_s1 + $0x58] sm:$0xff]   ;;  %v777_v10 = vld [vmem:[%s1005_s1 + $0x50] sm:$0xff]  }
   0x4   :  { %671 = vmatprep.subr.bf16.mxu0 %v769_v2  ;;  %752 = vmatprep.subr.bf16.mxu1 %v769_v2  ;;  %v774_v7 = vld [vmem:[%s1005_s1 + $0x20] sm:$0xff]   ;;  %v776_v9 = vld [vmem:[%s1005_s1 + $0x18] sm:$0xff]   ;;  %v778_v13 = vld [vmem:[%s1005_s1 + $0x10] sm:$0xff]  }
   0x5   :  { %v785_v11 = vld [vmem:[%s1006_s0 + $0x4] ss:$8 sps:$4 sm:$0xff]   ;;  %v783_v18 = vld [vmem:[%s1006_s0] ss:$8 sps:$4 sm:$0xff]   ;;  %v789_v20 = vld [vmem:[%s1006_s0 + $0x14] ss:$8 sps:$4 sm:$0xff]  }
   0x6   :  { %v788_v12 = vld [vmem:[%s1006_s0 + $0x64] ss:$8 sps:$4 sm:$0xff]   ;;  %310 = vmatprep.mubr.bf16.mxu0 %v785_v11  ;;  %v786_v19 = vld [vmem:[%s1006_s0 + $0x60] ss:$8 sps:$4 sm:$0xff]   ;;  %v792_v21 = vld [vmem:[%s1006_s0 + $0x74] ss:$8 sps:$4 sm:$0xff]  }
   0x7   :  { %672 = vmatpush3.bf16.msra.mxu0 %v770_v3  ;;  %760 = vmatpush3.bf16.msra.mxu1 %v770_v3  ;;  %v779_v14 = vld [vmem:[%s1005_s1 + $0x48] sm:$0xff]   ;;  %v781_v16 = vld [vmem:[%s1005_s1 + $0x40] sm:$0xff]   ;;  %v791_v22 = vld [vmem:[%s1006_s0 + $0x10] ss:$8 sps:$4 sm:$0xff]  }
   0x8   :  { %673 = vmatprep.subr.bf16.mxu0 %v771_v4  ;;  %753 = vmatprep.subr.bf16.mxu1 %v771_v4  ;;  %v780_v15 = vld [vmem:[%s1005_s1 + $0x8] sm:$0xff]   ;;  %v782_v17 = vld [vmem:[%s1005_s1] sm:$0xff]   ;;  %v794_v23 = vld [vmem:[%s1006_s0 + $0x70] ss:$8 sps:$4 sm:$0xff]  }
   0x9   :  { %358 = vmatprep.mubr.bf16.mxu1 %v788_v12  ;;  %v795_v24 = vld [vmem:[%s1006_s0 + $0x24] ss:$8 sps:$4 sm:$0xff]   ;;  %v797_v26 = vld [vmem:[%s1006_s0 + $0x20] ss:$8 sps:$4 sm:$0xff]   ;;  %v801_v28 = vld [vmem:[%s1006_s0 + $0x34] ss:$8 sps:$4 sm:$0xff]  }
   0xa   :  { %v798_v25 = vld [vmem:[%s1006_s0 + $0x84] ss:$8 sps:$4 sm:$0xff]   ;;  %v800_v27 = vld [vmem:[%s1006_s0 + $0x80] ss:$8 sps:$4 sm:$0xff]   ;;  %v804_v29 = vld [vmem:[%s1006_s0 + $0x94] ss:$8 sps:$4 sm:$0xff]  }
   0xb   :  { %674 = vmatpush3.bf16.msra.mxu0 %v772_v5  ;;  %761 = vmatpush3.bf16.msra.mxu1 %v772_v5  ;;  %v35_v30 = vld [vmem:[%s1006_s0 + $0xa0] sm:$0x11]  ;;  %v803_v31 = vld [vmem:[%s1006_s0 + $0x30] ss:$8 sps:$4 sm:$0xff]   ;;  %v812_v37 = vld [vmem:[%s1006_s0 + $0x54] ss:$8 sps:$4 sm:$0xff]  }
   0xc   :  { %675 = vmatprep.subr.bf16.mxu0 %v773_v6  ;;  %754 = vmatprep.subr.bf16.mxu1 %v773_v6  ;;  %v806_v32 = vld [vmem:[%s1006_s0 + $0x90] ss:$8 sps:$4 sm:$0xff]   ;;  %v807_v33 = vld [vmem:[%s1006_s0 + $0x44] ss:$8 sps:$4 sm:$0xff]   ;;  %v551_v34 = vcombine.high %v35_v30, %v35_v30  ;;  %v809_v35 = vld [vmem:[%s1006_s0 + $0x40] ss:$8 sps:$4 sm:$0xff]   ;;  %v550_v36 = vcombine.low %v35_v30, %v35_v30 }
   0xd   :  { %v814_v38 = vld [vmem:[%s1006_s0 + $0x50] ss:$8 sps:$4 sm:$0xff]   ;;  %v949_v43 = vld [vmem:[%s1007_s2] ss:$0 sm:$0xff] }
   0xf   :  { %676 = vmatpush3.bf16.msra.mxu0 %v774_v7  ;;  %762 = vmatpush3.bf16.msra.mxu1 %v774_v7 }
  0x10   :  { %677 = vmatprep.subr.bf16.mxu0 %v775_v8  ;;  %755 = vmatprep.subr.bf16.mxu1 %v775_v8 }
  0x13   :  { %678 = vmatpush3.bf16.msra.mxu0 %v776_v9  ;;  %763 = vmatpush3.bf16.msra.mxu1 %v776_v9 }
  0x14   :  { %679 = vmatprep.subr.bf16.mxu0 %v777_v10  ;;  %756 = vmatprep.subr.bf16.mxu1 %v777_v10 }
  0x17   :  { %680 = vmatpush3.bf16.msra.mxu0 %v778_v13  ;;  %764 = vmatpush3.bf16.msra.mxu1 %v778_v13 }
  0x18   :  { %681 = vmatprep.subr.bf16.mxu0 %v779_v14  ;;  %757 = vmatprep.subr.bf16.mxu1 %v779_v14 }
  0x1b   :  { %682 = vmatpush3.bf16.msra.mxu0 %v780_v15  ;;  %765 = vmatpush3.bf16.msra.mxu1 %v780_v15 }
  0x1c   :  { %683 = vmatprep.subr.bf16.mxu0 %v781_v16  ;;  %758 = vmatprep.subr.bf16.mxu1 %v781_v16 }
  0x1f   :  { %684 = vmatpush3.bf16.msra.mxu0 %v782_v17  ;;  %766 = vmatpush3.bf16.msra.mxu1 %v782_v17 }
  0x22   :  { %311 = vmatmul.mubr.bf16.vlgmr.msra.gmra.mxu0 %v783_v18  ;;  %359 = vmatmul.mubr.bf16.vlgmr.msra.gmra.mxu1 %v786_v19 }
  0x23   :  { %318 = vmatprep.mubr.bf16.mxu0 %v789_v20  ;;  %366 = vmatprep.mubr.bf16.mxu1 %v792_v21 }
  0x2a   :  { %319 = vmatmul.mubr.bf16.gmra.mxu0 %v791_v22  ;;  %367 = vmatmul.mubr.bf16.gmra.mxu1 %v794_v23 }
  0x2b   :  { %326 = vmatprep.mubr.bf16.mxu0 %v795_v24  ;;  %374 = vmatprep.mubr.bf16.mxu1 %v798_v25 }
  0x32   :  { %327 = vmatmul.mubr.bf16.gmra.mxu0 %v797_v26  ;;  %375 = vmatmul.mubr.bf16.gmra.mxu1 %v800_v27 }
  0x33   :  { %334 = vmatprep.mubr.bf16.mxu0 %v801_v28  ;;  %382 = vmatprep.mubr.bf16.mxu1 %v804_v29 }
  0x3a   :  { %335 = vmatmul.mubr.bf16.gmra.mxu0 %v803_v31  ;;  %383 = vmatmul.mubr.bf16.gmra.mxu1 %v806_v32 }
  0x3b   :  { %342 = vmatprep.mubr.bf16.mxu0 %v807_v33  ;;  %390 = vmatprep.mubr.bf16.mxu1 %v551_v34 }
  0x42   :  { %343 = vmatmul.mubr.bf16.gmra.mxu0 %v809_v35  ;;  %391 = vmatmul.mubr.bf16.gmra.mxu1 %v550_v36 }
  0x43   :  { %350 = vmatprep.mubr.bf16.mxu0 %v812_v37 }
  0x4a   :  { %351 = vmatmul.mubr.bf16.gmra.mxu0 %v814_v38 }
  0xe2   :  { %v685_v39 = vpop.f32.mrf.mxu0  ;;  %v721_v40 = vpop.f32.mrf.mxu1 }
  0xe4   :  { %v686_v41 = vpop.f32.mrf.mxu0  ;;  %v722_v42 = vpop.f32.mrf.mxu1 }
  0xe5   :  { %v687_v44 = vadd.f32 %v686_v41, %v685_v39  ;;  %v723_v45 = vadd.f32 %v722_v42, %v721_v40 }
  0xe6   :  { %v688_v46 = vpop.f32.mrf.mxu0  ;;  %v724_v47 = vpop.f32.mrf.mxu1 }
  0xe7   :  { %v361_v48 = vadd.f32 %v723_v45, %v949_v43  ;;  %v313_v49 = vadd.f32 %v687_v44, %v949_v43 }
  0xe8   :  { %v689_v50 = vpop.f32.mrf.mxu0  ;;  %v725_v51 = vpop.f32.mrf.mxu1 }
  0xe9   :  { %v690_v52 = vadd.f32 %v689_v50, %v688_v46  ;;  %v726_v53 = vadd.f32 %v725_v51, %v724_v47  ;;  %v410_v57 = vmax.f32 %v361_v48, 0.0  ;;  %v398_v59 = vmax.f32 %v313_v49, 0.0 }
  0xea   :  { %v691_v54 = vpop.f32.mrf.mxu0  ;;  %v727_v55 = vpop.f32.mrf.mxu1 }
  0xeb   :  { %v316_v56 = vadd.f32 %v690_v52, %v949_v43  ;;  %v364_v58 = vadd.f32 %v726_v53, %v949_v43 }
  0xec   :  { %v692_v60 = vpop.f32.mrf.mxu0  ;;  %v728_v61 = vpop.f32.mrf.mxu1 }
  0xed   :  { %v399_v62 = vmax.f32 %v316_v56, 0.0  ;;  %v693_v63 = vadd.f32 %v692_v60, %v691_v54  ;;  %v411_v0 = vmax.f32 %v364_v58, 0.0  ;;  %v729_v1 = vadd.f32 %v728_v61, %v727_v55 }
  0xee   :  { %v694_v2 = vpop.f32.mrf.mxu0  ;;  %v730_v3 = vpop.f32.mrf.mxu1 }
  0xef   :  { %v613_v4 = vpack.c.bf16 %v399_v62, %v398_v59  ;;  %v643_v5 = vpack.c.bf16 %v411_v0, %v410_v57  ;;  %v369_v6 = vadd.f32 %v729_v1, %v949_v43  ;;  %v321_v7 = vadd.f32 %v693_v63, %v949_v43 }
  0xf0   :  { %v695_v8 = vpop.f32.mrf.mxu0  ;;  %v731_v9 = vpop.f32.mrf.mxu1 }
  0xf1   :  { %614 = vst [vmem:[%s1008_s3] sm:$0xff] %v613_v4   ;;  %665 = vst [vmem:[%s1008_s3 + $0x30] sm:$0xff] %v643_v5   ;;  %v696_v10 = vadd.f32 %v695_v8, %v694_v2  ;;  %v732_v11 = vadd.f32 %v731_v9, %v730_v3  ;;  %v412_v15 = vmax.f32 %v369_v6, 0.0  ;;  %v400_v17 = vmax.f32 %v321_v7, 0.0 }
  0xf2   :  { %v697_v12 = vpop.f32.mrf.mxu0  ;;  %v733_v13 = vpop.f32.mrf.mxu1 }
  0xf3   :  { %v324_v14 = vadd.f32 %v696_v10, %v949_v43  ;;  %v372_v16 = vadd.f32 %v732_v11, %v949_v43 }
  0xf4   :  { %v698_v18 = vpop.f32.mrf.mxu0  ;;  %v734_v19 = vpop.f32.mrf.mxu1 }
  0xf5   :  { %v401_v20 = vmax.f32 %v324_v14, 0.0  ;;  %v699_v21 = vadd.f32 %v698_v18, %v697_v12  ;;  %v413_v22 = vmax.f32 %v372_v16, 0.0  ;;  %v735_v23 = vadd.f32 %v734_v19, %v733_v13 }
  0xf6   :  { %v700_v24 = vpop.f32.mrf.mxu0  ;;  %v736_v25 = vpop.f32.mrf.mxu1 }
  0xf7   :  { %v618_v26 = vpack.c.bf16 %v401_v20, %v400_v17  ;;  %v648_v27 = vpack.c.bf16 %v413_v22, %v412_v15  ;;  %v377_v28 = vadd.f32 %v735_v23, %v949_v43  ;;  %v329_v29 = vadd.f32 %v699_v21, %v949_v43 }
  0xf8   :  { %v701_v30 = vpop.f32.mrf.mxu0  ;;  %v737_v31 = vpop.f32.mrf.mxu1 }
  0xf9   :  { %660 = vst [vmem:[%s1008_s3 + $0x8] sm:$0xff] %v618_v26   ;;  %666 = vst [vmem:[%s1008_s3 + $0x38] sm:$0xff] %v648_v27   ;;  %v702_v32 = vadd.f32 %v701_v30, %v700_v24  ;;  %v738_v33 = vadd.f32 %v737_v31, %v736_v25  ;;  %v414_v37 = vmax.f32 %v377_v28, 0.0  ;;  %v402_v39 = vmax.f32 %v329_v29, 0.0 }
  0xfa   :  { %v703_v34 = vpop.f32.mrf.mxu0  ;;  %v739_v35 = vpop.f32.mrf.mxu1 }
  0xfb   :  { %v332_v36 = vadd.f32 %v702_v32, %v949_v43  ;;  %v380_v38 = vadd.f32 %v738_v33, %v949_v43 }
  0xfc   :  { %v704_v40 = vpop.f32.mrf.mxu0  ;;  %v740_v41 = vpop.f32.mrf.mxu1 }
  0xfd   :  { %v403_v42 = vmax.f32 %v332_v36, 0.0  ;;  %v705_v44 = vadd.f32 %v704_v40, %v703_v34  ;;  %v415_v45 = vmax.f32 %v380_v38, 0.0  ;;  %v741_v46 = vadd.f32 %v740_v41, %v739_v35 }
  0xfe   :  { %v706_v47 = vpop.f32.mrf.mxu0  ;;  %v742_v48 = vpop.f32.mrf.mxu1 }
  0xff   :  { %v623_v49 = vpack.c.bf16 %v403_v42, %v402_v39  ;;  %v653_v50 = vpack.c.bf16 %v415_v45, %v414_v37  ;;  %v385_v51 = vadd.f32 %v741_v46, %v949_v43  ;;  %v337_v52 = vadd.f32 %v705_v44, %v949_v43 }
 0x100   :  { %v707_v53 = vpop.f32.mrf.mxu0  ;;  %v743_v54 = vpop.f32.mrf.mxu1 }
 0x101   :  { %661 = vst [vmem:[%s1008_s3 + $0x10] sm:$0xff] %v623_v49   ;;  %667 = vst [vmem:[%s1008_s3 + $0x40] sm:$0xff] %v653_v50   ;;  %v708_v55 = vadd.f32 %v707_v53, %v706_v47  ;;  %v744_v56 = vadd.f32 %v743_v54, %v742_v48  ;;  %v416_v60 = vmax.f32 %v385_v51, 0.0  ;;  %v404_v62 = vmax.f32 %v337_v52, 0.0 }
 0x102   :  { %v709_v57 = vpop.f32.mrf.mxu0  ;;  %v745_v58 = vpop.f32.mrf.mxu1 }
 0x103   :  { %v340_v59 = vadd.f32 %v708_v55, %v949_v43  ;;  %v388_v61 = vadd.f32 %v744_v56, %v949_v43 }
 0x104   :  { %v710_v63 = vpop.f32.mrf.mxu0  ;;  %v746_v0 = vpop.f32.mrf.mxu1 }
 0x105   :  { %v405_v1 = vmax.f32 %v340_v59, 0.0  ;;  %v711_v2 = vadd.f32 %v710_v63, %v709_v57  ;;  %v417_v3 = vmax.f32 %v388_v61, 0.0  ;;  %v747_v4 = vadd.f32 %v746_v0, %v745_v58 }
 0x106   :  { %v712_v5 = vpop.f32.mrf.mxu0  ;;  %v748_v6 = vpop.f32.mrf.mxu1 }
 0x107   :  { %v628_v7 = vpack.c.bf16 %v405_v1, %v404_v62  ;;  %v658_v8 = vpack.c.bf16 %v417_v3, %v416_v60  ;;  %v393_v9 = vadd.f32 %v747_v4, %v949_v43  ;;  %v345_v12 = vadd.f32 %v711_v2, %v949_v43 }
 0x108   :  { %v713_v10 = vpop.f32.mrf.mxu0  ;;  %v749_v11 = vpop.f32.mrf.mxu1 }
 0x109   :  { %662 = vst [vmem:[%s1008_s3 + $0x18] sm:$0xff] %v628_v7   ;;  %668 = vst [vmem:[%s1008_s3 + $0x48] sm:$0xff] %v658_v8   ;;  %v714_v13 = vadd.f32 %v713_v10, %v712_v5  ;;  %v418_v14 = vmax.f32 %v393_v9, 0.0  ;;  %v406_v19 = vmax.f32 %v345_v12, 0.0 }
 0x10a   :  { %v715_v15 = vpop.f32.mrf.mxu0 }
 0x10b   :  { %v348_v16 = vadd.f32 %v714_v13, %v949_v43  ;;  %v609_v17 = vpack.c.bf16 %v418_v14, %v418_v14 }
 0x10c   :  { %v716_v18 = vpop.f32.mrf.mxu0 }
 0x10d   :  { %v407_v20 = vmax.f32 %v348_v16, 0.0  ;;  %524 = vst [vmem:[%s1008_s3 + $0x50] sm:$0x1] %v609_v17  ;;  %v717_v21 = vadd.f32 %v716_v18, %v715_v15 }
 0x10e   :  { %v718_v22 = vpop.f32.mrf.mxu0 }
 0x10f   :  { %v633_v23 = vpack.c.bf16 %v407_v20, %v406_v19  ;;  %v353_v25 = vadd.f32 %v717_v21, %v949_v43 }
 0x110   :  { %v719_v24 = vpop.f32.mrf.mxu0 }
 0x111   :  { %663 = vst [vmem:[%s1008_s3 + $0x20] sm:$0xff] %v633_v23   ;;  %v720_v26 = vadd.f32 %v719_v24, %v718_v22  ;;  %v408_v28 = vmax.f32 %v353_v25, 0.0 }
 0x113   :  { %v356_v27 = vadd.f32 %v720_v26, %v949_v43 }
 0x115   :  { %v409_v29 = vmax.f32 %v356_v27, 0.0 }
 0x117   :  { %v638_v30 = vpack.c.bf16 %v409_v29, %v408_v28 }
 0x119   :  { %664 = vst [vmem:[%s1008_s3 + $0x28] sm:$0xff] %v638_v30  }

// kernel: ssidvae_forward.22
= control target key start
LH: loop header
LB: loop body
LE: loop exit
PB: predicated region body
PF: predicated region fallthrough
CT: control target
= control target key end

     0   :  { %s1604_s12 = smov 0   ;;  %s1606_s13 = smov 0   ;;  %s1874_s0 = inlined_call_operand.vmem [shape: bf16[578,128], index: 0, kind: input, shape index: {}]   ;;  %s1875_s1 = inlined_call_operand.vmem [shape: bf16[128,128], index: 1, kind: input, shape index: {}]   ;;  %s1876_s2 = inlined_call_operand.vmem [shape: f32[1,128], index: 2, kind: input, shape index: {}]   ;;  %s1877_s3 = inlined_call_operand.vmem [shape: bf16[578,128], index: 3, kind: output, shape index: {}]  }
   0x1   :  { %s1608_s14 = smov 0  }
   0x2 LB: > { %s1617_s15 = sadd.s32 4294967295, %s1550_s14   ;;  %s1619_s16 = sadd.s32 1, %s1550_s14   ;;  %s1550_s14 = sphi %s1608_s14, %s1884_s14   ;;  %s1546_s13 = sphi %s1606_s13, %s1883_s13   ;;  %s1542_s12 = sphi %s1604_s12, %s1882_s12  }
   0x3   : > { %s85_s17 = ssub.s32 %s1550_s14, %s1619_s16  ;;  %s88_s18 = sadd.s32 1, %s1546_s13 }
   0x4   : > { %p86_p0 = scmp.eq.s32.totalorder %s85_s17, 0  ;;  %p98_p1 = scmp.ne.s32.totalorder %s1546_s13, %s1542_s12 }
   0x5   : > { %p99_p2 = scmp.eq.s32.totalorder %s1617_s15, 2  ;;  %p1088_p3 = scmp.ge.s32.totalorder %s1550_s14, 1 }
   0x6   : > { %s1627_s19 = scalar_select %p86_p0, %s1546_s13, %s88_s18  }
   0x7   : > { %p1629_p4 = por %p99_p2, %p98_p1  ;;  %p146_p5 = scmp.lt.s32.totalorder %s1550_s14, 4 }
   0x9   : > { %p147_p6 = pnand %p1088_p3, %p146_p5 }
   0xa   : > { %s1637_s23 = sshll.u32 (!%p147_p6), %s1617_s15, 5  ;;  %s170_s25 = sand.u32 (!%p147_p6), 1, %s1542_s12  }
   0xb   : > { %150 = sbr.rel (%p147_p6) target bundleno = 339 (0x153), region = 32  ;;  %p178_p7 = scmp.lt.s32.totalorder (!%p147_p6), %s1637_s23, 72 }
  0x10   : > { %v1472_v0 = vld [vmem:[%s1875_s1 + $0x38] sm:$0xff]   ;;  %v1473_v1 = vld [vmem:[%s1875_s1 + $0x30] sm:$0xff]   ;;  %s179_s26 = scalar_select %p178_p7, %s1637_s23, 72  ;;  %v1474_v2 = vld [vmem:[%s1875_s1 + $0x28] sm:$0xff]  }
  0x11   : > { %1320 = vmatprep.subr.bf16.mxu0 %v1472_v0  ;;  %1368 = vmatprep.subr.bf16.mxu1 %v1472_v0  ;;  %v1475_v3 = vld [vmem:[%s1875_s1 + $0x20] sm:$0xff]   ;;  %v1476_v6 = vld [vmem:[%s1875_s1 + $0x18] sm:$0xff]   ;;  %v1477_v7 = vld [vmem:[%s1875_s1 + $0x10] sm:$0xff]   ;;  %s753_s27 = ssub.s32 (%p1629_p4), 73, %s1637_s23  ;;  %s1198_s28 = sshll.u32 (%p1629_p4), %s1617_s15, 7 }
  0x12   : > { %1321 = vmatpush3.bf16.msra.mxu0 %v1472_v0  ;;  %1376 = vmatpush3.bf16.msra.mxu1 %v1472_v0  ;;  %s1091_s29 = sshll.u32 %s179_s26, 2  ;;  %v1478_v8 = vld [vmem:[%s1875_s1 + $0x8] sm:$0xff]   ;;  %v1479_v9 = vld [vmem:[%s1875_s1] sm:$0xff]   ;;  %s1089_s26 = sshll.u32 %s170_s25, 7 }
  0x13   : > { %1322 = vmatprep.subr.bf16.mxu0 %v1473_v1  ;;  %1369 = vmatprep.subr.bf16.mxu1 %v1473_v1  ;;  %s1650_s5 = scalar_lea.vmem %s1874_s0, %s1091_s29  ;;  %v1686_v24 = vld [vmem:[%s1876_s2] ss:$0 sm:$0xff]  ;;  %s1699_s12 = scalar_lea.vmem [#allocation2], %s1089_s26  }
  0x14   : > { %v1480_v4 = vld [vmem:[%s1650_s5] sm:$0xff]   ;;  %v1482_v10 = vld [vmem:[%s1650_s5 + $0x8] sm:$0xff]   ;;  %v1484_v12 = vld [vmem:[%s1650_s5 + $0x10] sm:$0xff]   ;;  %p754_p8 = scmp.lt.s32.totalorder (%p1629_p4), %s753_s27, 32  ;;  %s1746_s4 = scalar_lea.vmem (%p1629_p4), %s1877_s3, %s1198_s28  }
  0x15   : > { %v1481_v5 = vld [vmem:[%s1650_s5 + $0x40] sm:$0xff]   ;;  %1336 = vmatprep.mubr.bf16.mxu0 %v1480_v4  ;;  %v1483_v11 = vld [vmem:[%s1650_s5 + $0x48] sm:$0xff]   ;;  %v1485_v13 = vld [vmem:[%s1650_s5 + $0x50] sm:$0xff]  }
  0x16   : > { %1323 = vmatpush3.bf16.msra.mxu0 %v1473_v1  ;;  %1377 = vmatpush3.bf16.msra.mxu1 %v1473_v1  ;;  %v1486_v14 = vld [vmem:[%s1650_s5 + $0x18] sm:$0xff]   ;;  %v1488_v16 = vld [vmem:[%s1650_s5 + $0x20] sm:$0xff]   ;;  %v1490_v18 = vld [vmem:[%s1650_s5 + $0x28] sm:$0xff]  }
  0x17   : > { %1324 = vmatprep.subr.bf16.mxu0 %v1474_v2  ;;  %1370 = vmatprep.subr.bf16.mxu1 %v1474_v2  ;;  %v1487_v15 = vld [vmem:[%s1650_s5 + $0x58] sm:$0xff]   ;;  %v1489_v17 = vld [vmem:[%s1650_s5 + $0x60] sm:$0xff]   ;;  %v1491_v19 = vld [vmem:[%s1650_s5 + $0x68] sm:$0xff]  }
  0x18   : > { %1352 = vmatprep.mubr.bf16.mxu1 %v1481_v5  ;;  %v1492_v20 = vld [vmem:[%s1650_s5 + $0x30] sm:$0xff]   ;;  %v1494_v22 = vld [vmem:[%s1650_s5 + $0x38] sm:$0xff]  }
  0x19   : > { %v1493_v21 = vld [vmem:[%s1650_s5 + $0x70] sm:$0xff]   ;;  %v1495_v23 = vld [vmem:[%s1650_s5 + $0x78] sm:$0xff]  }
  0x1a   : > { %1325 = vmatpush3.bf16.msra.mxu0 %v1474_v2  ;;  %1378 = vmatpush3.bf16.msra.mxu1 %v1474_v2 }
  0x1b   : > { %1326 = vmatprep.subr.bf16.mxu0 %v1475_v3  ;;  %1371 = vmatprep.subr.bf16.mxu1 %v1475_v3 }
  0x1e   : > { %1327 = vmatpush3.bf16.msra.mxu0 %v1475_v3  ;;  %1379 = vmatpush3.bf16.msra.mxu1 %v1475_v3 }
  0x1f   : > { %1328 = vmatprep.subr.bf16.mxu0 %v1476_v6  ;;  %1372 = vmatprep.subr.bf16.mxu1 %v1476_v6 }
  0x22   : > { %1329 = vmatpush3.bf16.msra.mxu0 %v1476_v6  ;;  %1380 = vmatpush3.bf16.msra.mxu1 %v1476_v6 }
  0x23   : > { %1330 = vmatprep.subr.bf16.mxu0 %v1477_v7  ;;  %1373 = vmatprep.subr.bf16.mxu1 %v1477_v7 }
  0x26   : > { %1331 = vmatpush3.bf16.msra.mxu0 %v1477_v7  ;;  %1381 = vmatpush3.bf16.msra.mxu1 %v1477_v7 }
  0x27   : > { %1332 = vmatprep.subr.bf16.mxu0 %v1478_v8  ;;  %1374 = vmatprep.subr.bf16.mxu1 %v1478_v8 }
  0x2a   : > { %1333 = vmatpush3.bf16.msra.mxu0 %v1478_v8  ;;  %1382 = vmatpush3.bf16.msra.mxu1 %v1478_v8 }
  0x2b   : > { %1334 = vmatprep.subr.bf16.mxu0 %v1479_v9  ;;  %1375 = vmatprep.subr.bf16.mxu1 %v1479_v9 }
  0x2e   : > { %1335 = vmatpush3.bf16.msra.mxu0 %v1479_v9  ;;  %1383 = vmatpush3.bf16.msra.mxu1 %v1479_v9 }
  0x31   : > { %1337 = vmatmul.mubr.bf16.vlgmr.msra.gmra.mxu0 %v1482_v10  ;;  %1353 = vmatmul.mubr.bf16.vlgmr.msra.gmra.mxu1 %v1483_v11 }
  0x32   : > { %1340 = vmatprep.mubr.bf16.mxu0 %v1484_v12  ;;  %1356 = vmatprep.mubr.bf16.mxu1 %v1485_v13 }
  0x39   : > { %1341 = vmatmul.mubr.bf16.gmra.mxu0 %v1486_v14  ;;  %1357 = vmatmul.mubr.bf16.gmra.mxu1 %v1487_v15 }
  0x3a   : > { %1344 = vmatprep.mubr.bf16.mxu0 %v1488_v16  ;;  %1360 = vmatprep.mubr.bf16.mxu1 %v1489_v17 }
  0x41   : > { %1345 = vmatmul.mubr.bf16.gmra.mxu0 %v1490_v18  ;;  %1361 = vmatmul.mubr.bf16.gmra.mxu1 %v1491_v19 }
  0x42   : > { %1348 = vmatprep.mubr.bf16.mxu0 %v1492_v20  ;;  %1364 = vmatprep.mubr.bf16.mxu1 %v1493_v21 }
  0x49   : > { %1349 = vmatmul.mubr.bf16.gmra.mxu0 %v1494_v22  ;;  %1365 = vmatmul.mubr.bf16.gmra.mxu1 %v1495_v23 }
  0xf1   : > { %v1338_v25 = vpop.f32.mrf.mxu0  ;;  %v1354_v26 = vpop.f32.mrf.mxu1 }
  0xf2   : > { %v435_v27 = vadd.f32 %v1338_v25, %v1686_v24  ;;  %v499_v28 = vadd.f32 %v1354_v26, %v1686_v24 }
  0xf3   : > { %v426_v29 = vpop.f32.mrf.mxu0  ;;  %v490_v30 = vpop.f32.mrf.mxu1 }
  0xf4   : > { %v427_v31 = vadd.f32 %v1686_v24, %v426_v29  ;;  %v491_v32 = vadd.f32 %v1686_v24, %v490_v30  ;;  %v555_v37 = vmax.f32 %v435_v27, 0.0  ;;  %v571_v38 = vmax.f32 %v499_v28, 0.0 }
  0xf5   : > { %v1339_v33 = vpop.f32.mrf.mxu0  ;;  %v1355_v34 = vpop.f32.mrf.mxu1 }
  0xf6   : > { %v438_v35 = vadd.f32 %v1339_v33, %v1686_v24  ;;  %v502_v36 = vadd.f32 %v1355_v34, %v1686_v24  ;;  %v553_v45 = vmax.f32 %v427_v31, 0.0  ;;  %v569_v46 = vmax.f32 %v491_v32, 0.0 }
  0xf7   : > { %v429_v39 = vpop.f32.mrf.mxu0  ;;  %v493_v40 = vpop.f32.mrf.mxu1 }
  0xf8   : > { %v556_v41 = vmax.f32 %v438_v35, 0.0  ;;  %v572_v42 = vmax.f32 %v502_v36, 0.0  ;;  %v430_v43 = vadd.f32 %v1686_v24, %v429_v39  ;;  %v494_v44 = vadd.f32 %v1686_v24, %v493_v40 }
  0xf9   : > { %v1342_v47 = vpop.f32.mrf.mxu0  ;;  %v1358_v48 = vpop.f32.mrf.mxu1 }
  0xfa   : > { %v1209_v49 = vpack.c.bf16 %v556_v41, %v555_v37  ;;  %v1249_v50 = vpack.c.bf16 %v572_v42, %v571_v38  ;;  %v554_v51 = vmax.f32 %v430_v43, 0.0  ;;  %v570_v52 = vmax.f32 %v494_v44, 0.0 }
  0xfb   : > { %v451_v53 = vadd.f32 %v1342_v47, %v1686_v24  ;;  %v515_v54 = vadd.f32 %v1358_v48, %v1686_v24  ;;  %v442_v55 = vpop.f32.mrf.mxu0  ;;  %v506_v56 = vpop.f32.mrf.mxu1 }
  0xfc   : > { %1281 = vst [vmem:[%s1699_s12 + $0x8] sm:$0xff] %v1209_v49   ;;  %1289 = vst [vmem:[%s1699_s12 + $0x48] sm:$0xff] %v1249_v50   ;;  %v1204_v57 = vpack.c.bf16 %v554_v51, %v553_v45  ;;  %v1244_v58 = vpack.c.bf16 %v570_v52, %v569_v46  ;;  %v443_v59 = vadd.f32 %v1686_v24, %v442_v55 }
  0xfd   : > { %v507_v60 = vadd.f32 %v1686_v24, %v506_v56  ;;  %v1343_v61 = vpop.f32.mrf.mxu0  ;;  %v1359_v62 = vpop.f32.mrf.mxu1  ;;  %v559_v1 = vmax.f32 %v451_v53, 0.0  ;;  %v575_v2 = vmax.f32 %v515_v54, 0.0 }
  0xfe   : > { %1205 = vst [vmem:[%s1699_s12] sm:$0xff] %v1204_v57   ;;  %1288 = vst [vmem:[%s1699_s12 + $0x40] sm:$0xff] %v1244_v58   ;;  %v454_v63 = vadd.f32 %v1343_v61, %v1686_v24  ;;  %v518_v0 = vadd.f32 %v1359_v62, %v1686_v24  ;;  %v557_v9 = vmax.f32 %v443_v59, 0.0 }
  0xff   : > { %v445_v3 = vpop.f32.mrf.mxu0  ;;  %v509_v4 = vpop.f32.mrf.mxu1  ;;  %v573_v10 = vmax.f32 %v507_v60, 0.0 }
 0x100   : > { %v560_v5 = vmax.f32 %v454_v63, 0.0  ;;  %v576_v6 = vmax.f32 %v518_v0, 0.0  ;;  %v446_v7 = vadd.f32 %v1686_v24, %v445_v3  ;;  %v510_v8 = vadd.f32 %v1686_v24, %v509_v4 }
 0x101   : > { %v1346_v11 = vpop.f32.mrf.mxu0  ;;  %v1362_v12 = vpop.f32.mrf.mxu1 }
 0x102   : > { %v1219_v13 = vpack.c.bf16 %v560_v5, %v559_v1  ;;  %v1259_v14 = vpack.c.bf16 %v576_v6, %v575_v2  ;;  %v558_v15 = vmax.f32 %v446_v7, 0.0  ;;  %v574_v16 = vmax.f32 %v510_v8, 0.0 }
 0x103   : > { %v467_v17 = vadd.f32 %v1346_v11, %v1686_v24  ;;  %v531_v18 = vadd.f32 %v1362_v12, %v1686_v24  ;;  %v458_v19 = vpop.f32.mrf.mxu0  ;;  %v522_v20 = vpop.f32.mrf.mxu1 }
 0x104   : > { %1283 = vst [vmem:[%s1699_s12 + $0x18] sm:$0xff] %v1219_v13   ;;  %1291 = vst [vmem:[%s1699_s12 + $0x58] sm:$0xff] %v1259_v14   ;;  %v1214_v21 = vpack.c.bf16 %v558_v15, %v557_v9  ;;  %v1254_v22 = vpack.c.bf16 %v574_v16, %v573_v10  ;;  %v459_v23 = vadd.f32 %v1686_v24, %v458_v19 }
 0x105   : > { %v523_v25 = vadd.f32 %v1686_v24, %v522_v20  ;;  %v1347_v26 = vpop.f32.mrf.mxu0  ;;  %v1363_v27 = vpop.f32.mrf.mxu1  ;;  %v563_v30 = vmax.f32 %v467_v17, 0.0  ;;  %v579_v31 = vmax.f32 %v531_v18, 0.0 }
 0x106   : > { %1282 = vst [vmem:[%s1699_s12 + $0x10] sm:$0xff] %v1214_v21   ;;  %1290 = vst [vmem:[%s1699_s12 + $0x50] sm:$0xff] %v1254_v22   ;;  %v470_v28 = vadd.f32 %v1347_v26, %v1686_v24  ;;  %v534_v29 = vadd.f32 %v1363_v27, %v1686_v24  ;;  %v561_v38 = vmax.f32 %v459_v23, 0.0 }
 0x107   : > { %v461_v32 = vpop.f32.mrf.mxu0  ;;  %v525_v33 = vpop.f32.mrf.mxu1  ;;  %v577_v39 = vmax.f32 %v523_v25, 0.0 }
 0x108   : > { %v564_v34 = vmax.f32 %v470_v28, 0.0  ;;  %v580_v35 = vmax.f32 %v534_v29, 0.0  ;;  %v462_v36 = vadd.f32 %v1686_v24, %v461_v32  ;;  %v526_v37 = vadd.f32 %v1686_v24, %v525_v33 }
 0x109   : > { %v1350_v40 = vpop.f32.mrf.mxu0  ;;  %v1366_v41 = vpop.f32.mrf.mxu1 }
 0x10a   : > { %v1229_v42 = vpack.c.bf16 %v564_v34, %v563_v30  ;;  %v1269_v43 = vpack.c.bf16 %v580_v35, %v579_v31  ;;  %v562_v44 = vmax.f32 %v462_v36, 0.0  ;;  %v578_v45 = vmax.f32 %v526_v37, 0.0 }
 0x10b   : > { %v483_v46 = vadd.f32 %v1350_v40, %v1686_v24  ;;  %v547_v47 = vadd.f32 %v1366_v41, %v1686_v24  ;;  %v474_v48 = vpop.f32.mrf.mxu0  ;;  %v538_v49 = vpop.f32.mrf.mxu1 }
 0x10c   : > { %1285 = vst [vmem:[%s1699_s12 + $0x28] sm:$0xff] %v1229_v42   ;;  %1293 = vst [vmem:[%s1699_s12 + $0x68] sm:$0xff] %v1269_v43   ;;  %v1224_v50 = vpack.c.bf16 %v562_v44, %v561_v38  ;;  %v1264_v51 = vpack.c.bf16 %v578_v45, %v577_v39  ;;  %v475_v52 = vadd.f32 %v1686_v24, %v474_v48 }
 0x10d   : > { %v539_v53 = vadd.f32 %v1686_v24, %v538_v49  ;;  %v1351_v54 = vpop.f32.mrf.mxu0  ;;  %v1367_v55 = vpop.f32.mrf.mxu1  ;;  %v567_v58 = vmax.f32 %v483_v46, 0.0  ;;  %v583_v59 = vmax.f32 %v547_v47, 0.0 }
 0x10e   : > { %1284 = vst [vmem:[%s1699_s12 + $0x20] sm:$0xff] %v1224_v50   ;;  %1292 = vst [vmem:[%s1699_s12 + $0x60] sm:$0xff] %v1264_v51   ;;  %v486_v56 = vadd.f32 %v1351_v54, %v1686_v24  ;;  %v550_v57 = vadd.f32 %v1367_v55, %v1686_v24  ;;  %v565_v2 = vmax.f32 %v475_v52, 0.0 }
 0x10f   : > { %v477_v60 = vpop.f32.mrf.mxu0  ;;  %v541_v61 = vpop.f32.mrf.mxu1  ;;  %v581_v3 = vmax.f32 %v539_v53, 0.0 }
 0x110   : > { %v568_v62 = vmax.f32 %v486_v56, 0.0  ;;  %v584_v63 = vmax.f32 %v550_v57, 0.0  ;;  %v478_v0 = vadd.f32 %v1686_v24, %v477_v60  ;;  %v542_v1 = vadd.f32 %v1686_v24, %v541_v61 }
 0x112   : > { %v1239_v4 = vpack.c.bf16 %v568_v62, %v567_v58  ;;  %v1279_v5 = vpack.c.bf16 %v584_v63, %v583_v59  ;;  %v566_v6 = vmax.f32 %v478_v0, 0.0  ;;  %v582_v7 = vmax.f32 %v542_v1, 0.0  ;;  %751 = sbr.rel (!%p1629_p4) target bundleno = 339 (0x153), region = 36 }
 0x114   : > { %1287 = vst [vmem:[%s1699_s12 + $0x38] sm:$0xff] %v1239_v4   ;;  %1295 = vst [vmem:[%s1699_s12 + $0x78] sm:$0xff] %v1279_v5   ;;  %v1234_v8 = vpack.c.bf16 %v566_v6, %v565_v2  ;;  %v1274_v9 = vpack.c.bf16 %v582_v7, %v581_v3 }
 0x116   : > { %1286 = vst [vmem:[%s1699_s12 + $0x30] sm:$0xff] %v1234_v8   ;;  %1294 = vst [vmem:[%s1699_s12 + $0x70] sm:$0xff] %v1274_v9  }
 0x117   : > { %s1886_s27 = smov (!%p754_p8, %s753_s27), 32 }
 0x118   : > { %s1151_s5 = sshll.u32 %s1886_s27, 6 }
 0x119   : > { %p1154_p9 = scmp.eq.s32.totalorder %s1151_s5, 0 }
 0x11a   : > { %s1752_s6 = sshrl.u32 (!%p1154_p9), %s1886_s27, 5 }
 0x11b   : > { %762 = sbr.rel (%p1154_p9) target bundleno = 339 (0x153), region = 40  ;;  %p1155_p10 = scmp.le.s32.totalorder (!%p1154_p9), %s1752_s6, 0 }
 0x120   : > { %1041 = sbr.rel (%p1155_p10) target bundleno = 322 (0x142), region = 112  ;;  %s1879_s15 = smov (!%p1155_p10), %s1746_s4 }
 0x121   : > { %s1880_s20 = smov (!%p1155_p10), %s1699_s12  ;;  %s1761_s23 = smov (!%p1155_p10), 0  }
 0x122   : > { %s1763_s7 = smov (!%p1155_p10), 0  }
 0x125 LB: >> { %v779_v24 = vld [vmem:[%s1558_s20] sm:$0xf]  ;;  %v781_v10 = vld [vmem:[%s1558_s20 + $0x4] sm:$0xf]  ;;  %v783_v11 = vld [vmem:[%s1558_s20 + $0x8] sm:$0xf]  ;;  %s1566_s7 = sphi %s1763_s7, %s773_s7   ;;  %s1562_s23 = sphi %s1761_s23, %s1881_s23   ;;  %s1558_s20 = sphi %s1880_s20, %s848_s20   ;;  %s1554_s15 = sphi %s1879_s15, %s849_s15  }
 0x126   : >> { %780 = vst [vmem:[%s1554_s15] sm:$0xf] %v779_v24  ;;  %782 = vst [vmem:[%s1554_s15 + $0x4] sm:$0xf] %v781_v10  ;;  %v785_v12 = vld [vmem:[%s1558_s20 + $0xc] sm:$0xf]  ;;  %s843_s8 = sadd.s32 1, %s1562_s23 }
 0x127   : >> { %784 = vst [vmem:[%s1554_s15 + $0x8] sm:$0xf] %v783_v11  ;;  %v787_v13 = vld [vmem:[%s1558_s20 + $0x10] sm:$0xf]  ;;  %v789_v14 = vld [vmem:[%s1558_s20 + $0x14] sm:$0xf]  ;;  %p844_p11 = scmp.ge.s32.totalorder %s843_s8, %s1752_s6 }
 0x128   : >> { %786 = vst [vmem:[%s1554_s15 + $0xc] sm:$0xf] %v785_v12  ;;  %788 = vst [vmem:[%s1554_s15 + $0x10] sm:$0xf] %v787_v13  ;;  %v791_v15 = vld [vmem:[%s1558_s20 + $0x18] sm:$0xf] }
 0x129   : >> { %790 = vst [vmem:[%s1554_s15 + $0x14] sm:$0xf] %v789_v14  ;;  %v793_v16 = vld [vmem:[%s1558_s20 + $0x1c] sm:$0xf]  ;;  %v795_v17 = vld [vmem:[%s1558_s20 + $0x20] sm:$0xf] }
 0x12a   : >> { %792 = vst [vmem:[%s1554_s15 + $0x18] sm:$0xf] %v791_v15  ;;  %794 = vst [vmem:[%s1554_s15 + $0x1c] sm:$0xf] %v793_v16  ;;  %v797_v18 = vld [vmem:[%s1558_s20 + $0x24] sm:$0xf] }
 0x12b   : >> { %796 = vst [vmem:[%s1554_s15 + $0x20] sm:$0xf] %v795_v17  ;;  %v799_v19 = vld [vmem:[%s1558_s20 + $0x28] sm:$0xf]  ;;  %v801_v20 = vld [vmem:[%s1558_s20 + $0x2c] sm:$0xf] }
 0x12c   : >> { %798 = vst [vmem:[%s1554_s15 + $0x24] sm:$0xf] %v797_v18  ;;  %800 = vst [vmem:[%s1554_s15 + $0x28] sm:$0xf] %v799_v19  ;;  %v803_v21 = vld [vmem:[%s1558_s20 + $0x30] sm:$0xf] }
 0x12d   : >> { %802 = vst [vmem:[%s1554_s15 + $0x2c] sm:$0xf] %v801_v20  ;;  %v805_v22 = vld [vmem:[%s1558_s20 + $0x34] sm:$0xf]  ;;  %v807_v23 = vld [vmem:[%s1558_s20 + $0x38] sm:$0xf] }
 0x12e   : >> { %804 = vst [vmem:[%s1554_s15 + $0x30] sm:$0xf] %v803_v21  ;;  %806 = vst [vmem:[%s1554_s15 + $0x34] sm:$0xf] %v805_v22  ;;  %v809_v25 = vld [vmem:[%s1558_s20 + $0x3c] sm:$0xf] }
 0x12f   : >> { %808 = vst [vmem:[%s1554_s15 + $0x38] sm:$0xf] %v807_v23  ;;  %v811_v26 = vld [vmem:[%s1558_s20 + $0x40] sm:$0xf]  ;;  %v813_v27 = vld [vmem:[%s1558_s20 + $0x44] sm:$0xf] }
 0x130   : >> { %810 = vst [vmem:[%s1554_s15 + $0x3c] sm:$0xf] %v809_v25  ;;  %812 = vst [vmem:[%s1554_s15 + $0x40] sm:$0xf] %v811_v26  ;;  %v815_v28 = vld [vmem:[%s1558_s20 + $0x48] sm:$0xf] }
 0x131   : >> { %814 = vst [vmem:[%s1554_s15 + $0x44] sm:$0xf] %v813_v27  ;;  %v817_v29 = vld [vmem:[%s1558_s20 + $0x4c] sm:$0xf]  ;;  %v819_v30 = vld [vmem:[%s1558_s20 + $0x50] sm:$0xf] }
 0x132   : >> { %816 = vst [vmem:[%s1554_s15 + $0x48] sm:$0xf] %v815_v28  ;;  %818 = vst [vmem:[%s1554_s15 + $0x4c] sm:$0xf] %v817_v29  ;;  %v821_v31 = vld [vmem:[%s1558_s20 + $0x54] sm:$0xf] }
 0x133   : >> { %820 = vst [vmem:[%s1554_s15 + $0x50] sm:$0xf] %v819_v30  ;;  %v823_v32 = vld [vmem:[%s1558_s20 + $0x58] sm:$0xf]  ;;  %v825_v33 = vld [vmem:[%s1558_s20 + $0x5c] sm:$0xf] }
 0x134   : >> { %822 = vst [vmem:[%s1554_s15 + $0x54] sm:$0xf] %v821_v31  ;;  %824 = vst [vmem:[%s1554_s15 + $0x58] sm:$0xf] %v823_v32  ;;  %v827_v34 = vld [vmem:[%s1558_s20 + $0x60] sm:$0xf] }
 0x135   : >> { %826 = vst [vmem:[%s1554_s15 + $0x5c] sm:$0xf] %v825_v33  ;;  %v829_v35 = vld [vmem:[%s1558_s20 + $0x64] sm:$0xf]  ;;  %v831_v36 = vld [vmem:[%s1558_s20 + $0x68] sm:$0xf] }
 0x136   : >> { %828 = vst [vmem:[%s1554_s15 + $0x60] sm:$0xf] %v827_v34  ;;  %830 = vst [vmem:[%s1554_s15 + $0x64] sm:$0xf] %v829_v35  ;;  %v833_v37 = vld [vmem:[%s1558_s20 + $0x6c] sm:$0xf] }
 0x137   : >> { %832 = vst [vmem:[%s1554_s15 + $0x68] sm:$0xf] %v831_v36  ;;  %v835_v38 = vld [vmem:[%s1558_s20 + $0x70] sm:$0xf]  ;;  %v837_v39 = vld [vmem:[%s1558_s20 + $0x74] sm:$0xf] }
 0x138   : >> { %834 = vst [vmem:[%s1554_s15 + $0x6c] sm:$0xf] %v833_v37  ;;  %836 = vst [vmem:[%s1554_s15 + $0x70] sm:$0xf] %v835_v38  ;;  %v839_v40 = vld [vmem:[%s1558_s20 + $0x78] sm:$0xf] }
 0x139   : >> { %838 = vst [vmem:[%s1554_s15 + $0x74] sm:$0xf] %v837_v39  ;;  %v841_v41 = vld [vmem:[%s1558_s20 + $0x7c] sm:$0xf]  ;;  %840 = vst [vmem:[%s1554_s15 + $0x78] sm:$0xf] %v839_v40 }
 0x13a   : >> { %842 = vst [vmem:[%s1554_s15 + $0x7c] sm:$0xf] %v841_v41  ;;  %s1888_s8 = smov (%p844_p11, %s843_s8), 0  ;;  %s773_s7 = sadd.s32 1, %s1566_s7  }
 0x13b   : >> { %s1156_s9 = sshll.u32 %s1888_s8, 7  ;;  %p772_p12 = scmp.ge.s32.totalorder %s773_s7, %s1752_s6 }
 0x13c   : >> { %s848_s20 = scalar_lea.vmem %s1699_s12, %s1156_s9 [#allocation2]   ;;  %s849_s15 = scalar_lea.vmem %s1746_s4, %s1156_s9  }
 0x13d   : >> { %s1881_s23 = smov %s1888_s8  ;;  %775 = sbr.rel (!%p772_p12) target bundleno = 293 (0x125), region = 118 }
 0x142 PF: > { %s1856_s10 = sand.u32 31, %s1886_s27   ;;  %s1199_s11 = sshll.u32 %s1752_s6, 7 }
 0x143   : > { %s854_s14 = scalar_lea.vmem %s1699_s12, %s1199_s11 [#allocation2]   ;;  %s856_s17 = scalar_lea.vmem %s1746_s4, %s1199_s11  }
 0x144   : > { %p1161_p13 = scmp.le.s32.totalorder %s1856_s10, 0 }
 0x145   : > { %s1568_s18 = smov (!%p1161_p13), %s856_s17   ;;  %s1572_s21 = smov (!%p1161_p13), %s854_s14  }
 0x146   : > { %1055 = sbr.rel (%p1161_p13) target bundleno = 339 (0x153), region = 123  ;;  %s1576_s22 = smov (!%p1161_p13), 0  }
 0x147   : > { %s1580_s24 = smov (!%p1161_p13), 0  }
 0x14b LB: >> { %v866_v42 = vld [vmem:[%s1574_s21] sm:$0xf]  ;;  %s868_s25 = sadd.s32 1, %s1578_s22  ;;  %s860_s24 = sadd.s32 1, %s1582_s24   ;;  %s1582_s24 = sphi %s1580_s24, %s860_s24   ;;  %s1578_s22 = sphi %s1576_s22, %s1577_s22   ;;  %s1574_s21 = sphi %s1572_s21, %s873_s21   ;;  %s1570_s18 = sphi %s1568_s18, %s874_s18  }
 0x14c   : >> { %867 = vst [vmem:[%s1570_s18] sm:$0xf] %v866_v42  ;;  %p869_p0 = scmp.ge.s32.totalorder %s868_s25, %s1856_s10  ;;  %p859_p1 = scmp.ge.s32.totalorder %s860_s24, %s1856_s10 }
 0x14e   : >> { %s1890_s25 = smov (%p869_p0, %s868_s25), 0  ;;  %862 = sbr.rel (!%p859_p1) target bundleno = 331 (0x14b), region = 129 }
 0x14f   : >> { %s1162_s26 = sshll.u32 %s1890_s25, 2  ;;  %s1577_s22 = smov %s1890_s25  }
 0x150   : >> { %s873_s21 = scalar_lea.vmem %s854_s14, %s1162_s26 [#allocation2]   ;;  %s874_s18 = scalar_lea.vmem %s856_s17, %s1162_s26  }
 0x153 PF: > { %p10_p2 = scmp.ge.s32.totalorder %s1619_s16, 5   ;;  %s1882_s12 = smov %s1546_s13 }
 0x154   : > { %s1883_s13 = smov %s1627_s19  ;;  %s1884_s14 = smov %s1619_s16 }
 0x155   :  { %12 = sbr.rel (!%p10_p2) target bundleno = 2 (0x2), region = 140 }

// kernel: ssidvae_forward.23
= control target key start
LH: loop header
LB: loop body
LE: loop exit
PB: predicated region body
PF: predicated region fallthrough
CT: control target
= control target key end

     0   :  { %s1782_s12 = smov 0   ;;  %s1784_s13 = smov 0   ;;  %s2283_s0 = inlined_call_operand.vmem [shape: bf16[2178,128], index: 0, kind: input, shape index: {}]   ;;  %s2284_s1 = inlined_call_operand.vmem [shape: bf16[128,12], index: 1, kind: input, shape index: {}]   ;;  %s2285_s2 = inlined_call_operand.vmem [shape: f32[1,12], index: 2, kind: input, shape index: {}]   ;;  %s2286_s3 = inlined_call_operand.vmem [shape: f32[2178,12], index: 3, kind: output, shape index: {}]  }
   0x1   :  { %s1786_s14 = smov 0  }
   0x2 LB: > { %s1795_s15 = sadd.s32 4294967295, %s1728_s14   ;;  %s1797_s16 = sadd.s32 1, %s1728_s14   ;;  %s1728_s14 = sphi %s1786_s14, %s2295_s14   ;;  %s1724_s13 = sphi %s1784_s13, %s2294_s13   ;;  %s1720_s12 = sphi %s1782_s12, %s2293_s12  }
   0x3   : > { %s85_s17 = ssub.s32 %s1728_s14, %s1797_s16  ;;  %s88_s18 = sadd.s32 1, %s1724_s13 }
   0x4   : > { %p86_p0 = scmp.eq.s32.totalorder %s85_s17, 0  ;;  %p98_p1 = scmp.ne.s32.totalorder %s1724_s13, %s1720_s12 }
   0x5   : > { %p99_p2 = scmp.eq.s32.totalorder %s1795_s15, 4  ;;  %p1345_p3 = scmp.ge.s32.totalorder %s1728_s14, 1 }
   0x6   : > { %s1805_s19 = scalar_select %p86_p0, %s1724_s13, %s88_s18  }
   0x7   : > { %p1807_p4 = por %p99_p2, %p98_p1  ;;  %p146_p5 = scmp.lt.s32.totalorder %s1728_s14, 6 }
   0x9   : > { %p147_p6 = pnand %p1345_p3, %p146_p5 }
   0xa   : > { %s1815_s23 = sshll.u32 (!%p147_p6), %s1795_s15, 6  ;;  %s170_s22 = sand.u32 (!%p147_p6), 1, %s1720_s12  }
   0xb   : > { %150 = sbr.rel (%p147_p6) target bundleno = 371 (0x173), region = 32  ;;  %p178_p7 = scmp.lt.s32.totalorder (!%p147_p6), %s1815_s23, 272 }
   0xc   : > { %s1346_s24 = sshll.u32 (!%p147_p6), %s170_s22, 9 }
   0xd   : > { %s1885_s27 = scalar_lea.vmem (!%p147_p6), [#allocation2], %s1346_s24  }
  0x10   : > { %v1634_v0 = vld [vmem:[%s2284_s1 + $0x38] sm:$0xff]   ;;  %v1635_v1 = vld [vmem:[%s2284_s1 + $0x30] sm:$0xff]   ;;  %s179_s26 = scalar_select %p178_p7, %s1815_s23, 272  ;;  %v1636_v2 = vld [vmem:[%s2284_s1 + $0x28] sm:$0xff]   ;;  %vm809_vm0 = vcmask 97280  }
  0x11   : > { %1450 = vmatprep.subr.bf16.mxu0 %v1634_v0  ;;  %1530 = vmatprep.subr.bf16.mxu1 %v1634_v0  ;;  %v1637_v3 = vld [vmem:[%s2284_s1 + $0x20] sm:$0xff]   ;;  %v1638_v6 = vld [vmem:[%s2284_s1 + $0x18] sm:$0xff]   ;;  %v1639_v7 = vld [vmem:[%s2284_s1 + $0x10] sm:$0xff]   ;;  %s882_s12 = ssub.s32 (%p1807_p4), 273, %s1815_s23  ;;  %s1407_s28 = sshll.u32 (%p1807_p4), %s1795_s15, 9 }
  0x12   : > { %1451 = vmatpush3.bf16.msra.mxu0 %v1634_v0  ;;  %1538 = vmatpush3.bf16.msra.mxu1 %v1634_v0  ;;  %s1348_s29 = sshll.u32 %s179_s26, 2  ;;  %v1640_v8 = vld [vmem:[%s2284_s1 + $0x8] sm:$0xff]   ;;  %v1641_v9 = vld [vmem:[%s2284_s1] sm:$0xff]   ;;  %p883_p8 = scmp.lt.s32.totalorder (%p1807_p4), %s882_s12, 64 }
  0x13   : > { %1452 = vmatprep.subr.bf16.mxu0 %v1635_v1  ;;  %1531 = vmatprep.subr.bf16.mxu1 %v1635_v1  ;;  %s1828_s5 = scalar_lea.vmem %s2283_s0, %s1348_s29  ;;  %v1881_v40 = vld [vmem:[%s2285_s2] ss:$0 sm:$0xff]  ;;  %s2084_s4 = scalar_lea.vmem (%p1807_p4), %s2286_s3, %s1407_s28  }
  0x14   : > { %v1642_v4 = vld [vmem:[%s1828_s5] sm:$0xff]   ;;  %v1644_v10 = vld [vmem:[%s1828_s5 + $0x8] sm:$0xff]   ;;  %v1646_v12 = vld [vmem:[%s1828_s5 + $0x10] sm:$0xff]  }
  0x15   : > { %v1643_v5 = vld [vmem:[%s1828_s5 + $0x80] sm:$0xff]   ;;  %1466 = vmatprep.mubr.bf16.mxu0 %v1642_v4  ;;  %v1645_v11 = vld [vmem:[%s1828_s5 + $0x88] sm:$0xff]   ;;  %v1647_v13 = vld [vmem:[%s1828_s5 + $0x90] sm:$0xff]  }
  0x16   : > { %1453 = vmatpush3.bf16.msra.mxu0 %v1635_v1  ;;  %1539 = vmatpush3.bf16.msra.mxu1 %v1635_v1  ;;  %v1648_v14 = vld [vmem:[%s1828_s5 + $0x18] sm:$0xff]   ;;  %v1650_v16 = vld [vmem:[%s1828_s5 + $0x20] sm:$0xff]   ;;  %v1652_v18 = vld [vmem:[%s1828_s5 + $0x28] sm:$0xff]  }
  0x17   : > { %1454 = vmatprep.subr.bf16.mxu0 %v1636_v2  ;;  %1532 = vmatprep.subr.bf16.mxu1 %v1636_v2  ;;  %v1649_v15 = vld [vmem:[%s1828_s5 + $0x98] sm:$0xff]   ;;  %v1651_v17 = vld [vmem:[%s1828_s5 + $0xa0] sm:$0xff]   ;;  %v1653_v19 = vld [vmem:[%s1828_s5 + $0xa8] sm:$0xff]  }
  0x18   : > { %1498 = vmatprep.mubr.bf16.mxu1 %v1643_v5  ;;  %v1654_v20 = vld [vmem:[%s1828_s5 + $0x30] sm:$0xff]   ;;  %v1656_v22 = vld [vmem:[%s1828_s5 + $0x38] sm:$0xff]   ;;  %v1658_v24 = vld [vmem:[%s1828_s5 + $0x40] sm:$0xff]  }
  0x19   : > { %v1655_v21 = vld [vmem:[%s1828_s5 + $0xb0] sm:$0xff]   ;;  %v1657_v23 = vld [vmem:[%s1828_s5 + $0xb8] sm:$0xff]   ;;  %v1659_v25 = vld [vmem:[%s1828_s5 + $0xc0] sm:$0xff]  }
  0x1a   : > { %1455 = vmatpush3.bf16.msra.mxu0 %v1636_v2  ;;  %1540 = vmatpush3.bf16.msra.mxu1 %v1636_v2  ;;  %v1660_v26 = vld [vmem:[%s1828_s5 + $0x48] sm:$0xff]   ;;  %v1662_v28 = vld [vmem:[%s1828_s5 + $0x50] sm:$0xff]   ;;  %v1664_v30 = vld [vmem:[%s1828_s5 + $0x58] sm:$0xff]  }
  0x1b   : > { %1456 = vmatprep.subr.bf16.mxu0 %v1637_v3  ;;  %1533 = vmatprep.subr.bf16.mxu1 %v1637_v3  ;;  %v1661_v27 = vld [vmem:[%s1828_s5 + $0xc8] sm:$0xff]   ;;  %v1663_v29 = vld [vmem:[%s1828_s5 + $0xd0] sm:$0xff]   ;;  %v1665_v31 = vld [vmem:[%s1828_s5 + $0xd8] sm:$0xff]  }
  0x1c   : > { %v1666_v32 = vld [vmem:[%s1828_s5 + $0x60] sm:$0xff]   ;;  %v1668_v34 = vld [vmem:[%s1828_s5 + $0x68] sm:$0xff]   ;;  %v1670_v36 = vld [vmem:[%s1828_s5 + $0x70] sm:$0xff]  }
  0x1d   : > { %v1667_v33 = vld [vmem:[%s1828_s5 + $0xe0] sm:$0xff]   ;;  %v1669_v35 = vld [vmem:[%s1828_s5 + $0xe8] sm:$0xff]   ;;  %v1671_v37 = vld [vmem:[%s1828_s5 + $0xf0] sm:$0xff]  }
  0x1e   : > { %1457 = vmatpush3.bf16.msra.mxu0 %v1637_v3  ;;  %1541 = vmatpush3.bf16.msra.mxu1 %v1637_v3  ;;  %v1672_v38 = vld [vmem:[%s1828_s5 + $0x78] sm:$0xff]  }
  0x1f   : > { %1458 = vmatprep.subr.bf16.mxu0 %v1638_v6  ;;  %1534 = vmatprep.subr.bf16.mxu1 %v1638_v6  ;;  %v1673_v39 = vld [vmem:[%s1828_s5 + $0xf8] sm:$0xff]  }
  0x22   : > { %1459 = vmatpush3.bf16.msra.mxu0 %v1638_v6  ;;  %1542 = vmatpush3.bf16.msra.mxu1 %v1638_v6 }
  0x23   : > { %1460 = vmatprep.subr.bf16.mxu0 %v1639_v7  ;;  %1535 = vmatprep.subr.bf16.mxu1 %v1639_v7 }
  0x26   : > { %1461 = vmatpush3.bf16.msra.mxu0 %v1639_v7  ;;  %1543 = vmatpush3.bf16.msra.mxu1 %v1639_v7 }
  0x27   : > { %1462 = vmatprep.subr.bf16.mxu0 %v1640_v8  ;;  %1536 = vmatprep.subr.bf16.mxu1 %v1640_v8 }
  0x2a   : > { %1463 = vmatpush3.bf16.msra.mxu0 %v1640_v8  ;;  %1544 = vmatpush3.bf16.msra.mxu1 %v1640_v8 }
  0x2b   : > { %1464 = vmatprep.subr.bf16.mxu0 %v1641_v9  ;;  %1537 = vmatprep.subr.bf16.mxu1 %v1641_v9 }
  0x2e   : > { %1465 = vmatpush3.bf16.msra.mxu0 %v1641_v9  ;;  %1545 = vmatpush3.bf16.msra.mxu1 %v1641_v9 }
  0x31   : > { %1467 = vmatmul.mubr.bf16.vlgmr.msra.gmra.mxu0 %v1644_v10  ;;  %1499 = vmatmul.mubr.bf16.vlgmr.msra.gmra.mxu1 %v1645_v11 }
  0x32   : > { %1470 = vmatprep.mubr.bf16.mxu0 %v1646_v12  ;;  %1502 = vmatprep.mubr.bf16.mxu1 %v1647_v13 }
  0x39   : > { %1471 = vmatmul.mubr.bf16.gmra.mxu0 %v1648_v14  ;;  %1503 = vmatmul.mubr.bf16.gmra.mxu1 %v1649_v15 }
  0x3a   : > { %1474 = vmatprep.mubr.bf16.mxu0 %v1650_v16  ;;  %1506 = vmatprep.mubr.bf16.mxu1 %v1651_v17 }
  0x41   : > { %1475 = vmatmul.mubr.bf16.gmra.mxu0 %v1652_v18  ;;  %1507 = vmatmul.mubr.bf16.gmra.mxu1 %v1653_v19 }
  0x42   : > { %1478 = vmatprep.mubr.bf16.mxu0 %v1654_v20  ;;  %1510 = vmatprep.mubr.bf16.mxu1 %v1655_v21 }
  0x49   : > { %1479 = vmatmul.mubr.bf16.gmra.mxu0 %v1656_v22  ;;  %1511 = vmatmul.mubr.bf16.gmra.mxu1 %v1657_v23 }
  0x4a   : > { %1482 = vmatprep.mubr.bf16.mxu0 %v1658_v24  ;;  %1514 = vmatprep.mubr.bf16.mxu1 %v1659_v25 }
  0x51   : > { %1483 = vmatmul.mubr.bf16.gmra.mxu0 %v1660_v26  ;;  %1515 = vmatmul.mubr.bf16.gmra.mxu1 %v1661_v27 }
  0x52   : > { %1486 = vmatprep.mubr.bf16.mxu0 %v1662_v28  ;;  %1518 = vmatprep.mubr.bf16.mxu1 %v1663_v29 }
  0x59   : > { %1487 = vmatmul.mubr.bf16.gmra.mxu0 %v1664_v30  ;;  %1519 = vmatmul.mubr.bf16.gmra.mxu1 %v1665_v31 }
  0x5a   : > { %1490 = vmatprep.mubr.bf16.mxu0 %v1666_v32  ;;  %1522 = vmatprep.mubr.bf16.mxu1 %v1667_v33 }
  0x61   : > { %1491 = vmatmul.mubr.bf16.gmra.mxu0 %v1668_v34  ;;  %1523 = vmatmul.mubr.bf16.gmra.mxu1 %v1669_v35 }
  0x62   : > { %1494 = vmatprep.mubr.bf16.mxu0 %v1670_v36  ;;  %1526 = vmatprep.mubr.bf16.mxu1 %v1671_v37 }
  0x69   : > { %1495 = vmatmul.mubr.bf16.gmra.mxu0 %v1672_v38  ;;  %1527 = vmatmul.mubr.bf16.gmra.mxu1 %v1673_v39 }
  0xf1   : > { %v1468_v41 = vpop.f32.mrf.mxu0  ;;  %v1500_v42 = vpop.f32.mrf.mxu1 }
  0xf2   : > { %v563_v43 = vadd.f32 %v1468_v41, %v1881_v40  ;;  %v691_v44 = vadd.f32 %v1500_v42, %v1881_v40 }
  0xf3   : > { %v554_v45 = vpop.f32.mrf.mxu0  ;;  %v682_v46 = vpop.f32.mrf.mxu1 }
  0xf4   : > { %812 = vst.msk [vmem:[%s1885_s27 + $0x10] sm:$0xff] %vm809_vm0, %v563_v43  ;;  %844 = vst.msk [vmem:[%s1885_s27 + $0x110] sm:$0xff] %vm809_vm0, %v691_v44  ;;  %v555_v47 = vadd.f32 %v1881_v40, %v554_v45  ;;  %v683_v48 = vadd.f32 %v1881_v40, %v682_v46 }
  0xf5   : > { %v1469_v49 = vpop.f32.mrf.mxu0  ;;  %v1501_v50 = vpop.f32.mrf.mxu1 }
  0xf6   : > { %810 = vst.msk [vmem:[%s1885_s27] sm:$0xff] %vm809_vm0, %v555_v47  ;;  %842 = vst.msk [vmem:[%s1885_s27 + $0x100] sm:$0xff] %vm809_vm0, %v683_v48  ;;  %v566_v51 = vadd.f32 %v1469_v49, %v1881_v40  ;;  %v694_v52 = vadd.f32 %v1501_v50, %v1881_v40 }
  0xf7   : > { %v557_v53 = vpop.f32.mrf.mxu0  ;;  %v685_v54 = vpop.f32.mrf.mxu1 }
  0xf8   : > { %813 = vst.msk [vmem:[%s1885_s27 + $0x18] sm:$0xff] %vm809_vm0, %v566_v51  ;;  %845 = vst.msk [vmem:[%s1885_s27 + $0x118] sm:$0xff] %vm809_vm0, %v694_v52  ;;  %v558_v55 = vadd.f32 %v1881_v40, %v557_v53  ;;  %v686_v56 = vadd.f32 %v1881_v40, %v685_v54 }
  0xf9   : > { %v1472_v57 = vpop.f32.mrf.mxu0  ;;  %v1504_v58 = vpop.f32.mrf.mxu1 }
  0xfa   : > { %811 = vst.msk [vmem:[%s1885_s27 + $0x8] sm:$0xff] %vm809_vm0, %v558_v55  ;;  %843 = vst.msk [vmem:[%s1885_s27 + $0x108] sm:$0xff] %vm809_vm0, %v686_v56  ;;  %v579_v59 = vadd.f32 %v1472_v57, %v1881_v40  ;;  %v707_v60 = vadd.f32 %v1504_v58, %v1881_v40 }
  0xfb   : > { %v570_v61 = vpop.f32.mrf.mxu0  ;;  %v698_v62 = vpop.f32.mrf.mxu1 }
  0xfc   : > { %816 = vst.msk [vmem:[%s1885_s27 + $0x30] sm:$0xff] %vm809_vm0, %v579_v59  ;;  %848 = vst.msk [vmem:[%s1885_s27 + $0x130] sm:$0xff] %vm809_vm0, %v707_v60  ;;  %v571_v63 = vadd.f32 %v1881_v40, %v570_v61  ;;  %v699_v0 = vadd.f32 %v1881_v40, %v698_v62 }
  0xfd   : > { %v1473_v1 = vpop.f32.mrf.mxu0  ;;  %v1505_v2 = vpop.f32.mrf.mxu1 }
  0xfe   : > { %814 = vst.msk [vmem:[%s1885_s27 + $0x20] sm:$0xff] %vm809_vm0, %v571_v63  ;;  %846 = vst.msk [vmem:[%s1885_s27 + $0x120] sm:$0xff] %vm809_vm0, %v699_v0  ;;  %v582_v3 = vadd.f32 %v1473_v1, %v1881_v40  ;;  %v710_v4 = vadd.f32 %v1505_v2, %v1881_v40 }
  0xff   : > { %v573_v5 = vpop.f32.mrf.mxu0  ;;  %v701_v6 = vpop.f32.mrf.mxu1 }
 0x100   : > { %817 = vst.msk [vmem:[%s1885_s27 + $0x38] sm:$0xff] %vm809_vm0, %v582_v3  ;;  %849 = vst.msk [vmem:[%s1885_s27 + $0x138] sm:$0xff] %vm809_vm0, %v710_v4  ;;  %v574_v7 = vadd.f32 %v1881_v40, %v573_v5  ;;  %v702_v8 = vadd.f32 %v1881_v40, %v701_v6 }
 0x101   : > { %v1476_v9 = vpop.f32.mrf.mxu0  ;;  %v1508_v10 = vpop.f32.mrf.mxu1 }
 0x102   : > { %815 = vst.msk [vmem:[%s1885_s27 + $0x28] sm:$0xff] %vm809_vm0, %v574_v7  ;;  %847 = vst.msk [vmem:[%s1885_s27 + $0x128] sm:$0xff] %vm809_vm0, %v702_v8  ;;  %v595_v11 = vadd.f32 %v1476_v9, %v1881_v40  ;;  %v723_v12 = vadd.f32 %v1508_v10, %v1881_v40 }
 0x103   : > { %v586_v13 = vpop.f32.mrf.mxu0  ;;  %v714_v14 = vpop.f32.mrf.mxu1 }
 0x104   : > { %820 = vst.msk [vmem:[%s1885_s27 + $0x50] sm:$0xff] %vm809_vm0, %v595_v11  ;;  %852 = vst.msk [vmem:[%s1885_s27 + $0x150] sm:$0xff] %vm809_vm0, %v723_v12  ;;  %v587_v15 = vadd.f32 %v1881_v40, %v586_v13  ;;  %v715_v16 = vadd.f32 %v1881_v40, %v714_v14 }
 0x105   : > { %v1477_v17 = vpop.f32.mrf.mxu0  ;;  %v1509_v18 = vpop.f32.mrf.mxu1 }
 0x106   : > { %818 = vst.msk [vmem:[%s1885_s27 + $0x40] sm:$0xff] %vm809_vm0, %v587_v15  ;;  %850 = vst.msk [vmem:[%s1885_s27 + $0x140] sm:$0xff] %vm809_vm0, %v715_v16  ;;  %v598_v19 = vadd.f32 %v1477_v17, %v1881_v40  ;;  %v726_v20 = vadd.f32 %v1509_v18, %v1881_v40 }
 0x107   : > { %v589_v21 = vpop.f32.mrf.mxu0  ;;  %v717_v22 = vpop.f32.mrf.mxu1 }
 0x108   : > { %821 = vst.msk [vmem:[%s1885_s27 + $0x58] sm:$0xff] %vm809_vm0, %v598_v19  ;;  %853 = vst.msk [vmem:[%s1885_s27 + $0x158] sm:$0xff] %vm809_vm0, %v726_v20  ;;  %v590_v23 = vadd.f32 %v1881_v40, %v589_v21  ;;  %v718_v24 = vadd.f32 %v1881_v40, %v717_v22 }
 0x109   : > { %v1480_v25 = vpop.f32.mrf.mxu0  ;;  %v1512_v26 = vpop.f32.mrf.mxu1 }
 0x10a   : > { %819 = vst.msk [vmem:[%s1885_s27 + $0x48] sm:$0xff] %vm809_vm0, %v590_v23  ;;  %851 = vst.msk [vmem:[%s1885_s27 + $0x148] sm:$0xff] %vm809_vm0, %v718_v24  ;;  %v611_v27 = vadd.f32 %v1480_v25, %v1881_v40  ;;  %v739_v28 = vadd.f32 %v1512_v26, %v1881_v40 }
 0x10b   : > { %v602_v29 = vpop.f32.mrf.mxu0  ;;  %v730_v30 = vpop.f32.mrf.mxu1 }
 0x10c   : > { %824 = vst.msk [vmem:[%s1885_s27 + $0x70] sm:$0xff] %vm809_vm0, %v611_v27  ;;  %856 = vst.msk [vmem:[%s1885_s27 + $0x170] sm:$0xff] %vm809_vm0, %v739_v28  ;;  %v603_v31 = vadd.f32 %v1881_v40, %v602_v29  ;;  %v731_v32 = vadd.f32 %v1881_v40, %v730_v30 }
 0x10d   : > { %v1481_v33 = vpop.f32.mrf.mxu0  ;;  %v1513_v34 = vpop.f32.mrf.mxu1 }
 0x10e   : > { %822 = vst.msk [vmem:[%s1885_s27 + $0x60] sm:$0xff] %vm809_vm0, %v603_v31  ;;  %854 = vst.msk [vmem:[%s1885_s27 + $0x160] sm:$0xff] %vm809_vm0, %v731_v32  ;;  %v614_v35 = vadd.f32 %v1481_v33, %v1881_v40  ;;  %v742_v36 = vadd.f32 %v1513_v34, %v1881_v40 }
 0x10f   : > { %v605_v37 = vpop.f32.mrf.mxu0  ;;  %v733_v38 = vpop.f32.mrf.mxu1 }
 0x110   : > { %825 = vst.msk [vmem:[%s1885_s27 + $0x78] sm:$0xff] %vm809_vm0, %v614_v35  ;;  %857 = vst.msk [vmem:[%s1885_s27 + $0x178] sm:$0xff] %vm809_vm0, %v742_v36  ;;  %v606_v39 = vadd.f32 %v1881_v40, %v605_v37  ;;  %v734_v41 = vadd.f32 %v1881_v40, %v733_v38 }
 0x111   : > { %v1484_v42 = vpop.f32.mrf.mxu0  ;;  %v1516_v43 = vpop.f32.mrf.mxu1 }
 0x112   : > { %823 = vst.msk [vmem:[%s1885_s27 + $0x68] sm:$0xff] %vm809_vm0, %v606_v39  ;;  %855 = vst.msk [vmem:[%s1885_s27 + $0x168] sm:$0xff] %vm809_vm0, %v734_v41  ;;  %v627_v44 = vadd.f32 %v1484_v42, %v1881_v40  ;;  %v755_v45 = vadd.f32 %v1516_v43, %v1881_v40 }
 0x113   : > { %v618_v46 = vpop.f32.mrf.mxu0  ;;  %v746_v47 = vpop.f32.mrf.mxu1 }
 0x114   : > { %828 = vst.msk [vmem:[%s1885_s27 + $0x90] sm:$0xff] %vm809_vm0, %v627_v44  ;;  %860 = vst.msk [vmem:[%s1885_s27 + $0x190] sm:$0xff] %vm809_vm0, %v755_v45  ;;  %v619_v48 = vadd.f32 %v1881_v40, %v618_v46  ;;  %v747_v49 = vadd.f32 %v1881_v40, %v746_v47 }
 0x115   : > { %v1485_v50 = vpop.f32.mrf.mxu0  ;;  %v1517_v51 = vpop.f32.mrf.mxu1 }
 0x116   : > { %826 = vst.msk [vmem:[%s1885_s27 + $0x80] sm:$0xff] %vm809_vm0, %v619_v48  ;;  %858 = vst.msk [vmem:[%s1885_s27 + $0x180] sm:$0xff] %vm809_vm0, %v747_v49  ;;  %v630_v52 = vadd.f32 %v1485_v50, %v1881_v40  ;;  %v758_v53 = vadd.f32 %v1517_v51, %v1881_v40 }
 0x117   : > { %v621_v54 = vpop.f32.mrf.mxu0  ;;  %v749_v55 = vpop.f32.mrf.mxu1 }
 0x118   : > { %829 = vst.msk [vmem:[%s1885_s27 + $0x98] sm:$0xff] %vm809_vm0, %v630_v52  ;;  %861 = vst.msk [vmem:[%s1885_s27 + $0x198] sm:$0xff] %vm809_vm0, %v758_v53  ;;  %v622_v56 = vadd.f32 %v1881_v40, %v621_v54  ;;  %v750_v57 = vadd.f32 %v1881_v40, %v749_v55 }
 0x119   : > { %v1488_v58 = vpop.f32.mrf.mxu0  ;;  %v1520_v59 = vpop.f32.mrf.mxu1 }
 0x11a   : > { %827 = vst.msk [vmem:[%s1885_s27 + $0x88] sm:$0xff] %vm809_vm0, %v622_v56  ;;  %859 = vst.msk [vmem:[%s1885_s27 + $0x188] sm:$0xff] %vm809_vm0, %v750_v57  ;;  %v643_v60 = vadd.f32 %v1488_v58, %v1881_v40  ;;  %v771_v61 = vadd.f32 %v1520_v59, %v1881_v40 }
 0x11b   : > { %v634_v62 = vpop.f32.mrf.mxu0  ;;  %v762_v63 = vpop.f32.mrf.mxu1 }
 0x11c   : > { %832 = vst.msk [vmem:[%s1885_s27 + $0xb0] sm:$0xff] %vm809_vm0, %v643_v60  ;;  %864 = vst.msk [vmem:[%s1885_s27 + $0x1b0] sm:$0xff] %vm809_vm0, %v771_v61  ;;  %v635_v0 = vadd.f32 %v1881_v40, %v634_v62  ;;  %v763_v1 = vadd.f32 %v1881_v40, %v762_v63 }
 0x11d   : > { %v1489_v2 = vpop.f32.mrf.mxu0  ;;  %v1521_v3 = vpop.f32.mrf.mxu1 }
 0x11e   : > { %830 = vst.msk [vmem:[%s1885_s27 + $0xa0] sm:$0xff] %vm809_vm0, %v635_v0  ;;  %862 = vst.msk [vmem:[%s1885_s27 + $0x1a0] sm:$0xff] %vm809_vm0, %v763_v1  ;;  %v646_v4 = vadd.f32 %v1489_v2, %v1881_v40  ;;  %v774_v5 = vadd.f32 %v1521_v3, %v1881_v40 }
 0x11f   : > { %v637_v6 = vpop.f32.mrf.mxu0  ;;  %v765_v7 = vpop.f32.mrf.mxu1 }
 0x120   : > { %833 = vst.msk [vmem:[%s1885_s27 + $0xb8] sm:$0xff] %vm809_vm0, %v646_v4  ;;  %865 = vst.msk [vmem:[%s1885_s27 + $0x1b8] sm:$0xff] %vm809_vm0, %v774_v5  ;;  %v638_v8 = vadd.f32 %v1881_v40, %v637_v6  ;;  %v766_v9 = vadd.f32 %v1881_v40, %v765_v7 }
 0x121   : > { %v1492_v10 = vpop.f32.mrf.mxu0  ;;  %v1524_v11 = vpop.f32.mrf.mxu1 }
 0x122   : > { %831 = vst.msk [vmem:[%s1885_s27 + $0xa8] sm:$0xff] %vm809_vm0, %v638_v8  ;;  %863 = vst.msk [vmem:[%s1885_s27 + $0x1a8] sm:$0xff] %vm809_vm0, %v766_v9  ;;  %v659_v12 = vadd.f32 %v1492_v10, %v1881_v40  ;;  %v787_v13 = vadd.f32 %v1524_v11, %v1881_v40 }
 0x123   : > { %v650_v14 = vpop.f32.mrf.mxu0  ;;  %v778_v15 = vpop.f32.mrf.mxu1 }
 0x124   : > { %836 = vst.msk [vmem:[%s1885_s27 + $0xd0] sm:$0xff] %vm809_vm0, %v659_v12  ;;  %868 = vst.msk [vmem:[%s1885_s27 + $0x1d0] sm:$0xff] %vm809_vm0, %v787_v13  ;;  %v651_v16 = vadd.f32 %v1881_v40, %v650_v14  ;;  %v779_v17 = vadd.f32 %v1881_v40, %v778_v15 }
 0x125   : > { %v1493_v18 = vpop.f32.mrf.mxu0  ;;  %v1525_v19 = vpop.f32.mrf.mxu1 }
 0x126   : > { %834 = vst.msk [vmem:[%s1885_s27 + $0xc0] sm:$0xff] %vm809_vm0, %v651_v16  ;;  %866 = vst.msk [vmem:[%s1885_s27 + $0x1c0] sm:$0xff] %vm809_vm0, %v779_v17  ;;  %v662_v20 = vadd.f32 %v1493_v18, %v1881_v40  ;;  %v790_v21 = vadd.f32 %v1525_v19, %v1881_v40 }
 0x127   : > { %v653_v22 = vpop.f32.mrf.mxu0  ;;  %v781_v23 = vpop.f32.mrf.mxu1 }
 0x128   : > { %837 = vst.msk [vmem:[%s1885_s27 + $0xd8] sm:$0xff] %vm809_vm0, %v662_v20  ;;  %869 = vst.msk [vmem:[%s1885_s27 + $0x1d8] sm:$0xff] %vm809_vm0, %v790_v21  ;;  %v654_v24 = vadd.f32 %v1881_v40, %v653_v22  ;;  %v782_v25 = vadd.f32 %v1881_v40, %v781_v23 }
 0x129   : > { %v1496_v26 = vpop.f32.mrf.mxu0  ;;  %v1528_v27 = vpop.f32.mrf.mxu1 }
 0x12a   : > { %835 = vst.msk [vmem:[%s1885_s27 + $0xc8] sm:$0xff] %vm809_vm0, %v654_v24  ;;  %867 = vst.msk [vmem:[%s1885_s27 + $0x1c8] sm:$0xff] %vm809_vm0, %v782_v25  ;;  %v675_v28 = vadd.f32 %v1496_v26, %v1881_v40  ;;  %v803_v29 = vadd.f32 %v1528_v27, %v1881_v40 }
 0x12b   : > { %v666_v30 = vpop.f32.mrf.mxu0  ;;  %v794_v31 = vpop.f32.mrf.mxu1 }
 0x12c   : > { %840 = vst.msk [vmem:[%s1885_s27 + $0xf0] sm:$0xff] %vm809_vm0, %v675_v28  ;;  %872 = vst.msk [vmem:[%s1885_s27 + $0x1f0] sm:$0xff] %vm809_vm0, %v803_v29  ;;  %v667_v32 = vadd.f32 %v1881_v40, %v666_v30  ;;  %v795_v33 = vadd.f32 %v1881_v40, %v794_v31 }
 0x12d   : > { %v1497_v34 = vpop.f32.mrf.mxu0  ;;  %v1529_v35 = vpop.f32.mrf.mxu1 }
 0x12e   : > { %838 = vst.msk [vmem:[%s1885_s27 + $0xe0] sm:$0xff] %vm809_vm0, %v667_v32  ;;  %870 = vst.msk [vmem:[%s1885_s27 + $0x1e0] sm:$0xff] %vm809_vm0, %v795_v33  ;;  %v678_v36 = vadd.f32 %v1497_v34, %v1881_v40  ;;  %v806_v37 = vadd.f32 %v1529_v35, %v1881_v40  ;;  %880 = sbr.rel (!%p1807_p4) target bundleno = 371 (0x173), region = 36 }
 0x12f   : > { %v669_v38 = vpop.f32.mrf.mxu0  ;;  %v797_v39 = vpop.f32.mrf.mxu1 }
 0x130   : > { %841 = vst.msk [vmem:[%s1885_s27 + $0xf8] sm:$0xff] %vm809_vm0, %v678_v36  ;;  %873 = vst.msk [vmem:[%s1885_s27 + $0x1f8] sm:$0xff] %vm809_vm0, %v806_v37  ;;  %v670_v41 = vadd.f32 %v1881_v40, %v669_v38  ;;  %v798_v42 = vadd.f32 %v1881_v40, %v797_v39 }
 0x132   : > { %839 = vst.msk [vmem:[%s1885_s27 + $0xe8] sm:$0xff] %vm809_vm0, %v670_v41  ;;  %871 = vst.msk [vmem:[%s1885_s27 + $0x1e8] sm:$0xff] %vm809_vm0, %v798_v42 }
 0x133   : > { %s2297_s12 = smov (!%p883_p8, %s882_s12), 64 }
 0x134   : > { %s1392_s5 = sshll.u32 %s2297_s12, 7 }
 0x135   : > { %p1395_p9 = scmp.eq.s32.totalorder %s1392_s5, 0 }
 0x136   : > { %s2090_s6 = sshrl.u32 (!%p1395_p9), %s2297_s12, 6 }
 0x137   : > { %891 = sbr.rel (%p1395_p9) target bundleno = 371 (0x173), region = 40  ;;  %p1396_p10 = scmp.le.s32.totalorder (!%p1395_p9), %s2090_s6, 0 }
 0x13c   : > { %1298 = sbr.rel (%p1396_p10) target bundleno = 354 (0x162), region = 116  ;;  %s2288_s15 = smov (!%p1396_p10), %s2084_s4 }
 0x13d   : > { %s2289_s20 = smov (!%p1396_p10), %s1885_s27  ;;  %s2099_s23 = smov (!%p1396_p10), 0  }
 0x13e   : > { %s2101_s7 = smov (!%p1396_p10), 0  }
 0x141 LB: >> { %v1080_v40 = vld [vmem:[%s1736_s20] sm:$0xff]  ;;  %v1082_v43 = vld [vmem:[%s1736_s20 + $0x8] sm:$0xff]  ;;  %v1084_v44 = vld [vmem:[%s1736_s20 + $0x10] sm:$0xff]  ;;  %s1208_s8 = sadd.s32 1, %s1740_s23  ;;  %s1074_s7 = sadd.s32 1, %s1744_s7   ;;  %s1744_s7 = sphi %s2101_s7, %s1074_s7   ;;  %s1740_s23 = sphi %s2099_s23, %s2292_s23   ;;  %s1736_s20 = sphi %s2289_s20, %s2291_s20   ;;  %s1732_s15 = sphi %s2288_s15, %s2290_s15  }
 0x142   : >> { %1081 = vst [vmem:[%s1732_s15] sm:$0xff] %v1080_v40  ;;  %1083 = vst [vmem:[%s1732_s15 + $0x8] sm:$0xff] %v1082_v43  ;;  %v1086_v45 = vld [vmem:[%s1736_s20 + $0x18] sm:$0xff]  ;;  %v1088_v46 = vld [vmem:[%s1736_s20 + $0x20] sm:$0xff]  ;;  %p1209_p11 = scmp.ge.s32.totalorder %s1208_s8, %s2090_s6  ;;  %p1073_p12 = scmp.ge.s32.totalorder %s1074_s7, %s2090_s6 }
 0x143   : >> { %1085 = vst [vmem:[%s1732_s15 + $0x10] sm:$0xff] %v1084_v44  ;;  %v1090_v47 = vld [vmem:[%s1736_s20 + $0x28] sm:$0xff]  ;;  %1087 = vst [vmem:[%s1732_s15 + $0x18] sm:$0xff] %v1086_v45  ;;  %v1092_v48 = vld [vmem:[%s1736_s20 + $0x30] sm:$0xff] }
 0x144   : >> { %1089 = vst [vmem:[%s1732_s15 + $0x20] sm:$0xff] %v1088_v46  ;;  %1091 = vst [vmem:[%s1732_s15 + $0x28] sm:$0xff] %v1090_v47  ;;  %v1094_v49 = vld [vmem:[%s1736_s20 + $0x38] sm:$0xff]  ;;  %v1096_v50 = vld [vmem:[%s1736_s20 + $0x40] sm:$0xff]  ;;  %s2299_s8 = smov (%p1209_p11, %s1208_s8), 0 }
 0x145   : >> { %1093 = vst [vmem:[%s1732_s15 + $0x30] sm:$0xff] %v1092_v48  ;;  %1095 = vst [vmem:[%s1732_s15 + $0x38] sm:$0xff] %v1094_v49  ;;  %v1098_v51 = vld [vmem:[%s1736_s20 + $0x48] sm:$0xff]  ;;  %v1100_v52 = vld [vmem:[%s1736_s20 + $0x50] sm:$0xff]  ;;  %s1397_s9 = sshll.u32 %s2299_s8, 9  ;;  %s2292_s23 = smov %s2299_s8 }
 0x146   : >> { %1097 = vst [vmem:[%s1732_s15 + $0x40] sm:$0xff] %v1096_v50  ;;  %v1102_v53 = vld [vmem:[%s1736_s20 + $0x58] sm:$0xff]  ;;  %1099 = vst [vmem:[%s1732_s15 + $0x48] sm:$0xff] %v1098_v51  ;;  %v1104_v54 = vld [vmem:[%s1736_s20 + $0x60] sm:$0xff]  ;;  %s2157_s10 = scalar_lea.vmem %s1885_s27, %s1397_s9 [#allocation2]   ;;  %s2160_s11 = scalar_lea.vmem %s2084_s4, %s1397_s9  }
 0x147   : >> { %1101 = vst [vmem:[%s1732_s15 + $0x50] sm:$0xff] %v1100_v52  ;;  %1103 = vst [vmem:[%s1732_s15 + $0x58] sm:$0xff] %v1102_v53  ;;  %v1106_v55 = vld [vmem:[%s1736_s20 + $0x68] sm:$0xff]  ;;  %v1108_v56 = vld [vmem:[%s1736_s20 + $0x70] sm:$0xff] }
 0x148   : >> { %1105 = vst [vmem:[%s1732_s15 + $0x60] sm:$0xff] %v1104_v54  ;;  %1107 = vst [vmem:[%s1732_s15 + $0x68] sm:$0xff] %v1106_v55  ;;  %v1110_v57 = vld [vmem:[%s1736_s20 + $0x78] sm:$0xff]  ;;  %v1112_v58 = vld [vmem:[%s1736_s20 + $0x80] sm:$0xff] }
 0x149   : >> { %1109 = vst [vmem:[%s1732_s15 + $0x70] sm:$0xff] %v1108_v56  ;;  %v1114_v59 = vld [vmem:[%s1736_s20 + $0x88] sm:$0xff]  ;;  %1111 = vst [vmem:[%s1732_s15 + $0x78] sm:$0xff] %v1110_v57  ;;  %v1116_v60 = vld [vmem:[%s1736_s20 + $0x90] sm:$0xff] }
 0x14a   : >> { %1113 = vst [vmem:[%s1732_s15 + $0x80] sm:$0xff] %v1112_v58  ;;  %1115 = vst [vmem:[%s1732_s15 + $0x88] sm:$0xff] %v1114_v59  ;;  %v1118_v61 = vld [vmem:[%s1736_s20 + $0x98] sm:$0xff]  ;;  %v1120_v62 = vld [vmem:[%s1736_s20 + $0xa0] sm:$0xff] }
 0x14b   : >> { %1117 = vst [vmem:[%s1732_s15 + $0x90] sm:$0xff] %v1116_v60  ;;  %1119 = vst [vmem:[%s1732_s15 + $0x98] sm:$0xff] %v1118_v61  ;;  %v1122_v63 = vld [vmem:[%s1736_s20 + $0xa8] sm:$0xff]  ;;  %v1124_v0 = vld [vmem:[%s1736_s20 + $0xb0] sm:$0xff] }
 0x14c   : >> { %1121 = vst [vmem:[%s1732_s15 + $0xa0] sm:$0xff] %v1120_v62  ;;  %v1126_v1 = vld [vmem:[%s1736_s20 + $0xb8] sm:$0xff]  ;;  %1123 = vst [vmem:[%s1732_s15 + $0xa8] sm:$0xff] %v1122_v63  ;;  %v1128_v2 = vld [vmem:[%s1736_s20 + $0xc0] sm:$0xff] }
 0x14d   : >> { %1125 = vst [vmem:[%s1732_s15 + $0xb0] sm:$0xff] %v1124_v0  ;;  %1127 = vst [vmem:[%s1732_s15 + $0xb8] sm:$0xff] %v1126_v1  ;;  %v1130_v3 = vld [vmem:[%s1736_s20 + $0xc8] sm:$0xff]  ;;  %v1132_v4 = vld [vmem:[%s1736_s20 + $0xd0] sm:$0xff] }
 0x14e   : >> { %1129 = vst [vmem:[%s1732_s15 + $0xc0] sm:$0xff] %v1128_v2  ;;  %1131 = vst [vmem:[%s1732_s15 + $0xc8] sm:$0xff] %v1130_v3  ;;  %v1134_v5 = vld [vmem:[%s1736_s20 + $0xd8] sm:$0xff]  ;;  %v1136_v6 = vld [vmem:[%s1736_s20 + $0xe0] sm:$0xff] }
 0x14f   : >> { %1133 = vst [vmem:[%s1732_s15 + $0xd0] sm:$0xff] %v1132_v4  ;;  %v1138_v7 = vld [vmem:[%s1736_s20 + $0xe8] sm:$0xff]  ;;  %1135 = vst [vmem:[%s1732_s15 + $0xd8] sm:$0xff] %v1134_v5  ;;  %v1140_v8 = vld [vmem:[%s1736_s20 + $0xf0] sm:$0xff] }
 0x150   : >> { %1137 = vst [vmem:[%s1732_s15 + $0xe0] sm:$0xff] %v1136_v6  ;;  %1139 = vst [vmem:[%s1732_s15 + $0xe8] sm:$0xff] %v1138_v7  ;;  %v1142_v9 = vld [vmem:[%s1736_s20 + $0xf8] sm:$0xff]  ;;  %v1144_v10 = vld [vmem:[%s1736_s20 + $0x100] sm:$0xff] }
 0x151   : >> { %1141 = vst [vmem:[%s1732_s15 + $0xf0] sm:$0xff] %v1140_v8  ;;  %1143 = vst [vmem:[%s1732_s15 + $0xf8] sm:$0xff] %v1142_v9  ;;  %v1146_v11 = vld [vmem:[%s1736_s20 + $0x108] sm:$0xff]  ;;  %v1148_v12 = vld [vmem:[%s1736_s20 + $0x110] sm:$0xff] }
 0x152   : >> { %1145 = vst [vmem:[%s1732_s15 + $0x100] sm:$0xff] %v1144_v10  ;;  %v1150_v13 = vld [vmem:[%s1736_s20 + $0x118] sm:$0xff]  ;;  %1147 = vst [vmem:[%s1732_s15 + $0x108] sm:$0xff] %v1146_v11  ;;  %v1152_v14 = vld [vmem:[%s1736_s20 + $0x120] sm:$0xff] }
 0x153   : >> { %1149 = vst [vmem:[%s1732_s15 + $0x110] sm:$0xff] %v1148_v12  ;;  %1151 = vst [vmem:[%s1732_s15 + $0x118] sm:$0xff] %v1150_v13  ;;  %v1154_v15 = vld [vmem:[%s1736_s20 + $0x128] sm:$0xff]  ;;  %v1156_v16 = vld [vmem:[%s1736_s20 + $0x130] sm:$0xff] }
 0x154   : >> { %1153 = vst [vmem:[%s1732_s15 + $0x120] sm:$0xff] %v1152_v14  ;;  %1155 = vst [vmem:[%s1732_s15 + $0x128] sm:$0xff] %v1154_v15  ;;  %v1158_v17 = vld [vmem:[%s1736_s20 + $0x138] sm:$0xff]  ;;  %v1160_v18 = vld [vmem:[%s1736_s20 + $0x140] sm:$0xff] }
 0x155   : >> { %1157 = vst [vmem:[%s1732_s15 + $0x130] sm:$0xff] %v1156_v16  ;;  %v1162_v19 = vld [vmem:[%s1736_s20 + $0x148] sm:$0xff]  ;;  %1159 = vst [vmem:[%s1732_s15 + $0x138] sm:$0xff] %v1158_v17  ;;  %v1164_v20 = vld [vmem:[%s1736_s20 + $0x150] sm:$0xff] }
 0x156   : >> { %1161 = vst [vmem:[%s1732_s15 + $0x140] sm:$0xff] %v1160_v18  ;;  %1163 = vst [vmem:[%s1732_s15 + $0x148] sm:$0xff] %v1162_v19  ;;  %v1166_v21 = vld [vmem:[%s1736_s20 + $0x158] sm:$0xff]  ;;  %v1168_v22 = vld [vmem:[%s1736_s20 + $0x160] sm:$0xff] }
 0x157   : >> { %1165 = vst [vmem:[%s1732_s15 + $0x150] sm:$0xff] %v1164_v20  ;;  %1167 = vst [vmem:[%s1732_s15 + $0x158] sm:$0xff] %v1166_v21  ;;  %v1170_v23 = vld [vmem:[%s1736_s20 + $0x168] sm:$0xff]  ;;  %v1172_v24 = vld [vmem:[%s1736_s20 + $0x170] sm:$0xff] }
 0x158   : >> { %1169 = vst [vmem:[%s1732_s15 + $0x160] sm:$0xff] %v1168_v22  ;;  %v1174_v25 = vld [vmem:[%s1736_s20 + $0x178] sm:$0xff]  ;;  %1171 = vst [vmem:[%s1732_s15 + $0x168] sm:$0xff] %v1170_v23  ;;  %v1176_v26 = vld [vmem:[%s1736_s20 + $0x180] sm:$0xff] }
 0x159   : >> { %1173 = vst [vmem:[%s1732_s15 + $0x170] sm:$0xff] %v1172_v24  ;;  %1175 = vst [vmem:[%s1732_s15 + $0x178] sm:$0xff] %v1174_v25  ;;  %v1178_v27 = vld [vmem:[%s1736_s20 + $0x188] sm:$0xff]  ;;  %v1180_v28 = vld [vmem:[%s1736_s20 + $0x190] sm:$0xff] }
 0x15a   : >> { %1177 = vst [vmem:[%s1732_s15 + $0x180] sm:$0xff] %v1176_v26  ;;  %1179 = vst [vmem:[%s1732_s15 + $0x188] sm:$0xff] %v1178_v27  ;;  %v1182_v29 = vld [vmem:[%s1736_s20 + $0x198] sm:$0xff]  ;;  %v1184_v30 = vld [vmem:[%s1736_s20 + $0x1a0] sm:$0xff] }
 0x15b   : >> { %1181 = vst [vmem:[%s1732_s15 + $0x190] sm:$0xff] %v1180_v28  ;;  %v1186_v31 = vld [vmem:[%s1736_s20 + $0x1a8] sm:$0xff]  ;;  %1183 = vst [vmem:[%s1732_s15 + $0x198] sm:$0xff] %v1182_v29  ;;  %v1188_v32 = vld [vmem:[%s1736_s20 + $0x1b0] sm:$0xff] }
 0x15c   : >> { %1185 = vst [vmem:[%s1732_s15 + $0x1a0] sm:$0xff] %v1184_v30  ;;  %1187 = vst [vmem:[%s1732_s15 + $0x1a8] sm:$0xff] %v1186_v31  ;;  %v1190_v33 = vld [vmem:[%s1736_s20 + $0x1b8] sm:$0xff]  ;;  %v1192_v34 = vld [vmem:[%s1736_s20 + $0x1c0] sm:$0xff] }
 0x15d   : >> { %1189 = vst [vmem:[%s1732_s15 + $0x1b0] sm:$0xff] %v1188_v32  ;;  %1191 = vst [vmem:[%s1732_s15 + $0x1b8] sm:$0xff] %v1190_v33  ;;  %v1194_v35 = vld [vmem:[%s1736_s20 + $0x1c8] sm:$0xff]  ;;  %v1196_v36 = vld [vmem:[%s1736_s20 + $0x1d0] sm:$0xff]  ;;  %1076 = sbr.rel (!%p1073_p12) target bundleno = 321 (0x141), region = 122 }
 0x15e   : >> { %1193 = vst [vmem:[%s1732_s15 + $0x1c0] sm:$0xff] %v1192_v34  ;;  %v1198_v37 = vld [vmem:[%s1736_s20 + $0x1d8] sm:$0xff]  ;;  %1195 = vst [vmem:[%s1732_s15 + $0x1c8] sm:$0xff] %v1194_v35  ;;  %v1200_v38 = vld [vmem:[%s1736_s20 + $0x1e0] sm:$0xff] }
 0x15f   : >> { %1197 = vst [vmem:[%s1732_s15 + $0x1d0] sm:$0xff] %v1196_v36  ;;  %1199 = vst [vmem:[%s1732_s15 + $0x1d8] sm:$0xff] %v1198_v37  ;;  %v1202_v39 = vld [vmem:[%s1736_s20 + $0x1e8] sm:$0xff]  ;;  %v1204_v41 = vld [vmem:[%s1736_s20 + $0x1f0] sm:$0xff] }
 0x160   : >> { %1201 = vst [vmem:[%s1732_s15 + $0x1e0] sm:$0xff] %v1200_v38  ;;  %1203 = vst [vmem:[%s1732_s15 + $0x1e8] sm:$0xff] %v1202_v39  ;;  %v1206_v42 = vld [vmem:[%s1736_s20 + $0x1f8] sm:$0xff]  ;;  %s2291_s20 = smov %s2157_s10 }
 0x161   : >> { %1205 = vst [vmem:[%s1732_s15 + $0x1f0] sm:$0xff] %v1204_v41  ;;  %1207 = vst [vmem:[%s1732_s15 + $0x1f8] sm:$0xff] %v1206_v42  ;;  %s2290_s15 = smov %s2160_s11 }
 0x162 PF: > { %s2265_s14 = sand.u32 63, %s2297_s12   ;;  %s1408_s17 = sshll.u32 %s2090_s6, 9 }
 0x163   : > { %s1219_s18 = scalar_lea.vmem %s1885_s27, %s1408_s17 [#allocation2]   ;;  %s1221_s21 = scalar_lea.vmem %s2084_s4, %s1408_s17  }
 0x164   : > { %p1402_p13 = scmp.le.s32.totalorder %s2265_s14, 0 }
 0x165   : > { %s1746_s22 = smov (!%p1402_p13), %s1221_s21   ;;  %s1750_s24 = smov (!%p1402_p13), %s1219_s18  }
 0x166   : > { %1312 = sbr.rel (%p1402_p13) target bundleno = 371 (0x173), region = 127  ;;  %s1754_s25 = smov (!%p1402_p13), 0  }
 0x167   : > { %s1758_s26 = smov (!%p1402_p13), 0  }
 0x16b LB: >> { %v1231_v40 = vld [vmem:[%s1752_s24] sm:$0xff]  ;;  %s1233_s12 = sadd.s32 1, %s1756_s25  ;;  %s1225_s26 = sadd.s32 1, %s1760_s26   ;;  %s1760_s26 = sphi %s1758_s26, %s1225_s26   ;;  %s1756_s25 = sphi %s1754_s25, %s1755_s25   ;;  %s1752_s24 = sphi %s1750_s24, %s1238_s24   ;;  %s1748_s22 = sphi %s1746_s22, %s1239_s22  }
 0x16c   : >> { %1232 = vst [vmem:[%s1748_s22] sm:$0xff] %v1231_v40  ;;  %p1234_p0 = scmp.ge.s32.totalorder %s1233_s12, %s2265_s14  ;;  %p1224_p1 = scmp.ge.s32.totalorder %s1225_s26, %s2265_s14 }
 0x16e   : >> { %s2301_s12 = smov (%p1234_p0, %s1233_s12), 0  ;;  %1227 = sbr.rel (!%p1224_p1) target bundleno = 363 (0x16b), region = 133 }
 0x16f   : >> { %s1403_s27 = sshll.u32 %s2301_s12, 3  ;;  %s1755_s25 = smov %s2301_s12  }
 0x170   : >> { %s1238_s24 = scalar_lea.vmem %s1219_s18, %s1403_s27 [#allocation2]   ;;  %s1239_s22 = scalar_lea.vmem %s1221_s21, %s1403_s27  }
 0x173 PF: > { %p10_p2 = scmp.ge.s32.totalorder %s1797_s16, 7   ;;  %s2293_s12 = smov %s1724_s13 }
 0x174   : > { %s2294_s13 = smov %s1805_s19  ;;  %s2295_s14 = smov %s1797_s16 }
 0x175   :  { %12 = sbr.rel (!%p10_p2) target bundleno = 2 (0x2), region = 144 }

</bundles_post_ra>
